<compile_context>
chip_gen: v5e
topology: v5e:2x2
jax: 0.10.0
libtpu: 0.0.40
codegen_flags: <defaults>
</compile_context>

<pallas_src>
import math

import jax
import jax.numpy as jnp
from jax import lax
from jax.experimental import pallas as pl
from jax.experimental.pallas import tpu as pltpu

# Synthetic symbol table (stands in for text.symbols in the original repo).
symbols = [chr(ord("a") + i) for i in range(16)]   # vocab = 16, index 0 = pad

KSIZE = 5
PAD = KSIZE // 2            # 'same' padding for each conv layer
BN_EPS = 1e-5


# ---------------------------------------------------------------------------
# Fused Pallas kernel: embed -> (conv + bias + relu) x3 -> projection
# ---------------------------------------------------------------------------
def encoder_prenet_kernel(
    tok_ref,                 # (1, L, 1) int32   token ids for this batch element
    emb_ref,                 # (V, E)    bf16    embedding table (row 0 is zero)
    w1_ref, b1_ref,          # (K*E, H)  bf16 (BN scale folded), (1, H) f32
    w2_ref, b2_ref,          # (K*H, H)  bf16, (1, H) f32
    w3_ref, b3_ref,          # (K*H, H)  bf16, (1, H) f32
    wp_ref, bp_ref,          # (H, H)    bf16, (1, H) f32
    o_ref,                   # (1, L, H) output tile
    xpad_ref,                # (L + 2*PAD, E) bf16 VMEM scratch (layer-1 input)
    hpad_ref,                # (L + 2*PAD, H) bf16 VMEM scratch (layer-2/3 input)
):
    L = o_ref.shape[1]
    H = o_ref.shape[2]
    V, E = emb_ref.shape

    # Per-layer 'same' zero padding lives in the scratch halos: zero the slabs,
    # then only ever write the central L rows.  This matches PyTorch's per-conv
    # zero padding exactly (the previous single-halo scheme did not).
    xpad_ref[...] = jnp.zeros(xpad_ref.shape, xpad_ref.dtype)
    hpad_ref[...] = jnp.zeros(hpad_ref.shape, hpad_ref.dtype)

    # Fused embedding: one-hot (L, V) x (V, E) MXU matmul == exact gather.
    tok = tok_ref[0]                                              # (L, 1) int32
    onehot = (tok == lax.broadcasted_iota(jnp.int32, (L, V), 1)).astype(emb_ref.dtype)
    x = jnp.dot(onehot, emb_ref[...], preferred_element_type=jnp.float32)
    xpad_ref[pl.ds(PAD, L), :] = x.astype(xpad_ref.dtype)

    def conv_bias_relu(inp_ref, cin, w_ref, b_ref):
        # 5-tap accumulation straight from the zero-haloed bf16 VMEM slab
        # (no im2col concat / lane shuffles); f32 accumulation and epilogue.
        acc = jnp.dot(inp_ref[pl.ds(0, L), :],
                      w_ref[pl.ds(0, cin), :],
                      preferred_element_type=jnp.float32)
        for k in range(1, KSIZE):
            acc += jnp.dot(inp_ref[pl.ds(k, L), :],
                           w_ref[pl.ds(k * cin, cin), :],
                           preferred_element_type=jnp.float32)
        return jnp.maximum(acc + b_ref[...], 0.0)                 # (L, H) f32

    h = conv_bias_relu(xpad_ref, E, w1_ref, b1_ref)
    hpad_ref[pl.ds(PAD, L), :] = h.astype(hpad_ref.dtype)
    h = conv_bias_relu(hpad_ref, H, w2_ref, b2_ref)
    hpad_ref[pl.ds(PAD, L), :] = h.astype(hpad_ref.dtype)
    h = conv_bias_relu(hpad_ref, H, w3_ref, b3_ref)

    # Fused projection epilogue (no HBM round trip of the activation).
    out = jnp.dot(h.astype(wp_ref.dtype), wp_ref[...],
                  preferred_element_type=jnp.float32) + bp_ref[...]
    o_ref[0] = out.astype(o_ref.dtype)


# ---------------------------------------------------------------------------
# Wrapper
# ---------------------------------------------------------------------------
def encoder_prenet_pallas(tokens, params, *, out_dtype=jnp.float32):
    """tokens: (B, L) int32 -> (B, L, H) out_dtype."""
    B, L = tokens.shape
    emb = params["emb"]
    V, E = emb.shape
    H = params["proj_w"].shape[-1]
    c1, c2, c3 = params["convs"]
    # TODO(synk): for very long sequences (L >> 4K) switch to a (B, L/TL) grid
    # with per-tile halos + boundary masks to keep VMEM residency O(TL).

    const = lambda b: (0, 0)
    return pl.pallas_call(
        encoder_prenet_kernel,
        out_shape=jax.ShapeDtypeStruct((B, L, H), out_dtype),
        grid=(B,),
        in_specs=[
            pl.BlockSpec((1, L, 1), lambda b: (b, 0, 0)),
            pl.BlockSpec((V, E), const),
            pl.BlockSpec((KSIZE * E, H), const), pl.BlockSpec((1, H), const),
            pl.BlockSpec((KSIZE * H, H), const), pl.BlockSpec((1, H), const),
            pl.BlockSpec((KSIZE * H, H), const), pl.BlockSpec((1, H), const),
            pl.BlockSpec((H, H), const), pl.BlockSpec((1, H), const),
        ],
        out_specs=pl.BlockSpec((1, L, H), lambda b: (b, 0, 0)),
        scratch_shapes=[
            pltpu.VMEM((L + 2 * PAD, E), jnp.bfloat16),
            pltpu.VMEM((L + 2 * PAD, H), jnp.bfloat16),
        ],
        compiler_params=pltpu.CompilerParams(
            # No cross-iteration scratch dependency -> batch axis fully parallel
            # (megacore-shardable on v7x).
            dimension_semantics=("parallel",),
            vmem_limit_bytes=32 * 1024 * 1024,
        ),
    )(
        tokens[..., None].astype(jnp.int32),
        emb,
        c1["w"], c1["bias"],
        c2["w"], c2["bias"],
        c3["w"], c3["bias"],
        params["proj_w"], params["proj_b"],
    )


# ---------------------------------------------------------------------------
# Parameter construction (mirrors the PyTorch __init__ shapes / inits)
# ---------------------------------------------------------------------------
def xavier_uniform(key, shape, fan_in, fan_out, gain):
    a = gain * math.sqrt(6.0 / (fan_in + fan_out))
    return jax.random.uniform(key, shape, jnp.float32, -a, a)


def init_params(key, embedding_size, num_hidden):
    vocab = len(symbols)
    keys = jax.random.split(key, 10)
    relu_gain = math.sqrt(2.0)
    bn_scale = 1.0 / math.sqrt(1.0 + BN_EPS)    # eval-mode BN, fresh running stats

    # Embedding (padding_idx=0 row is zero); stored bf16.
    emb = jax.random.normal(keys[0], (vocab, embedding_size), jnp.float32)
    emb = emb.at[0].set(0.0)
    params = {"emb": emb.astype(jnp.bfloat16), "convs": []}

    cin = embedding_size
    for i in range(3):
        # PyTorch conv weight (Cout, Cin, K), xavier_uniform(gain='relu').
        fan_in, fan_out = cin * KSIZE, num_hidden * KSIZE
        w_t = xavier_uniform(keys[1 + 2 * i], (num_hidden, cin, KSIZE),
                             fan_in, fan_out, relu_gain)
        bound = 1.0 / math.sqrt(fan_in)
        b_conv = jax.random.uniform(keys[2 + 2 * i], (num_hidden,),
                                    jnp.float32, -bound, bound)
        # (Cout, Cin, K) -> (K, Cin, Cout) -> (K*Cin, Cout); fold BN scale into
        # the weights in f32 BEFORE the bf16 cast (bias+ReLU epilogue only).
        w = jnp.transpose(w_t, (2, 1, 0)).reshape(KSIZE * cin, num_hidden)
        params["convs"].append({
            "w": (w * bn_scale).astype(jnp.bfloat16),
            "bias": (b_conv * bn_scale)[None, :],          # f32 (1, H)
        })
        cin = num_hidden

    # Projection Linear (out, in), xavier_uniform(gain=1) -> stored (in, out).
    wp_t = xavier_uniform(keys[7], (num_hidden, num_hidden),
                          num_hidden, num_hidden, 1.0)
    bound = 1.0 / math.sqrt(num_hidden)
    bp = jax.random.uniform(keys[8], (num_hidden,), jnp.float32, -bound, bound)
    params["proj_w"] = wp_t.T.astype(jnp.bfloat16)
    params["proj_b"] = bp[None, :]
    return params


# ---------------------------------------------------------------------------
# Full forward (Pallas) and an independent pure-JAX reference
# ---------------------------------------------------------------------------
@jax.jit
def encoder_prenet(tokens, params):
    return encoder_prenet_pallas(tokens, params)


def encoder_prenet_ref(tokens, params):
    """Pure-JAX reference matching the kernel's cast points (eval-mode module)."""
    x = jnp.take(params["emb"], tokens, axis=0).astype(jnp.float32)   # (B, L, E)
    for layer in params["convs"]:
        kcin, cout = layer["w"].shape
        w = layer["w"].reshape(KSIZE, kcin // KSIZE, cout).astype(jnp.float32)
        xin = x.astype(jnp.bfloat16).astype(jnp.float32)              # bf16 MXU inputs
        y = lax.conv_general_dilated(
            xin, w, window_strides=(1,), padding=[(PAD, PAD)],
            dimension_numbers=("NWC", "WIO", "NWC"))
        x = jnp.maximum(y + layer["bias"], 0.0)
    xin = x.astype(jnp.bfloat16).astype(jnp.float32)
    return xin @ params["proj_w"].astype(jnp.float32) + params["proj_b"]


# TODO(synk): training-mode dropout / batch-statistics BatchNorm are not
# emulated (inference semantics: dropout = identity, BN = folded running stats).

if __name__ == "__main__":
    B, L = 2, 256
    embedding_size, num_hidden = 128, 128   # lane-aligned channel widths

    key = jax.random.PRNGKey(0)
    k_tok, k_param = jax.random.split(key)
    tokens = jax.random.randint(k_tok, (B, L), 0, len(symbols), dtype=jnp.int32)
    params = init_params(k_param, embedding_size, num_hidden)

    out = jax.block_until_ready(encoder_prenet(tokens, params))
    ref = encoder_prenet_ref(tokens, params)

    assert out.shape == (B, L, num_hidden)
    max_err = float(jnp.max(jnp.abs(out - ref)))
    assert jnp.allclose(out, ref, atol=1e-2, rtol=1e-2), (
        f"mismatch vs reference (max abs err {max_err})")

    print("KERNEL_OK")
</pallas_src>

<mosaic_0001>
module attributes {stable_mosaic.version = 11 : i64} {
  func.func @encoder_prenet_kernel(%arg0: i32, %arg1: memref<1x256x1xi32, #tpu.memory_space<vmem>>, %arg2: memref<16x128xbf16, #tpu.memory_space<vmem>>, %arg3: memref<640x128xbf16, #tpu.memory_space<vmem>>, %arg4: memref<1x128xf32, #tpu.memory_space<vmem>>, %arg5: memref<640x128xbf16, #tpu.memory_space<vmem>>, %arg6: memref<1x128xf32, #tpu.memory_space<vmem>>, %arg7: memref<640x128xbf16, #tpu.memory_space<vmem>>, %arg8: memref<1x128xf32, #tpu.memory_space<vmem>>, %arg9: memref<128x128xbf16, #tpu.memory_space<vmem>>, %arg10: memref<1x128xf32, #tpu.memory_space<vmem>>, %arg11: memref<1x256x128xf32, #tpu.memory_space<vmem>>, %arg12: memref<260x128xbf16, #tpu.memory_space<vmem>>, %arg13: memref<260x128xbf16, #tpu.memory_space<vmem>>) attributes {dimension_semantics = [#tpu.dimension_semantics<parallel>], iteration_bounds = array<i64: 2>, scalar_prefetch = 0 : i64, scratch_operands = 2 : i64, tpu.core_type = #tpu.core_type<tc>, window_params = [{transform_indices = @transform_0, window_bounds = array<i64: 1, 256, 1>}, {pipeline_mode = #tpu.pipeline_mode<synchronous>, transform_indices = @transform_1, window_bounds = array<i64: 16, 128>}, {pipeline_mode = #tpu.pipeline_mode<synchronous>, transform_indices = @transform_2, window_bounds = array<i64: 640, 128>}, {pipeline_mode = #tpu.pipeline_mode<synchronous>, transform_indices = @transform_3, window_bounds = array<i64: 1, 128>}, {pipeline_mode = #tpu.pipeline_mode<synchronous>, transform_indices = @transform_4, window_bounds = array<i64: 640, 128>}, {pipeline_mode = #tpu.pipeline_mode<synchronous>, transform_indices = @transform_5, window_bounds = array<i64: 1, 128>}, {pipeline_mode = #tpu.pipeline_mode<synchronous>, transform_indices = @transform_6, window_bounds = array<i64: 640, 128>}, {pipeline_mode = #tpu.pipeline_mode<synchronous>, transform_indices = @transform_7, window_bounds = array<i64: 1, 128>}, {pipeline_mode = #tpu.pipeline_mode<synchronous>, transform_indices = @transform_8, window_bounds = array<i64: 128, 128>}, {pipeline_mode = #tpu.pipeline_mode<synchronous>, transform_indices = @transform_9, window_bounds = array<i64: 1, 128>}, {transform_indices = @transform_10, window_bounds = array<i64: 1, 256, 128>}]} {
    %cst = arith.constant 0.000000e+00 : bf16
    %0 = vector.broadcast %cst : bf16 to vector<260x128xbf16>
    %c0 = arith.constant 0 : index
    %c0_0 = arith.constant 0 : index
    %1 = vector.load %arg12[%c0, %c0_0] : memref<260x128xbf16, #tpu.memory_space<vmem>>, vector<260x128xbf16>
    tpu.vector_store %arg12[%c0, %c0_0], %0 {strides = array<i32>} : memref<260x128xbf16, #tpu.memory_space<vmem>>, vector<260x128xbf16>,
    %cst_1 = arith.constant 0.000000e+00 : bf16
    %2 = vector.broadcast %cst_1 : bf16 to vector<260x128xbf16>
    %c0_2 = arith.constant 0 : index
    %c0_3 = arith.constant 0 : index
    %3 = vector.load %arg13[%c0_2, %c0_3] : memref<260x128xbf16, #tpu.memory_space<vmem>>, vector<260x128xbf16>
    tpu.vector_store %arg13[%c0_2, %c0_3], %2 {strides = array<i32>} : memref<260x128xbf16, #tpu.memory_space<vmem>>, vector<260x128xbf16>,
    %c0_4 = arith.constant 0 : index
    %c0_5 = arith.constant 0 : index
    %c0_6 = arith.constant 0 : index
    %4 = vector.load %arg1[%c0_4, %c0_5, %c0_6] : memref<1x256x1xi32, #tpu.memory_space<vmem>>, vector<1x256x1xi32>
    %5 = vector.shape_cast %4 : vector<1x256x1xi32> to vector<256x1xi32>
    %6 = tpu.iota {dimensions = array<i32: 1>} : vector<256x16xi32>
    %7 = vector.broadcast %5 : vector<256x1xi32> to vector<256x16xi32>
    %8 = arith.cmpi eq, %7, %6 : vector<256x16xi32>
    %9 = arith.extui %8 : vector<256x16xi1> to vector<256x16xi32>
    %10 = arith.sitofp %9 : vector<256x16xi32> to vector<256x16xf32>
    %11 = arith.truncf %10 : vector<256x16xf32> to vector<256x16xbf16>
    %c0_7 = arith.constant 0 : index
    %c0_8 = arith.constant 0 : index
    %12 = vector.load %arg2[%c0_7, %c0_8] : memref<16x128xbf16, #tpu.memory_space<vmem>>, vector<16x128xbf16>
    %cst_9 = arith.constant dense<0.000000e+00> : vector<256x128xf32>
    %13 = tpu.matmul %11, %12, %cst_9 {dimension_numbers = #tpu.dot_dimension_numbers<[1], [0], [0], [1], [0, 0, 1, 1], [], []>} : vector<256x16xbf16>, vector<16x128xbf16>, vector<256x128xf32> -> vector<256x128xf32>
    %14 = arith.truncf %13 : vector<256x128xf32> to vector<256x128xbf16>
    %c2 = arith.constant 2 : index
    %c0_10 = arith.constant 0 : index
    %15 = vector.load %arg12[%c2, %c0_10] : memref<260x128xbf16, #tpu.memory_space<vmem>>, vector<256x128xbf16>
    tpu.vector_store %arg12[%c2, %c0_10], %14 {strides = array<i32>} : memref<260x128xbf16, #tpu.memory_space<vmem>>, vector<256x128xbf16>,
    %c0_11 = arith.constant 0 : index
    %c0_12 = arith.constant 0 : index
    %16 = vector.load %arg12[%c0_11, %c0_12] : memref<260x128xbf16, #tpu.memory_space<vmem>>, vector<256x128xbf16>
    %c0_13 = arith.constant 0 : index
    %c0_14 = arith.constant 0 : index
    %17 = vector.load %arg3[%c0_13, %c0_14] : memref<640x128xbf16, #tpu.memory_space<vmem>>, vector<128x128xbf16>
    %cst_15 = arith.constant dense<0.000000e+00> : vector<256x128xf32>
    %18 = tpu.matmul %16, %17, %cst_15 {dimension_numbers = #tpu.dot_dimension_numbers<[1], [0], [0], [1], [0, 0, 1, 1], [], []>} : vector<256x128xbf16>, vector<128x128xbf16>, vector<256x128xf32> -> vector<256x128xf32>
    %c1 = arith.constant 1 : index
    %c0_16 = arith.constant 0 : index
    %19 = vector.load %arg12[%c1, %c0_16] : memref<260x128xbf16, #tpu.memory_space<vmem>>, vector<256x128xbf16>
    %c128 = arith.constant 128 : index
    %c0_17 = arith.constant 0 : index
    %20 = vector.load %arg3[%c128, %c0_17] : memref<640x128xbf16, #tpu.memory_space<vmem>>, vector<128x128xbf16>
    %cst_18 = arith.constant dense<0.000000e+00> : vector<256x128xf32>
    %21 = tpu.matmul %19, %20, %cst_18 {dimension_numbers = #tpu.dot_dimension_numbers<[1], [0], [0], [1], [0, 0, 1, 1], [], []>} : vector<256x128xbf16>, vector<128x128xbf16>, vector<256x128xf32> -> vector<256x128xf32>
    %22 = arith.addf %18, %21 : vector<256x128xf32>
    %c2_19 = arith.constant 2 : index
    %c0_20 = arith.constant 0 : index
    %23 = vector.load %arg12[%c2_19, %c0_20] : memref<260x128xbf16, #tpu.memory_space<vmem>>, vector<256x128xbf16>
    %c256 = arith.constant 256 : index
    %c0_21 = arith.constant 0 : index
    %24 = vector.load %arg3[%c256, %c0_21] : memref<640x128xbf16, #tpu.memory_space<vmem>>, vector<128x128xbf16>
    %cst_22 = arith.constant dense<0.000000e+00> : vector<256x128xf32>
    %25 = tpu.matmul %23, %24, %cst_22 {dimension_numbers = #tpu.dot_dimension_numbers<[1], [0], [0], [1], [0, 0, 1, 1], [], []>} : vector<256x128xbf16>, vector<128x128xbf16>, vector<256x128xf32> -> vector<256x128xf32>
    %26 = arith.addf %22, %25 : vector<256x128xf32>
    %c3 = arith.constant 3 : index
    %c0_23 = arith.constant 0 : index
    %27 = vector.load %arg12[%c3, %c0_23] : memref<260x128xbf16, #tpu.memory_space<vmem>>, vector<256x128xbf16>
    %c384 = arith.constant 384 : index
    %c0_24 = arith.constant 0 : index
    %28 = vector.load %arg3[%c384, %c0_24] : memref<640x128xbf16, #tpu.memory_space<vmem>>, vector<128x128xbf16>
    %cst_25 = arith.constant dense<0.000000e+00> : vector<256x128xf32>
    %29 = tpu.matmul %27, %28, %cst_25 {dimension_numbers = #tpu.dot_dimension_numbers<[1], [0], [0], [1], [0, 0, 1, 1], [], []>} : vector<256x128xbf16>, vector<128x128xbf16>, vector<256x128xf32> -> vector<256x128xf32>
    %30 = arith.addf %26, %29 : vector<256x128xf32>
    %c4 = arith.constant 4 : index
    %c0_26 = arith.constant 0 : index
    %31 = vector.load %arg12[%c4, %c0_26] : memref<260x128xbf16, #tpu.memory_space<vmem>>, vector<256x128xbf16>
    %c512 = arith.constant 512 : index
    %c0_27 = arith.constant 0 : index
    %32 = vector.load %arg3[%c512, %c0_27] : memref<640x128xbf16, #tpu.memory_space<vmem>>, vector<128x128xbf16>
    %cst_28 = arith.constant dense<0.000000e+00> : vector<256x128xf32>
    %33 = tpu.matmul %31, %32, %cst_28 {dimension_numbers = #tpu.dot_dimension_numbers<[1], [0], [0], [1], [0, 0, 1, 1], [], []>} : vector<256x128xbf16>, vector<128x128xbf16>, vector<256x128xf32> -> vector<256x128xf32>
    %34 = arith.addf %30, %33 : vector<256x128xf32>
    %c0_29 = arith.constant 0 : index
    %c0_30 = arith.constant 0 : index
    %35 = vector.load %arg4[%c0_29, %c0_30] : memref<1x128xf32, #tpu.memory_space<vmem>>, vector<1x128xf32>
    %36 = vector.broadcast %35 : vector<1x128xf32> to vector<256x128xf32>
    %37 = arith.addf %34, %36 : vector<256x128xf32>
    %cst_31 = arith.constant 0.000000e+00 : f32
    %38 = vector.broadcast %cst_31 : f32 to vector<256x128xf32>
    %39 = arith.maximumf %37, %38 : vector<256x128xf32>
    %40 = arith.truncf %39 : vector<256x128xf32> to vector<256x128xbf16>
    %c2_32 = arith.constant 2 : index
    %c0_33 = arith.constant 0 : index
    %41 = vector.load %arg13[%c2_32, %c0_33] : memref<260x128xbf16, #tpu.memory_space<vmem>>, vector<256x128xbf16>
    tpu.vector_store %arg13[%c2_32, %c0_33], %40 {strides = array<i32>} : memref<260x128xbf16, #tpu.memory_space<vmem>>, vector<256x128xbf16>,
    %c0_34 = arith.constant 0 : index
    %c0_35 = arith.constant 0 : index
    %42 = vector.load %arg13[%c0_34, %c0_35] : memref<260x128xbf16, #tpu.memory_space<vmem>>, vector<256x128xbf16>
    %c0_36 = arith.constant 0 : index
    %c0_37 = arith.constant 0 : index
    %43 = vector.load %arg5[%c0_36, %c0_37] : memref<640x128xbf16, #tpu.memory_space<vmem>>, vector<128x128xbf16>
    %cst_38 = arith.constant dense<0.000000e+00> : vector<256x128xf32>
    %44 = tpu.matmul %42, %43, %cst_38 {dimension_numbers = #tpu.dot_dimension_numbers<[1], [0], [0], [1], [0, 0, 1, 1], [], []>} : vector<256x128xbf16>, vector<128x128xbf16>, vector<256x128xf32> -> vector<256x128xf32>
    %c1_39 = arith.constant 1 : index
    %c0_40 = arith.constant 0 : index
    %45 = vector.load %arg13[%c1_39, %c0_40] : memref<260x128xbf16, #tpu.memory_space<vmem>>, vector<256x128xbf16>
    %c128_41 = arith.constant 128 : index
    %c0_42 = arith.constant 0 : index
    %46 = vector.load %arg5[%c128_41, %c0_42] : memref<640x128xbf16, #tpu.memory_space<vmem>>, vector<128x128xbf16>
    %cst_43 = arith.constant dense<0.000000e+00> : vector<256x128xf32>
    %47 = tpu.matmul %45, %46, %cst_43 {dimension_numbers = #tpu.dot_dimension_numbers<[1], [0], [0], [1], [0, 0, 1, 1], [], []>} : vector<256x128xbf16>, vector<128x128xbf16>, vector<256x128xf32> -> vector<256x128xf32>
    %48 = arith.addf %44, %47 : vector<256x128xf32>
    %c2_44 = arith.constant 2 : index
    %c0_45 = arith.constant 0 : index
    %49 = vector.load %arg13[%c2_44, %c0_45] : memref<260x128xbf16, #tpu.memory_space<vmem>>, vector<256x128xbf16>
    %c256_46 = arith.constant 256 : index
    %c0_47 = arith.constant 0 : index
    %50 = vector.load %arg5[%c256_46, %c0_47] : memref<640x128xbf16, #tpu.memory_space<vmem>>, vector<128x128xbf16>
    %cst_48 = arith.constant dense<0.000000e+00> : vector<256x128xf32>
    %51 = tpu.matmul %49, %50, %cst_48 {dimension_numbers = #tpu.dot_dimension_numbers<[1], [0], [0], [1], [0, 0, 1, 1], [], []>} : vector<256x128xbf16>, vector<128x128xbf16>, vector<256x128xf32> -> vector<256x128xf32>
    %52 = arith.addf %48, %51 : vector<256x128xf32>
    %c3_49 = arith.constant 3 : index
    %c0_50 = arith.constant 0 : index
    %53 = vector.load %arg13[%c3_49, %c0_50] : memref<260x128xbf16, #tpu.memory_space<vmem>>, vector<256x128xbf16>
    %c384_51 = arith.constant 384 : index
    %c0_52 = arith.constant 0 : index
    %54 = vector.load %arg5[%c384_51, %c0_52] : memref<640x128xbf16, #tpu.memory_space<vmem>>, vector<128x128xbf16>
    %cst_53 = arith.constant dense<0.000000e+00> : vector<256x128xf32>
    %55 = tpu.matmul %53, %54, %cst_53 {dimension_numbers = #tpu.dot_dimension_numbers<[1], [0], [0], [1], [0, 0, 1, 1], [], []>} : vector<256x128xbf16>, vector<128x128xbf16>, vector<256x128xf32> -> vector<256x128xf32>
    %56 = arith.addf %52, %55 : vector<256x128xf32>
    %c4_54 = arith.constant 4 : index
    %c0_55 = arith.constant 0 : index
    %57 = vector.load %arg13[%c4_54, %c0_55] : memref<260x128xbf16, #tpu.memory_space<vmem>>, vector<256x128xbf16>
    %c512_56 = arith.constant 512 : index
    %c0_57 = arith.constant 0 : index
    %58 = vector.load %arg5[%c512_56, %c0_57] : memref<640x128xbf16, #tpu.memory_space<vmem>>, vector<128x128xbf16>
    %cst_58 = arith.constant dense<0.000000e+00> : vector<256x128xf32>
    %59 = tpu.matmul %57, %58, %cst_58 {dimension_numbers = #tpu.dot_dimension_numbers<[1], [0], [0], [1], [0, 0, 1, 1], [], []>} : vector<256x128xbf16>, vector<128x128xbf16>, vector<256x128xf32> -> vector<256x128xf32>
    %60 = arith.addf %56, %59 : vector<256x128xf32>
    %c0_59 = arith.constant 0 : index
    %c0_60 = arith.constant 0 : index
    %61 = vector.load %arg6[%c0_59, %c0_60] : memref<1x128xf32, #tpu.memory_space<vmem>>, vector<1x128xf32>
    %62 = vector.broadcast %61 : vector<1x128xf32> to vector<256x128xf32>
    %63 = arith.addf %60, %62 : vector<256x128xf32>
    %cst_61 = arith.constant 0.000000e+00 : f32
    %64 = vector.broadcast %cst_61 : f32 to vector<256x128xf32>
    %65 = arith.maximumf %63, %64 : vector<256x128xf32>
    %66 = arith.truncf %65 : vector<256x128xf32> to vector<256x128xbf16>
    %c2_62 = arith.constant 2 : index
    %c0_63 = arith.constant 0 : index
    %67 = vector.load %arg13[%c2_62, %c0_63] : memref<260x128xbf16, #tpu.memory_space<vmem>>, vector<256x128xbf16>
    tpu.vector_store %arg13[%c2_62, %c0_63], %66 {strides = array<i32>} : memref<260x128xbf16, #tpu.memory_space<vmem>>, vector<256x128xbf16>,
    %c0_64 = arith.constant 0 : index
    %c0_65 = arith.constant 0 : index
    %68 = vector.load %arg13[%c0_64, %c0_65] : memref<260x128xbf16, #tpu.memory_space<vmem>>, vector<256x128xbf16>
    %c0_66 = arith.constant 0 : index
    %c0_67 = arith.constant 0 : index
    %69 = vector.load %arg7[%c0_66, %c0_67] : memref<640x128xbf16, #tpu.memory_space<vmem>>, vector<128x128xbf16>
    %cst_68 = arith.constant dense<0.000000e+00> : vector<256x128xf32>
    %70 = tpu.matmul %68, %69, %cst_68 {dimension_numbers = #tpu.dot_dimension_numbers<[1], [0], [0], [1], [0, 0, 1, 1], [], []>} : vector<256x128xbf16>, vector<128x128xbf16>, vector<256x128xf32> -> vector<256x128xf32>
    %c1_69 = arith.constant 1 : index
    %c0_70 = arith.constant 0 : index
    %71 = vector.load %arg13[%c1_69, %c0_70] : memref<260x128xbf16, #tpu.memory_space<vmem>>, vector<256x128xbf16>
    %c128_71 = arith.constant 128 : index
    %c0_72 = arith.constant 0 : index
    %72 = vector.load %arg7[%c128_71, %c0_72] : memref<640x128xbf16, #tpu.memory_space<vmem>>, vector<128x128xbf16>
    %cst_73 = arith.constant dense<0.000000e+00> : vector<256x128xf32>
    %73 = tpu.matmul %71, %72, %cst_73 {dimension_numbers = #tpu.dot_dimension_numbers<[1], [0], [0], [1], [0, 0, 1, 1], [], []>} : vector<256x128xbf16>, vector<128x128xbf16>, vector<256x128xf32> -> vector<256x128xf32>
    %74 = arith.addf %70, %73 : vector<256x128xf32>
    %c2_74 = arith.constant 2 : index
    %c0_75 = arith.constant 0 : index
    %75 = vector.load %arg13[%c2_74, %c0_75] : memref<260x128xbf16, #tpu.memory_space<vmem>>, vector<256x128xbf16>
    %c256_76 = arith.constant 256 : index
    %c0_77 = arith.constant 0 : index
    %76 = vector.load %arg7[%c256_76, %c0_77] : memref<640x128xbf16, #tpu.memory_space<vmem>>, vector<128x128xbf16>
    %cst_78 = arith.constant dense<0.000000e+00> : vector<256x128xf32>
    %77 = tpu.matmul %75, %76, %cst_78 {dimension_numbers = #tpu.dot_dimension_numbers<[1], [0], [0], [1], [0, 0, 1, 1], [], []>} : vector<256x128xbf16>, vector<128x128xbf16>, vector<256x128xf32> -> vector<256x128xf32>
    %78 = arith.addf %74, %77 : vector<256x128xf32>
    %c3_79 = arith.constant 3 : index
    %c0_80 = arith.constant 0 : index
    %79 = vector.load %arg13[%c3_79, %c0_80] : memref<260x128xbf16, #tpu.memory_space<vmem>>, vector<256x128xbf16>
    %c384_81 = arith.constant 384 : index
    %c0_82 = arith.constant 0 : index
    %80 = vector.load %arg7[%c384_81, %c0_82] : memref<640x128xbf16, #tpu.memory_space<vmem>>, vector<128x128xbf16>
    %cst_83 = arith.constant dense<0.000000e+00> : vector<256x128xf32>
    %81 = tpu.matmul %79, %80, %cst_83 {dimension_numbers = #tpu.dot_dimension_numbers<[1], [0], [0], [1], [0, 0, 1, 1], [], []>} : vector<256x128xbf16>, vector<128x128xbf16>, vector<256x128xf32> -> vector<256x128xf32>
    %82 = arith.addf %78, %81 : vector<256x128xf32>
    %c4_84 = arith.constant 4 : index
    %c0_85 = arith.constant 0 : index
    %83 = vector.load %arg13[%c4_84, %c0_85] : memref<260x128xbf16, #tpu.memory_space<vmem>>, vector<256x128xbf16>
    %c512_86 = arith.constant 512 : index
    %c0_87 = arith.constant 0 : index
    %84 = vector.load %arg7[%c512_86, %c0_87] : memref<640x128xbf16, #tpu.memory_space<vmem>>, vector<128x128xbf16>
    %cst_88 = arith.constant dense<0.000000e+00> : vector<256x128xf32>
    %85 = tpu.matmul %83, %84, %cst_88 {dimension_numbers = #tpu.dot_dimension_numbers<[1], [0], [0], [1], [0, 0, 1, 1], [], []>} : vector<256x128xbf16>, vector<128x128xbf16>, vector<256x128xf32> -> vector<256x128xf32>
    %86 = arith.addf %82, %85 : vector<256x128xf32>
    %c0_89 = arith.constant 0 : index
    %c0_90 = arith.constant 0 : index
    %87 = vector.load %arg8[%c0_89, %c0_90] : memref<1x128xf32, #tpu.memory_space<vmem>>, vector<1x128xf32>
    %88 = vector.broadcast %87 : vector<1x128xf32> to vector<256x128xf32>
    %89 = arith.addf %86, %88 : vector<256x128xf32>
    %cst_91 = arith.constant 0.000000e+00 : f32
    %90 = vector.broadcast %cst_91 : f32 to vector<256x128xf32>
    %91 = arith.maximumf %89, %90 : vector<256x128xf32>
    %92 = arith.truncf %91 : vector<256x128xf32> to vector<256x128xbf16>
    %c0_92 = arith.constant 0 : index
    %c0_93 = arith.constant 0 : index
    %93 = vector.load %arg9[%c0_92, %c0_93] : memref<128x128xbf16, #tpu.memory_space<vmem>>, vector<128x128xbf16>
    %cst_94 = arith.constant dense<0.000000e+00> : vector<256x128xf32>
    %94 = tpu.matmul %92, %93, %cst_94 {dimension_numbers = #tpu.dot_dimension_numbers<[1], [0], [0], [1], [0, 0, 1, 1], [], []>} : vector<256x128xbf16>, vector<128x128xbf16>, vector<256x128xf32> -> vector<256x128xf32>
    %c0_95 = arith.constant 0 : index
    %c0_96 = arith.constant 0 : index
    %95 = vector.load %arg10[%c0_95, %c0_96] : memref<1x128xf32, #tpu.memory_space<vmem>>, vector<1x128xf32>
    %96 = vector.broadcast %95 : vector<1x128xf32> to vector<256x128xf32>
    %97 = arith.addf %94, %96 : vector<256x128xf32>
    %c0_97 = arith.constant 0 : index
    %c0_98 = arith.constant 0 : index
    %c0_99 = arith.constant 0 : index
    %98 = vector.load %arg11[%c0_97, %c0_98, %c0_99] : memref<1x256x128xf32, #tpu.memory_space<vmem>>, vector<1x256x128xf32>
    %99 = vector.shape_cast %98 : vector<1x256x128xf32> to vector<256x128xf32>
    %100 = vector.shape_cast %97 : vector<256x128xf32> to vector<1x256x128xf32>
    tpu.vector_store %arg11[%c0_97, %c0_98, %c0_99], %100 {strides = array<i32>} : memref<1x256x128xf32, #tpu.memory_space<vmem>>, vector<1x256x128xf32>,
    return
  }
  func.func @transform_0(%arg0: i32) -> (i32, i32, i32) {
    %c0_i32 = arith.constant 0 : i32
    %c0_i32_0 = arith.constant 0 : i32
    %c0_i32_1 = arith.constant 0 : i32
    return %arg0, %c0_i32, %c0_i32_0 : i32, i32, i32
  }
  func.func @transform_1(%arg0: i32) -> (i32, i32) {
    %c0_i32 = arith.constant 0 : i32
    %c0_i32_0 = arith.constant 0 : i32
    %c0_i32_1 = arith.constant 0 : i32
    return %c0_i32, %c0_i32_0 : i32, i32
  }
  func.func @transform_2(%arg0: i32) -> (i32, i32) {
    %c0_i32 = arith.constant 0 : i32
    %c0_i32_0 = arith.constant 0 : i32
    %c0_i32_1 = arith.constant 0 : i32
    return %c0_i32, %c0_i32_0 : i32, i32
  }
  func.func @transform_3(%arg0: i32) -> (i32, i32) {
    %c0_i32 = arith.constant 0 : i32
    %c0_i32_0 = arith.constant 0 : i32
    %c0_i32_1 = arith.constant 0 : i32
    return %c0_i32, %c0_i32_0 : i32, i32
  }
  func.func @transform_4(%arg0: i32) -> (i32, i32) {
    %c0_i32 = arith.constant 0 : i32
    %c0_i32_0 = arith.constant 0 : i32
    %c0_i32_1 = arith.constant 0 : i32
    return %c0_i32, %c0_i32_0 : i32, i32
  }
  func.func @transform_5(%arg0: i32) -> (i32, i32) {
    %c0_i32 = arith.constant 0 : i32
    %c0_i32_0 = arith.constant 0 : i32
    %c0_i32_1 = arith.constant 0 : i32
    return %c0_i32, %c0_i32_0 : i32, i32
  }
  func.func @transform_6(%arg0: i32) -> (i32, i32) {
    %c0_i32 = arith.constant 0 : i32
    %c0_i32_0 = arith.constant 0 : i32
    %c0_i32_1 = arith.constant 0 : i32
    return %c0_i32, %c0_i32_0 : i32, i32
  }
  func.func @transform_7(%arg0: i32) -> (i32, i32) {
    %c0_i32 = arith.constant 0 : i32
    %c0_i32_0 = arith.constant 0 : i32
    %c0_i32_1 = arith.constant 0 : i32
    return %c0_i32, %c0_i32_0 : i32, i32
  }
  func.func @transform_8(%arg0: i32) -> (i32, i32) {
    %c0_i32 = arith.constant 0 : i32
    %c0_i32_0 = arith.constant 0 : i32
    %c0_i32_1 = arith.constant 0 : i32
    return %c0_i32, %c0_i32_0 : i32, i32
  }
  func.func @transform_9(%arg0: i32) -> (i32, i32) {
    %c0_i32 = arith.constant 0 : i32
    %c0_i32_0 = arith.constant 0 : i32
    %c0_i32_1 = arith.constant 0 : i32
    return %c0_i32, %c0_i32_0 : i32, i32
  }
  func.func @transform_10(%arg0: i32) -> (i32, i32, i32) {
    %c0_i32 = arith.constant 0 : i32
    %c0_i32_0 = arith.constant 0 : i32
    %c0_i32_1 = arith.constant 0 : i32
    return %arg0, %c0_i32, %c0_i32_0 : i32, i32, i32
  }
}

</mosaic_0001>

<bundles_post_ra>
// kernel: encoder_prenet.1
= control target key start
LH: loop header
LB: loop body
LE: loop exit
PB: predicated region body
PF: predicated region fallthrough
CT: control target
= control target key end

     0   :  { %15 = vsyncpa [#allocation5], 0  ;;  %s9601_s0 = inlined_call_operand.vmem [shape: s32[2,256,1], index: 0, kind: input, shape index: {}]   ;;  %s9602_s1 = inlined_call_operand.vmem [shape: bf16[16,128], index: 1, kind: input, shape index: {}]   ;;  %s9603_s2 = inlined_call_operand.vmem [shape: bf16[640,128], index: 2, kind: input, shape index: {}]   ;;  %s9604_s3 = inlined_call_operand.vmem [shape: f32[1,128], index: 3, kind: input, shape index: {}]   ;;  %s9605_s4 = inlined_call_operand.hbm [shape: bf16[640,128], index: 4, kind: input, shape index: {}]   ;;  %s9606_s5 = inlined_call_operand.vmem [shape: f32[1,128], index: 5, kind: input, shape index: {}]   ;;  %s9607_s6 = inlined_call_operand.hbm [shape: bf16[640,128], index: 6, kind: input, shape index: {}]   ;;  %s9608_s7 = inlined_call_operand.vmem [shape: f32[1,128], index: 7, kind: input, shape index: {}]   ;;  %s9609_s8 = inlined_call_operand.vmem [shape: bf16[128,128], index: 8, kind: input, shape index: {}]   ;;  %s9610_s9 = inlined_call_operand.vmem [shape: f32[1,128], index: 9, kind: input, shape index: {}]   ;;  %s9611_s10 = inlined_call_operand.hbm [shape: f32[2,256,128], index: 10, kind: output, shape index: {}]  }
   0x1   :  { %16 = vsyncpa [#allocation8], 0 }
   0x2   :  { %17 = vsyncpa [#allocation6], 0 }
   0x3   :  { %19 = vsyncpa [#allocation6 + $0x1], 0  ;;  %s7305_s13 = smov 0   ;;  %s7307_s14 = smov 0  }
   0x4   :  { %s7309_s15 = smov 0   ;;  %s7311_s16 = smov 0  }
   0x5 LB: > { %s7326_s17 = sadd.s32 4294967295, %s7240_s16   ;;  %s6070_s18 = sadd.s32 4294967294, %s7240_s16   ;;  %s7240_s16 = sphi %s7311_s16, %s9713_s16   ;;  %s7236_s15 = sphi %s7309_s15, %s9712_s15   ;;  %s7232_s14 = sphi %s7307_s14, %s9711_s14   ;;  %s7228_s13 = sphi %s7305_s13, %s9710_s13  }
   0x6   : > { %s7330_s19 = sadd.s32 1, %s7240_s16   ;;  %s247_s20 = sadd.s32 1, %s7236_s15 }
   0x7   : > { %s244_s21 = ssub.s32 %s7240_s16, %s7330_s19  ;;  %p257_p0 = scmp.ne.s32.totalorder %s7236_s15, %s7232_s14 }
   0x8   : > { %p245_p1 = scmp.eq.s32.totalorder %s244_s21, 0  ;;  %p258_p2 = scmp.eq.s32.totalorder %s7326_s17, 1 }
   0x9   : > { %p263_p3 = scmp.ne.s32.totalorder %s7232_s14, %s7228_s13  ;;  %p264_p4 = scmp.eq.s32.totalorder %s6070_s18, 1 }
   0xa   : > { %s7341_s22 = scalar_select %p245_p1, %s7236_s15, %s247_s20  }
   0xb   : > { %p7343_p5 = por %p258_p2, %p257_p0  ;;  %p7347_p6 = por %p264_p4, %p263_p3 }
   0xc   : > { %9614 = sst [smem:[#allocation13_spill]] %s7341_s22  ;;  %p6071_p7 = scmp.ge.s32.totalorder %s7240_s16, 1 }
   0xd   : > { %p271_p8 = scmp.lt.s32.totalorder %s7240_s16, 3  ;;  %p7050_p9 = scmp.eq.s32.totalorder %s7326_s17, 0 }
   0xe   : > { %s291_s28 = sshll.u32 %s9605_s4, 4  ;;  %s7242_s29 = smov [#allocation4]   ;;  %s292_s28 = int_to_ptr.hbm [resolvable:$true] %s291_s28 }
   0xf   : > { %p7354_p10 = pnand %p6071_p7, %p271_p8  ;;  %s293_s30 = sshll.u32 %s7242_s29, 4  ;;  %s294_s30 = int_to_ptr.vmem [resolvable:$true] %s293_s30 }
  0x10   : > { %s308_s18 = sshll.u32 %s9607_s6, 4  ;;  %s7243_s20 = smov 64   ;;  %s309_s18 = int_to_ptr.hbm [resolvable:$true] %s308_s18 }
  0x11   : > { %p7039_p11 = pneg %p7354_p10  ;;  %s7244_s21 = smov 4  }
  0x12   : > { %s7245_s22 = smov [#allocation7]   ;;  %343 = sbr.rel (%p7354_p10) target bundleno = 1986 (0x7c2), region = 60 }
  0x13   : > { %p7040_p12 = pnand %p7050_p9, %p7039_p11  ;;  %s310_s26 = sshll.u32 %s7245_s22, 4  ;;  %s311_s26 = int_to_ptr.vmem [resolvable:$true] %s310_s26 }
  0x15   : > { %7042 = dma.hbm_to_vmem [thread:$0]  (!%p7040_p12), %s292_s28, 5120, %s294_s30, [#allocation5], %s7243_s20, %s7243_s20, %s7244_s21  }
  0x16   : > { %7045 = dma.hbm_to_vmem [thread:$0]  (!%p7040_p12), %s309_s18, 5120, %s311_s26, [#allocation8], %s7243_s20, %s7243_s20, %s7244_s21  }
  0x17   : > { %7215 = dma.done.wait (%p7050_p9), [#allocation5], 5120  }
  0x18   : > { %7217 = vsyncadd (%p7050_p9), [#allocation5], 4294962176 }
  0x19   : > { %7219 = dma.done.wait (%p7050_p9), [#allocation8], 5120  }
  0x1a   : > { %7221 = vsyncadd (%p7050_p9), [#allocation8], 4294962176  ;;  %p387_p13 = scmp.lt.s32.totalorder %s7326_s17, 1  ;;  %v7246_v0 = vmov 0   ;;  %v6831_v33 = vld [vmem:[%s9602_s1] sm:$0xff]  ;;  %v491_v35 = vlaneseq  ;;  %v7247_v43 = vmov 0.0  }
  0x1b   : > { %7097 = vset.pattern.permute.xlu2 %v7246_v0  ;;  %393 = vst [vmem:[#allocation2] sm:$0xf] %v7246_v0  ;;  %7096 = vset.pattern.permute.xlu1 %v7246_v0  ;;  %vm709_vm2 = vcmask 130048   ;;  %s384_s30 = sand.u32 1, %s7232_s14   ;;  %s7005_s21 = sshll.u32 %s7326_s17, 8 }
  0x1c   : > { %394 = vst [vmem:[#allocation2 + $0x4] sm:$0xf] %v7246_v0  ;;  %7095 = vset.pattern.permute.xlu0 %v7246_v0  ;;  %s388_s22 = scalar_select %p387_p13, %s7326_s17, 1  ;;  %765 = vmatpush.bf16.msra.mxu0 %v6831_v33  ;;  %v7489_v39 = vand.u32 127, %v491_v35 }
  0x1d   : > { %395 = vst [vmem:[#allocation2 + $0x8] sm:$0xf] %v7246_v0  ;;  %7018 = vmatpush.bf16.msra.mxu1 %v6831_v33  ;;  %7019 = vmatpush.bf16.msra.mxu2 %v6831_v33  ;;  %s6078_s11 = sshll.u32 %s384_s30, 8 }
  0x1e   : > { %396 = vst [vmem:[#allocation2 + $0xc] sm:$0xf] %v7246_v0  ;;  %s6830_s25 = sshll.u32 %s388_s22, 8  ;;  %7020 = vmatpush.bf16.msra.mxu3 %v6831_v33  ;;  %s9470_s20 = scalar_lea.vmem [#allocation9], %s6078_s11 }
  0x1f   : > { %397 = vst [vmem:[#allocation2 + $0x10] sm:$0xf] %v7246_v0  ;;  %s7391_s29 = scalar_lea.vmem %s9601_s0, %s6830_s25  ;;  %s5982_s25 = scalar_lea.hbm %s9611_s10, %s7005_s21 }
  0x20   : > { %398 = vst [vmem:[#allocation2 + $0x14] sm:$0xf] %v7246_v0  ;;  %v463_v1 = vld [vmem:[%s7391_s29 + $0x20] sm:$0xff]  ;;  %v461_v2 = vld [vmem:[%s7391_s29 + $0x10] sm:$0xff]  ;;  %v464_v4 = vld [vmem:[%s7391_s29 + $0x28] sm:$0xff]  ;;  %s5983_s27 = sshll.u32 %s9470_s20, 4  ;;  %s5984_s27 = int_to_ptr.vmem [resolvable:$true] %s5983_s27 }
  0x21   : > { %399 = vst [vmem:[#allocation2 + $0x18] sm:$0xf] %v7246_v0  ;;  %v459_v3 = vld [vmem:[%s7391_s29] sm:$0xff]  ;;  %506 = vperm.xlu2 %7097, %v463_v1   ;;  %500 = vperm.xlu1 %7096, %v461_v2   ;;  %v462_v5 = vld [vmem:[%s7391_s29 + $0x18] sm:$0xff]  ;;  %v460_v6 = vld [vmem:[%s7391_s29 + $0x8] sm:$0xff]  ;;  %s5985_s28 = sshll.u32 %s5982_s25, 4  ;;  %s5986_s28 = int_to_ptr.hbm [resolvable:$true] %s5985_s28 }
  0x22   : > { %400 = vst [vmem:[#allocation2 + $0x1c] sm:$0xf] %v7246_v0  ;;  %494 = vperm.xlu0 %7095, %v459_v3   ;;  %v467_v7 = vld [vmem:[%s7391_s29 + $0x40] sm:$0xff]  ;;  %v466_v8 = vld [vmem:[%s7391_s29 + $0x38] sm:$0xff]  ;;  %v465_v9 = vld [vmem:[%s7391_s29 + $0x30] sm:$0xff]  ;;  %s7184_s17 = sshra.s32 %s5986_s28, 4  ;;  %s7185_s17 = int_to_ptr.hbm [resolvable:$true] %s7184_s17 }
  0x23   : > { %401 = vst [vmem:[#allocation2 + $0x20] sm:$0xf] %v7246_v0  ;;  %v470_v10 = vld [vmem:[%s7391_s29 + $0x58] sm:$0xff]  ;;  %v469_v11 = vld [vmem:[%s7391_s29 + $0x50] sm:$0xff]  ;;  %v468_v12 = vld [vmem:[%s7391_s29 + $0x48] sm:$0xff]  ;;  %s7186_s11 = scalar_lea.hbm %s7185_s17, 256  ;;  %p7191_p3 = scmp.lt.s32.totalorder %s7185_s17, %s9611_s10 }
  0x24   : > { %402 = vst [vmem:[#allocation2 + $0x24] sm:$0xf] %v7246_v0  ;;  %v473_v13 = vld [vmem:[%s7391_s29 + $0x70] sm:$0xff]  ;;  %v472_v14 = vld [vmem:[%s7391_s29 + $0x68] sm:$0xff]  ;;  %v471_v15 = vld [vmem:[%s7391_s29 + $0x60] sm:$0xff]  ;;  %p7187_p0 = scmp.ne.s32.totalorder %s7185_s17, %s7186_s11  ;;  %s7190_s21 = scalar_lea.hbm %s9611_s10, 512 }
  0x25   : > { %403 = vst [vmem:[#allocation2 + $0x28] sm:$0xf] %v7246_v0  ;;  %v476_v16 = vld [vmem:[%s7391_s29 + $0x88] sm:$0xff]  ;;  %v475_v17 = vld [vmem:[%s7391_s29 + $0x80] sm:$0xff]  ;;  %v474_v18 = vld [vmem:[%s7391_s29 + $0x78] sm:$0xff]  ;;  %p7192_p4 = scmp.lt.s32.totalorder %s7190_s21, %s7186_s11 }
  0x26   : > { %404 = vst [vmem:[#allocation2 + $0x2c] sm:$0xf] %v7246_v0  ;;  %v479_v19 = vld [vmem:[%s7391_s29 + $0xa0] sm:$0xff]  ;;  %v478_v20 = vld [vmem:[%s7391_s29 + $0x98] sm:$0xff]  ;;  %v477_v21 = vld [vmem:[%s7391_s29 + $0x90] sm:$0xff]  ;;  %p7188_p1 = pnand %p7187_p0, %p7343_p5 }
  0x27   : > { %405 = vst [vmem:[#allocation2 + $0x30] sm:$0xf] %v7246_v0  ;;  %v482_v22 = vld [vmem:[%s7391_s29 + $0xb8] sm:$0xff]  ;;  %v481_v23 = vld [vmem:[%s7391_s29 + $0xb0] sm:$0xff]  ;;  %v480_v24 = vld [vmem:[%s7391_s29 + $0xa8] sm:$0xff]  ;;  %p7193_p7 = por %p7192_p4, %p7191_p3 }
  0x28   : > { %406 = vst [vmem:[#allocation2 + $0x34] sm:$0xf] %v7246_v0  ;;  %v485_v25 = vld [vmem:[%s7391_s29 + $0xd0] sm:$0xff]  ;;  %v484_v26 = vld [vmem:[%s7391_s29 + $0xc8] sm:$0xff]  ;;  %v483_v27 = vld [vmem:[%s7391_s29 + $0xc0] sm:$0xff]  ;;  %p7189_p2 = pneg %p7188_p1 }
  0x29   : > { %407 = vst [vmem:[#allocation2 + $0x38] sm:$0xf] %v7246_v0  ;;  %509 = vperm.xlu2 %7097, %v464_v4   ;;  %503 = vperm.xlu1 %7096, %v462_v5   ;;  %v488_v28 = vld [vmem:[%s7391_s29 + $0xe8] sm:$0xff]  ;;  %v487_v29 = vld [vmem:[%s7391_s29 + $0xe0] sm:$0xff]  ;;  %v486_v30 = vld [vmem:[%s7391_s29 + $0xd8] sm:$0xff] }
  0x2a   : > { %408 = vst [vmem:[#allocation2 + $0x3c] sm:$0xf] %v7246_v0  ;;  %497 = vperm.xlu0 %7095, %v460_v6   ;;  %v490_v31 = vld [vmem:[%s7391_s29 + $0xf8] sm:$0xff]  ;;  %v489_v32 = vld [vmem:[%s7391_s29 + $0xf0] sm:$0xff]  ;;  %s5971_s29 = scalar_lea.sflag [#allocation6], %s384_s30  ;;  %p7194_p8 = pnand %p7193_p7, %p7189_p2 }
  0x2b   : > { %409 = vst [vmem:[#allocation2 + $0x40] sm:$0xf] %v7246_v0 }
  0x2c   : > { %410 = vst [vmem:[#allocation2 + $0x44] sm:$0xf] %v7246_v0 }
  0x2d   : > { %411 = vst [vmem:[#allocation2 + $0x48] sm:$0xf] %v7246_v0 }
  0x2e   : > { %412 = vst [vmem:[#allocation2 + $0x4c] sm:$0xf] %v7246_v0 }
  0x2f   : > { %413 = vst [vmem:[#allocation2 + $0x50] sm:$0xf] %v7246_v0 }
  0x30   : > { %414 = vst [vmem:[#allocation2 + $0x54] sm:$0xf] %v7246_v0 }
  0x31   : > { %415 = vst [vmem:[#allocation2 + $0x58] sm:$0xf] %v7246_v0  ;;  %518 = vperm.xlu2 %7097, %v467_v7   ;;  %515 = vperm.xlu1 %7096, %v466_v8  }
  0x32   : > { %416 = vst [vmem:[#allocation2 + $0x5c] sm:$0xf] %v7246_v0  ;;  %512 = vperm.xlu0 %7095, %v465_v9  }
  0x33   : > { %417 = vst [vmem:[#allocation2 + $0x60] sm:$0xf] %v7246_v0 }
  0x34   : > { %418 = vst [vmem:[#allocation2 + $0x64] sm:$0xf] %v7246_v0 }
  0x35   : > { %419 = vst [vmem:[#allocation2 + $0x68] sm:$0xf] %v7246_v0 }
  0x36   : > { %420 = vst [vmem:[#allocation2 + $0x6c] sm:$0xf] %v7246_v0 }
  0x37   : > { %421 = vst [vmem:[#allocation2 + $0x70] sm:$0xf] %v7246_v0 }
  0x38   : > { %422 = vst [vmem:[#allocation2 + $0x74] sm:$0xf] %v7246_v0 }
  0x39   : > { %423 = vst [vmem:[#allocation2 + $0x78] sm:$0xf] %v7246_v0  ;;  %527 = vperm.xlu2 %7097, %v470_v10   ;;  %524 = vperm.xlu1 %7096, %v469_v11  }
  0x3a   : > { %424 = vst [vmem:[#allocation2 + $0x7c] sm:$0xf] %v7246_v0  ;;  %521 = vperm.xlu0 %7095, %v468_v12  }
  0x3b   : > { %425 = vst [vmem:[#allocation2 + $0x80] sm:$0x3] %v7246_v0 }
  0x3c   : > { %426 = vst [vmem:[#allocation3] sm:$0xf] %v7246_v0 }
  0x3d   : > { %427 = vst [vmem:[#allocation3 + $0x4] sm:$0xf] %v7246_v0 }
  0x3e   : > { %428 = vst [vmem:[#allocation3 + $0x8] sm:$0xf] %v7246_v0 }
  0x3f   : > { %429 = vst [vmem:[#allocation3 + $0xc] sm:$0xf] %v7246_v0 }
  0x40   : > { %430 = vst [vmem:[#allocation3 + $0x10] sm:$0xf] %v7246_v0 }
  0x41   : > { %431 = vst [vmem:[#allocation3 + $0x14] sm:$0xf] %v7246_v0  ;;  %536 = vperm.xlu2 %7097, %v473_v13   ;;  %533 = vperm.xlu1 %7096, %v472_v14  }
  0x42   : > { %432 = vst [vmem:[#allocation3 + $0x18] sm:$0xf] %v7246_v0  ;;  %530 = vperm.xlu0 %7095, %v471_v15  }
  0x43   : > { %433 = vst [vmem:[#allocation3 + $0x1c] sm:$0xf] %v7246_v0 }
  0x44   : > { %434 = vst [vmem:[#allocation3 + $0x20] sm:$0xf] %v7246_v0 }
  0x45   : > { %435 = vst [vmem:[#allocation3 + $0x24] sm:$0xf] %v7246_v0 }
  0x46   : > { %436 = vst [vmem:[#allocation3 + $0x28] sm:$0xf] %v7246_v0 }
  0x47   : > { %437 = vst [vmem:[#allocation3 + $0x2c] sm:$0xf] %v7246_v0 }
  0x48   : > { %438 = vst [vmem:[#allocation3 + $0x30] sm:$0xf] %v7246_v0 }
  0x49   : > { %439 = vst [vmem:[#allocation3 + $0x34] sm:$0xf] %v7246_v0  ;;  %545 = vperm.xlu2 %7097, %v476_v16   ;;  %542 = vperm.xlu1 %7096, %v475_v17  }
  0x4a   : > { %440 = vst [vmem:[#allocation3 + $0x38] sm:$0xf] %v7246_v0  ;;  %539 = vperm.xlu0 %7095, %v474_v18  }
  0x4b   : > { %441 = vst [vmem:[#allocation3 + $0x3c] sm:$0xf] %v7246_v0 }
  0x4c   : > { %442 = vst [vmem:[#allocation3 + $0x40] sm:$0xf] %v7246_v0 }
  0x4d   : > { %443 = vst [vmem:[#allocation3 + $0x44] sm:$0xf] %v7246_v0 }
  0x4e   : > { %444 = vst [vmem:[#allocation3 + $0x48] sm:$0xf] %v7246_v0 }
  0x4f   : > { %445 = vst [vmem:[#allocation3 + $0x4c] sm:$0xf] %v7246_v0 }
  0x50   : > { %446 = vst [vmem:[#allocation3 + $0x50] sm:$0xf] %v7246_v0 }
  0x51   : > { %447 = vst [vmem:[#allocation3 + $0x54] sm:$0xf] %v7246_v0  ;;  %554 = vperm.xlu2 %7097, %v479_v19   ;;  %551 = vperm.xlu1 %7096, %v478_v20  }
  0x52   : > { %448 = vst [vmem:[#allocation3 + $0x58] sm:$0xf] %v7246_v0  ;;  %548 = vperm.xlu0 %7095, %v477_v21  }
  0x53   : > { %449 = vst [vmem:[#allocation3 + $0x5c] sm:$0xf] %v7246_v0 }
  0x54   : > { %450 = vst [vmem:[#allocation3 + $0x60] sm:$0xf] %v7246_v0 }
  0x55   : > { %451 = vst [vmem:[#allocation3 + $0x64] sm:$0xf] %v7246_v0 }
  0x56   : > { %452 = vst [vmem:[#allocation3 + $0x68] sm:$0xf] %v7246_v0 }
  0x57   : > { %453 = vst [vmem:[#allocation3 + $0x6c] sm:$0xf] %v7246_v0 }
  0x58   : > { %454 = vst [vmem:[#allocation3 + $0x70] sm:$0xf] %v7246_v0 }
  0x59   : > { %455 = vst [vmem:[#allocation3 + $0x74] sm:$0xf] %v7246_v0  ;;  %563 = vperm.xlu2 %7097, %v482_v22   ;;  %560 = vperm.xlu1 %7096, %v481_v23  }
  0x5a   : > { %456 = vst [vmem:[#allocation3 + $0x78] sm:$0xf] %v7246_v0  ;;  %557 = vperm.xlu0 %7095, %v480_v24  }
  0x5b   : > { %457 = vst [vmem:[#allocation3 + $0x7c] sm:$0xf] %v7246_v0 }
  0x5c   : > { %458 = vst [vmem:[#allocation3 + $0x80] sm:$0x3] %v7246_v0 }
  0x61   : > { %572 = vperm.xlu2 %7097, %v485_v25   ;;  %569 = vperm.xlu1 %7096, %v484_v26   ;;  %v6862_v26 = vld [vmem:[%s9603_s2 + $0x78] sm:$0xff] }
  0x62   : > { %566 = vperm.xlu0 %7095, %v483_v27   ;;  %1420 = vmatpush.bf16.msrb.mxu1 %v6862_v26 }
  0x69   : > { %581 = vperm.xlu2 %7097, %v488_v28   ;;  %578 = vperm.xlu1 %7096, %v487_v29   ;;  %v6861_v28 = vld [vmem:[%s9603_s2 + $0x70] sm:$0xff] }
  0x6a   : > { %575 = vperm.xlu0 %7095, %v486_v30   ;;  %1421 = vmatpush.bf16.msrb.mxu1 %v6861_v28 }
  0x71   : > { %587 = vperm.xlu1 %7096, %v490_v31  }
  0x72   : > { %584 = vperm.xlu0 %7095, %v489_v32  }
  0x7b   : > { %v507_v34 = vpop.permute.xlu2 %506 }
  0x7c   : > { %vm593_vm9 = vcmp.eq.s32.totalorder %v507_v34, %v7489_v39 }
  0x7d   : > { %v6085_v0 = vsel %vm593_vm9, 1.0, %v7247_v43 }
  0x83   : > { %v510_v36 = vpop.permute.xlu2 %509 }
  0x84   : > { %vm594_vm10 = vcmp.eq.s32.totalorder %v510_v36, %v7489_v39 }
  0x85   : > { %v6086_v1 = vsel %vm594_vm10, 1.0, %v7247_v43 }
  0x86   : > { %v687_v4 = vpack.c.bf16 %v6086_v1, %v6085_v0  ;;  %v6870_v1 = vld [vmem:[%s9603_s2 + $0xb8] sm:$0xff] }
  0x87   : > { %1780 = vmatpush.bf16.msrb.mxu3 %v6870_v1 }
  0x8b   : > { %v7492_v42 = vpop.permute.xlu2 %518 }
  0x93   : > { %v501_v37 = vpop.permute.xlu1 %500  ;;  %v528_v49 = vpop.permute.xlu2 %527 }
  0x94   : > { %v495_v38 = vpop.permute.xlu0 %494  ;;  %vm600_vm3 = vcmp.eq.s32.totalorder %v528_v49, %v7489_v39  ;;  %vm591_vm4 = vcmp.eq.s32.totalorder %v501_v37, %v7489_v39  ;;  %v6853_v49 = vld [vmem:[%s9603_s2 + $0x30] sm:$0xff] }
  0x95   : > { %vm589_vm0 = vcmp.eq.s32.totalorder %v495_v38, %v7489_v39  ;;  %v6092_v50 = vsel %vm600_vm3, 1.0, %v7247_v43  ;;  %v6083_v52 = vsel %vm591_vm4, 1.0, %v7247_v43 }
  0x96   : > { %v6081_v44 = vsel %vm589_vm0, 1.0, %v7247_v43 }
  0x9b   : > { %v504_v40 = vpop.permute.xlu1 %503  ;;  %v537_v60 = vpop.permute.xlu2 %536 }
  0x9c   : > { %v498_v41 = vpop.permute.xlu0 %497  ;;  %vm592_vm5 = vcmp.eq.s32.totalorder %v504_v40, %v7489_v39  ;;  %vm603_vm14 = vcmp.eq.s32.totalorder %v537_v60, %v7489_v39  ;;  %v6858_v60 = vld [vmem:[%s9603_s2 + $0x58] sm:$0xff] }
  0x9d   : > { %vm590_vm1 = vcmp.eq.s32.totalorder %v498_v41, %v7489_v39  ;;  %v6084_v53 = vsel %vm592_vm5, 1.0, %v7247_v43  ;;  %v6095_v14 = vsel %vm603_vm14, 1.0, %v7247_v43  ;;  %vm597_vm5 = vcmp.eq.s32.totalorder %v7492_v42, %v7489_v39 }
  0x9e   : > { %v6082_v45 = vsel %vm590_vm1, 1.0, %v7247_v43  ;;  %v686_v57 = vpack.c.bf16 %v6084_v53, %v6083_v52  ;;  %v6089_v29 = vsel %vm597_vm5, 1.0, %v7247_v43  ;;  %v6852_v52 = vld [vmem:[%s9603_s2 + $0x28] sm:$0xff]  ;;  %vm1682_vm5 = vcmask 1046528  }
  0x9f   : > { %v685_v46 = vpack.c.bf16 %v6082_v45, %v6081_v44  ;;  %v6860_v44 = vld [vmem:[%s9603_s2 + $0x68] sm:$0xff]  ;;  %v6854_v45 = vld [vmem:[%s9603_s2 + $0x38] sm:$0xff] }
  0xa0   : > { %1422 = vmatpush.bf16.msrb.mxu1 %v6860_v44  ;;  %1573 = vmatpush.bf16.msrb.mxu2 %v6854_v45 }
  0xa1   : > { %6117 = vmatmul.msk.bf16.vlgmr.msra.gmra.mxu0 %vm709_vm2, %v685_v46 }
  0xa3   : > { %v516_v47 = vpop.permute.xlu1 %515  ;;  %v546_v5 = vpop.permute.xlu2 %545 }
  0xa4   : > { %v513_v48 = vpop.permute.xlu0 %512  ;;  %vm596_vm12 = vcmp.eq.s32.totalorder %v516_v47, %v7489_v39  ;;  %1574 = vmatpush.bf16.msrb.mxu2 %v6853_v49 }
  0xa5   : > { %vm595_vm13 = vcmp.eq.s32.totalorder %v513_v48, %v7489_v39  ;;  %v6088_v11 = vsel %vm596_vm12, 1.0, %v7247_v43  ;;  %v6859_v48 = vld [vmem:[%s9603_s2 + $0x60] sm:$0xff] }
  0xa6   : > { %v6087_v12 = vsel %vm595_vm13, 1.0, %v7247_v43  ;;  %1423 = vmatpush.bf16.msrb.mxu1 %v6859_v48 }
  0xa7   : > { %v688_v18 = vpack.c.bf16 %v6088_v11, %v6087_v12  ;;  %v6875_v11 = vld [vmem:[%s9603_s2 + $0xe0] sm:$0xff]  ;;  %v6865_v12 = vld [vmem:[%s9603_s2 + $0x90] sm:$0xff] }
  0xa8   : > { %1575 = vmatpush.bf16.msrb.mxu2 %v6852_v52 }
  0xaa   : > { %1424 = vmatpush.bf16.msrb.mxu1 %v6858_v60 }
  0xab   : > { %v525_v51 = vpop.permute.xlu1 %524  ;;  %v555_v8 = vpop.permute.xlu2 %554 }
  0xac   : > { %vm599_vm6 = vcmp.eq.s32.totalorder %v525_v51, %v7489_v39  ;;  %v7505_v54 = vpop.permute.xlu0 %521  ;;  %vm609_vm15 = vcmp.eq.s32.totalorder %v555_v8, %v7489_v39  ;;  %v6867_v8 = vld [vmem:[%s9603_s2 + $0xa0] sm:$0xff] }
  0xad   : > { %v6091_v55 = vsel %vm599_vm6, 1.0, %v7247_v43  ;;  %v6101_v15 = vsel %vm609_vm15, 1.0, %v7247_v43  ;;  %vm598_vm6 = vcmp.eq.s32.totalorder %v7505_v54, %v7489_v39 }
  0xae   : > { %v690_v56 = vpack.c.bf16 %v6092_v50, %v6091_v55  ;;  %v6090_v30 = vsel %vm598_vm6, 1.0, %v7247_v43  ;;  %vm1223_vm6 = vsmask.f32 7424 }
  0xaf   : > { %v689_v36 = vpack.c.bf16 %v6090_v30, %v6089_v29  ;;  %v6886_v30 = vld [vmem:[%s9603_s2 + $0x138] sm:$0xff] }
  0xb0   : > { %6122 = vmatmul.msk.bf16.vlgmr.msra.gmra.mxu1 %vm709_vm2, %v690_v56 }
  0xb1   : > { %6118 = vmatmul.msk.bf16.gmra.mxu0 %vm709_vm2, %v686_v57 }
  0xb3   : > { %v534_v58 = vpop.permute.xlu1 %533  ;;  %v564_v23 = vpop.permute.xlu2 %563 }
  0xb4   : > { %v531_v59 = vpop.permute.xlu0 %530  ;;  %vm602_vm7 = vcmp.eq.s32.totalorder %v534_v58, %v7489_v39  ;;  %vm612_vm9 = vcmp.eq.s32.totalorder %v564_v23, %v7489_v39 }
  0xb5   : > { %vm601_vm8 = vcmp.eq.s32.totalorder %v531_v59, %v7489_v39  ;;  %v6094_v61 = vsel %vm602_vm7, 1.0, %v7247_v43  ;;  %v6104_v33 = vsel %vm612_vm9, 1.0, %v7247_v43  ;;  %v6851_v59 = vld [vmem:[%s9603_s2 + $0x20] sm:$0xff] }
  0xb6   : > { %v6093_v62 = vsel %vm601_vm8, 1.0, %v7247_v43  ;;  %vm606_vm8 = vcmp.eq.s32.totalorder %v546_v5, %v7489_v39  ;;  %1576 = vmatpush.bf16.msrb.mxu2 %v6851_v59  ;;  %v6847_v5 = vld [vmem:[%s9603_s2] sm:$0xff] }
  0xb7   : > { %v691_v3 = vpack.c.bf16 %v6094_v61, %v6093_v62  ;;  %v6098_v32 = vsel %vm606_vm8, 1.0, %v7247_v43  ;;  %v6850_v61 = vld [vmem:[%s9603_s2 + $0x18] sm:$0xff]  ;;  %vm1921_vm8 = vsmask.f32 6400 }
  0xba   : > { %1577 = vmatpush.bf16.msrb.mxu2 %v6850_v61 }
  0xbb   : > { %v543_v63 = vpop.permute.xlu1 %542  ;;  %v573_v38 = vpop.permute.xlu2 %572 }
  0xbc   : > { %v540_v2 = vpop.permute.xlu0 %539  ;;  %vm605_vm4 = vcmp.eq.s32.totalorder %v543_v63, %v7489_v39 }
  0xbd   : > { %vm604_vm11 = vcmp.eq.s32.totalorder %v540_v2, %v7489_v39  ;;  %v6097_v27 = vsel %vm605_vm4, 1.0, %v7247_v43  ;;  %v6848_v2 = vld [vmem:[%s9603_s2 + $0x8] sm:$0xff] }
  0xbe   : > { %v6096_v9 = vsel %vm604_vm11, 1.0, %v7247_v43  ;;  %v693_v34 = vpack.c.bf16 %v6098_v32, %v6097_v27  ;;  %vm615_vm11 = vcmp.eq.s32.totalorder %v573_v38, %v7489_v39 }
  0xbf   : > { %v692_v16 = vpack.c.bf16 %v6096_v9, %v6095_v14  ;;  %v6107_v41 = vsel %vm615_vm11, 1.0, %v7247_v43  ;;  %v6876_v9 = vld [vmem:[%s9603_s2 + $0xe8] sm:$0xff] }
  0xc0   : > { %6123 = vmatmul.msk.bf16.gmra.mxu1 %vm709_vm2, %v691_v3  ;;  %v6878_v3 = vld [vmem:[%s9603_s2 + $0xf8] sm:$0xff]  ;;  %v6856_v14 = vld [vmem:[%s9603_s2 + $0x48] sm:$0xff] }
  0xc1   : > { %6119 = vmatmul.msk.bf16.gmra.mxu0 %vm709_vm2, %v687_v4  ;;  %v6857_v4 = vld [vmem:[%s9603_s2 + $0x50] sm:$0xff] }
  0xc2   : > { %2063 = vmatpush.bf16.msrb.mxu0 %v6878_v3  ;;  %1425 = vmatpush.bf16.msrb.mxu1 %v6857_v4 }
  0xc3   : > { %v7520_v6 = vpop.permute.xlu1 %551  ;;  %v582_v53 = vpop.permute.xlu2 %581 }
  0xc4   : > { %v7522_v7 = vpop.permute.xlu0 %548  ;;  %vm608_vm12 = vcmp.eq.s32.totalorder %v7520_v6, %v7489_v39  ;;  %vm618_vm15 = vcmp.eq.s32.totalorder %v582_v53, %v7489_v39  ;;  %v6868_v6 = vld [vmem:[%s9603_s2 + $0xa8] sm:$0xff] }
  0xc5   : > { %vm607_vm13 = vcmp.eq.s32.totalorder %v7522_v7, %v7489_v39  ;;  %v6100_v46 = vsel %vm608_vm12, 1.0, %v7247_v43  ;;  %v6110_v55 = vsel %vm618_vm15, 1.0, %v7247_v43  ;;  %v6877_v7 = vld [vmem:[%s9603_s2 + $0xf0] sm:$0xff] }
  0xc6   : > { %v6099_v47 = vsel %vm607_vm13, 1.0, %v7247_v43  ;;  %2064 = vmatpush.bf16.msrb.mxu0 %v6877_v7  ;;  %1426 = vmatpush.bf16.msrb.mxu1 %v6856_v14 }
  0xc7   : > { %v694_v50 = vpack.c.bf16 %v6100_v46, %v6099_v47 }
  0xca   : > { %2065 = vmatpush.bf16.msrb.mxu0 %v6876_v9 }
  0xcb   : > { %v561_v10 = vpop.permute.xlu1 %560 }
  0xcc   : > { %v558_v13 = vpop.permute.xlu0 %557  ;;  %vm611_vm7 = vcmp.eq.s32.totalorder %v561_v10, %v7489_v39  ;;  %v6866_v10 = vld [vmem:[%s9603_s2 + $0x98] sm:$0xff] }
  0xcd   : > { %vm610_vm0 = vcmp.eq.s32.totalorder %v558_v13, %v7489_v39  ;;  %v6103_v31 = vsel %vm611_vm7, 1.0, %v7247_v43  ;;  %v6874_v13 = vld [vmem:[%s9603_s2 + $0xd8] sm:$0xff]  ;;  %vm2204_vm7 = vcmask 1045504  }
  0xce   : > { %v6102_v17 = vsel %vm610_vm0, 1.0, %v7247_v43  ;;  %v696_v37 = vpack.c.bf16 %v6104_v33, %v6103_v31  ;;  %2066 = vmatpush.bf16.msrb.mxu0 %v6875_v11 }
  0xcf   : > { %v695_v19 = vpack.c.bf16 %v6102_v17, %v6101_v15  ;;  %v6864_v17 = vld [vmem:[%s9603_s2 + $0x88] sm:$0xff] }
  0xd0   : > { %6124 = vmatmul.msk.bf16.gmra.mxu1 %vm709_vm2, %v692_v16 }
  0xd1   : > { %6120 = vmatmul.msk.bf16.gmra.mxu0 %vm709_vm2, %v688_v18  ;;  %6127 = vmatmul.msk.bf16.vlgmr.msra.gmra.mxu2 %vm709_vm2, %v695_v19  ;;  %v6873_v18 = vld [vmem:[%s9603_s2 + $0xd0] sm:$0xff] }
  0xd2   : > { %2067 = vmatpush.bf16.msrb.mxu0 %v6874_v13 }
  0xd3   : > { %v570_v20 = vpop.permute.xlu1 %569 }
  0xd4   : > { %vm614_vm1 = vcmp.eq.s32.totalorder %v570_v20, %v7489_v39  ;;  %v567_v21 = vpop.permute.xlu0 %566  ;;  %v6863_v20 = vld [vmem:[%s9603_s2 + $0x80] sm:$0xff] }
  0xd5   : > { %v6106_v22 = vsel %vm614_vm1, 1.0, %v7247_v43  ;;  %vm613_vm3 = vcmp.eq.s32.totalorder %v567_v21, %v7489_v39  ;;  %v6872_v21 = vld [vmem:[%s9603_s2 + $0xc8] sm:$0xff] }
  0xd6   : > { %v6105_v24 = vsel %vm613_vm3, 1.0, %v7247_v43  ;;  %2068 = vmatpush.bf16.msrb.mxu0 %v6873_v18  ;;  %vm912_vm3 = vcmask 1044484  }
  0xd7   : > { %v697_v25 = vpack.c.bf16 %v6106_v22, %v6105_v24  ;;  %v6855_v22 = vld [vmem:[%s9603_s2 + $0x40] sm:$0xff] }
  0xd8   : > { %1427 = vmatpush.bf16.msrb.mxu1 %v6855_v22 }
  0xd9   : > { %6129 = vmatmul.msk.bf16.vlgmr.msra.gmra.mxu3 %vm709_vm2, %v697_v25  ;;  %v6871_v25 = vld [vmem:[%s9603_s2 + $0xc0] sm:$0xff] }
  0xda   : > { %2069 = vmatpush.bf16.msrb.mxu0 %v6872_v21 }
  0xdb   : > { %v579_v51 = vpop.permute.xlu1 %578 }
  0xdc   : > { %v576_v35 = vpop.permute.xlu0 %575  ;;  %vm617_vm14 = vcmp.eq.s32.totalorder %v579_v51, %v7489_v39  ;;  %2302 = vmatpush.bf16.msra.mxu1 %v6886_v30 }
  0xdd   : > { %vm616_vm10 = vcmp.eq.s32.totalorder %v576_v35, %v7489_v39  ;;  %v6109_v54 = vsel %vm617_vm14, 1.0, %v7247_v43 }
  0xde   : > { %v6108_v40 = vsel %vm616_vm10, 1.0, %v7247_v43  ;;  %v699_v56 = vpack.c.bf16 %v6110_v55, %v6109_v54  ;;  %2070 = vmatpush.bf16.msrb.mxu0 %v6871_v25 }
  0xdf   : > { %v698_v42 = vpack.c.bf16 %v6108_v40, %v6107_v41 }
  0xe0   : > { %6125 = vmatmul.msk.bf16.gmra.mxu1 %vm709_vm2, %v693_v34 }
  0xe1   : > { %6121 = vmatmul.msk.bf16.gmra.mxu0 %vm709_vm2, %v689_v36  ;;  %6128 = vmatmul.msk.bf16.gmra.mxu2 %vm709_vm2, %v696_v37 }
  0xe3   : > { %v588_v57 = vpop.permute.xlu1 %587 }
  0xe4   : > { %v585_v58 = vpop.permute.xlu0 %584  ;;  %vm620_vm0 = vcmp.eq.s32.totalorder %v588_v57, %v7489_v39 }
  0xe5   : > { %vm619_vm1 = vcmp.eq.s32.totalorder %v585_v58, %v7489_v39  ;;  %v6112_v62 = vsel %vm620_vm0, 1.0, %v7247_v43  ;;  %v6849_v39 = vld [vmem:[%s9603_s2 + $0x10] sm:$0xff] }
  0xe6   : > { %v6111_v63 = vsel %vm619_vm1, 1.0, %v7247_v43  ;;  %1578 = vmatpush.bf16.msrb.mxu2 %v6849_v39  ;;  %v6869_v43 = vld [vmem:[%s9603_s2 + $0xb0] sm:$0xff] }
  0xe7   : > { %v700_v0 = vpack.c.bf16 %v6112_v62, %v6111_v63  ;;  %1781 = vmatpush.bf16.msrb.mxu3 %v6869_v43 }
  0xe9   : > { %6130 = vmatmul.msk.bf16.gmra.mxu3 %vm709_vm2, %v698_v42 }
  0xea   : > { %1579 = vmatpush.bf16.msrb.mxu2 %v6848_v2 }
  0xeb   : > { %1782 = vmatpush.bf16.msrb.mxu3 %v6868_v6 }
  0xee   : > { %1580 = vmatpush.bf16.msrb.mxu2 %v6847_v5 }
  0xef   : > { %1783 = vmatpush.bf16.msrb.mxu3 %v6867_v8 }
  0xf0   : > { %6126 = vmatmul.msk.bf16.gmra.mxu1 %vm709_vm2, %v694_v50 }
  0xf3   : > { %1784 = vmatpush.bf16.msrb.mxu3 %v6866_v10 }
  0xf7   : > { %1785 = vmatpush.bf16.msrb.mxu3 %v6865_v12 }
  0xf9   : > { %6131 = vmatmul.msk.bf16.gmra.mxu3 %vm709_vm2, %v699_v56 }
  0xfb   : > { %1786 = vmatpush.bf16.msrb.mxu3 %v6864_v17 }
  0xff   : > { %1787 = vmatpush.bf16.msrb.mxu3 %v6863_v20 }
 0x109   : > { %6132 = vmatmul.msk.bf16.gmra.mxu3 %vm709_vm2, %v700_v0  ;;  %vm911_vm2 = vcmask 1040384  }
 0x10a   : > { %vm7679_vm4 = vmor %vm911_vm2, %vm912_vm3 }
 0x11e   : > { %v767_v15 = vpop.f32.mrf.mxu0 }
 0x11f   : > { %v847_v16 = vpack.c.bf16 %v767_v15, %v767_v15 }
 0x121   : > { %v914_v19 = vrot.slane %v847_v16, 7 }
 0x123   : > { %1042 = vst [vmem:[#allocation2] sm:$0xe] %v914_v19  ;;  %v915_v27 = vrot.slane %v914_v19, 4 }
 0x126   : > { %v769_v23 = vpop.f32.mrf.mxu0 }
 0x127   : > { %v848_v24 = vpack.c.bf16 %v769_v23, %v769_v23 }
 0x129   : > { %v916_v28 = vrot.slane %v848_v24, 7 }
 0x12a   : > { %v1662_v49 = vld [vmem:[#allocation2] sm:$0xe] }
 0x12b   : > { %v917_v29 = vsel %vm7679_vm4, %v915_v27, %v916_v28  ;;  %v918_v35 = vrot.slane %v916_v28, 4  ;;  %v2184_v53 = vld [vmem:[#allocation2] sm:$0xc]  ;;  %v1680_v55 = vunpack.c.l.b16 %v1662_v49 }
 0x12c   : > { %1043 = vst [vmem:[#allocation2 + $0x4] sm:$0xf] %v917_v29  ;;  %v2202_v59 = vunpack.c.l.b16 %v2184_v53 }
 0x12d   : > { %v792_v31 = vpop.f32.mrf.mxu1 }
 0x12e   : > { %v772_v32 = vpop.f32.mrf.mxu0  ;;  %v857_v34 = vpack.c.bf16 %v792_v31, %v792_v31 }
 0x12f   : > { %v849_v33 = vpack.c.bf16 %v772_v32, %v772_v32 }
 0x130   : > { %v7690_v40 = vrot.slane %v857_v34, 7 }
 0x131   : > { %v919_v36 = vrot.slane %v849_v33, 7 }
 0x132   : > { %v945_v46 = vrot.slane %v7690_v40, 4 }
 0x133   : > { %v920_v37 = vsel %vm7679_vm4, %v918_v35, %v919_v36  ;;  %v7007_v38 = vld [vmem:[#allocation2] sm:$0xff]   ;;  %v921_v48 = vrot.slane %v919_v36, 4 }
 0x134   : > { %1044 = vst [vmem:[#allocation2 + $0x8] sm:$0xf] %v920_v37  ;;  %1581 = vmatmul.bf16.vlgmr.msrb.gmra.mxu2 %v7007_v38  ;;  %v7009_v51 = vunpack.c.h.b16 %v7007_v38  ;;  %v1227_v57 = vshll.u32 %v7007_v38, 16  ;;  %v1225_v8 = vshrl.u32 %v7007_v38, 16 }
 0x135   : > { %v794_v41 = vpop.f32.mrf.mxu1 }
 0x136   : > { %v774_v42 = vpop.f32.mrf.mxu0  ;;  %v858_v44 = vpack.c.bf16 %v794_v41, %v794_v41  ;;  %v1681_v58 = vpack.c.b16 %v7009_v51, %v1680_v55  ;;  %v2203_v63 = vpack.c.b16 %v7009_v51, %v2202_v59  ;;  %v1229_v43 = vrot.slane %v1227_v57, 1 }
 0x137   : > { %v850_v45 = vpack.c.bf16 %v774_v42, %v774_v42 }
 0x138   : > { %v946_v47 = vrot.slane %v858_v44, 7  ;;  %v1923_v4 = vshrl.u32 %v1681_v58, 16  ;;  %v1926_v5 = vshll.u32 %v1681_v58, 16  ;;  %v2205_v9 = vrot.slane %v2203_v63, 2 }
 0x139   : > { %v922_v50 = vrot.slane %v850_v45, 7  ;;  %v1683_v10 = vrot.slane %v1681_v58, 1  ;;  %v1230_v18 = vor.u32 %v1229_v43, %v1225_v8  ;;  %v6885_v45 = vld [vmem:[%s9603_s2 + $0x130] sm:$0xff] }
 0x13a   : > { %v947_v52 = vsel %vm7679_vm4, %v945_v46, %v946_v47  ;;  %v948_v0 = vrot.slane %v946_v47, 4  ;;  %v1925_v19 = vrot.slane %v1923_v4, 1  ;;  %v1928_v20 = vrot.slane %v1926_v5, 2  ;;  %2303 = vmatpush.bf16.msra.mxu1 %v6885_v45 }
 0x13b   : > { %v923_v54 = vsel %vm7679_vm4, %v921_v48, %v922_v50  ;;  %1053 = vst [vmem:[#allocation2 + $0x2c] sm:$0xf] %v947_v52  ;;  %v924_v1 = vrot.slane %v922_v50, 4 }
 0x13c   : > { %1045 = vst [vmem:[#allocation2 + $0xc] sm:$0xf] %v923_v54  ;;  %v1929_v34 = vor.u32 %v1928_v20, %v1925_v19 }
 0x13d   : > { %v797_v56 = vpop.f32.mrf.mxu1 }
 0x13e   : > { %v777_v60 = vpop.f32.mrf.mxu0  ;;  %v859_v61 = vpack.c.bf16 %v797_v56, %v797_v56 }
 0x13f   : > { %v851_v62 = vpack.c.bf16 %v777_v60, %v777_v60 }
 0x140   : > { %v949_v39 = vrot.slane %v859_v61, 7 }
 0x141   : > { %v925_v2 = vrot.slane %v851_v62, 7 }
 0x142   : > { %v950_v3 = vsel %vm7679_vm4, %v948_v0, %v949_v39  ;;  %v951_v25 = vrot.slane %v949_v39, 4 }
 0x143   : > { %v926_v6 = vsel %vm7679_vm4, %v924_v1, %v925_v2  ;;  %1054 = vst [vmem:[#allocation2 + $0x30] sm:$0xf] %v950_v3  ;;  %v7701_v7 = vld [vmem:[#allocation2 + $0x8] sm:$0xff]  ;;  %v927_v30 = vrot.slane %v925_v2, 4 }
 0x144   : > { %1046 = vst [vmem:[#allocation2 + $0x10] sm:$0xf] %v926_v6  ;;  %1586 = vmatmul.bf16.gmra.mxu2 %v7701_v7  ;;  %v1684_v12 = vrot.slane %v7701_v7, 1  ;;  %v1232_v13 = vshll.u32 %v7701_v7, 16  ;;  %v1236_v14 = vshrl.u32 %v7701_v7, 16  ;;  %v2206_v15 = vrot.slane %v7701_v7, 2 }
 0x145   : > { %v799_v11 = vpop.f32.mrf.mxu1 }
 0x146   : > { %v779_v16 = vpop.f32.mrf.mxu0  ;;  %v860_v17 = vpack.c.bf16 %v799_v11, %v799_v11  ;;  %v1685_v22 = vsel %vm1682_vm5, %v1683_v10, %v1684_v12  ;;  %v1234_v23 = vrot.slane %v1232_v13, 1  ;;  %v1930_v24 = vrot.slane %v1236_v14, 1 }
 0x147   : > { %v852_v21 = vpack.c.bf16 %v779_v16, %v779_v16  ;;  %1788 = vmatmul.bf16.vlgmr.msrb.gmra.mxu3 %v1685_v22  ;;  %v1931_v28 = vrot.slane %v1232_v13, 2  ;;  %v7712_v29 = vsel %vm2204_vm7, %v2205_v9, %v2206_v15 }
 0x148   : > { %v952_v27 = vrot.slane %v860_v17, 7  ;;  %v1235_v32 = vsel %vm1223_vm6, %v1230_v18, %v1234_v23  ;;  %v1238_v60 = vor.u32 %v1236_v14, %v1234_v23 }
 0x149   : > { %v928_v31 = vrot.slane %v852_v21, 7  ;;  %1428 = vmatmul.bf16.vlgmr.msrb.gmra.mxu1 %v1235_v32  ;;  %v1932_v35 = vor.u32 %v1931_v28, %v1930_v24 }
 0x14a   : > { %v953_v33 = vsel %vm7679_vm4, %v951_v25, %v952_v27  ;;  %v954_v46 = vrot.slane %v952_v27, 4 }
 0x14b   : > { %v929_v36 = vsel %vm7679_vm4, %v927_v30, %v928_v31  ;;  %1055 = vst [vmem:[#allocation2 + $0x34] sm:$0xf] %v953_v33  ;;  %v1933_v37 = vsel %vm1921_vm8, %v1929_v34, %v1932_v35  ;;  %v930_v48 = vrot.slane %v928_v31, 4 }
 0x14c   : > { %1047 = vst [vmem:[#allocation2 + $0x14] sm:$0xf] %v929_v36  ;;  %2071 = vmatmul.bf16.vlgmr.msrb.gmra.mxu0 %v1933_v37 }
 0x14d   : > { %v802_v38 = vpop.f32.mrf.mxu1 }
 0x14e   : > { %v782_v41 = vpop.f32.mrf.mxu0  ;;  %v861_v42 = vpack.c.bf16 %v802_v38, %v802_v38 }
 0x14f   : > { %v853_v44 = vpack.c.bf16 %v782_v41, %v782_v41 }
 0x150   : > { %v955_v47 = vrot.slane %v861_v42, 7 }
 0x151   : > { %v931_v49 = vrot.slane %v853_v44, 7 }
 0x152   : > { %v956_v50 = vsel %vm7679_vm4, %v954_v46, %v955_v47  ;;  %v957_v39 = vrot.slane %v955_v47, 4 }
 0x153   : > { %v932_v51 = vsel %vm7679_vm4, %v930_v48, %v931_v49  ;;  %1056 = vst [vmem:[#allocation2 + $0x38] sm:$0xf] %v956_v50  ;;  %v7727_v52 = vld [vmem:[#allocation2 + $0x10] sm:$0xff]  ;;  %v933_v3 = vrot.slane %v931_v49, 4 }
 0x154   : > { %1048 = vst [vmem:[#allocation2 + $0x18] sm:$0xf] %v932_v51  ;;  %v817_v53 = vpop.f32.mrf.mxu2  ;;  %1591 = vmatmul.bf16.gmra.mxu2 %v7727_v52  ;;  %v1686_v55 = vrot.slane %v7727_v52, 1  ;;  %v1240_v56 = vshll.u32 %v7727_v52, 16  ;;  %v1244_v57 = vshrl.u32 %v7727_v52, 16  ;;  %v2208_v11 = vrot.slane %v7727_v52, 2 }
 0x155   : > { %v804_v54 = vpop.f32.mrf.mxu1  ;;  %v867_v61 = vpack.c.bf16 %v817_v53, %v817_v53 }
 0x156   : > { %v784_v58 = vpop.f32.mrf.mxu0  ;;  %v862_v59 = vpack.c.bf16 %v804_v54, %v804_v54  ;;  %v1687_v63 = vsel %vm1682_vm5, %v1684_v12, %v1686_v55  ;;  %v1242_v0 = vrot.slane %v1240_v56, 1  ;;  %v1934_v2 = vrot.slane %v1244_v57, 1 }
 0x157   : > { %v854_v62 = vpack.c.bf16 %v784_v58, %v784_v58  ;;  %1793 = vmatmul.bf16.gmra.mxu3 %v1687_v63  ;;  %v1935_v43 = vrot.slane %v1240_v56, 2  ;;  %v7741_v9 = vrot.slane %v867_v61, 7  ;;  %v7753_v18 = vsel %vm2204_vm7, %v2206_v15, %v2208_v11 }
 0x158   : > { %v958_v1 = vrot.slane %v862_v59, 7  ;;  %v1243_v5 = vsel %vm1223_vm6, %v1238_v60, %v1242_v0  ;;  %v1246_v37 = vor.u32 %v1244_v57, %v1242_v0 }
 0x159   : > { %v934_v4 = vrot.slane %v854_v62, 7  ;;  %1433 = vmatmul.bf16.gmra.mxu1 %v1243_v5  ;;  %v7739_v8 = vor.u32 %v1935_v43, %v1934_v2  ;;  %v975_v22 = vrot.slane %v7741_v9, 4  ;;  %v6884_v2 = vld [vmem:[%s9603_s2 + $0x128] sm:$0xff] }
 0x15a   : > { %v959_v6 = vsel %vm7679_vm4, %v957_v39, %v958_v1  ;;  %v960_v25 = vrot.slane %v958_v1, 4  ;;  %2304 = vmatpush.bf16.msra.mxu1 %v6884_v2 }
 0x15b   : > { %v935_v10 = vsel %vm7679_vm4, %v933_v3, %v934_v4  ;;  %1057 = vst [vmem:[#allocation2 + $0x3c] sm:$0xf] %v959_v6  ;;  %v1937_v14 = vsel %vm1921_vm8, %v1932_v35, %v7739_v8  ;;  %v936_v28 = vrot.slane %v934_v4, 4 }
 0x15c   : > { %1049 = vst [vmem:[#allocation2 + $0x1c] sm:$0xf] %v935_v10  ;;  %v819_v12 = vpop.f32.mrf.mxu2  ;;  %v827_v13 = vpop.f32.mrf.mxu3  ;;  %2076 = vmatmul.bf16.gmra.mxu0 %v1937_v14 }
 0x15d   : > { %v868_v16 = vpack.c.bf16 %v819_v12, %v819_v12  ;;  %v807_v17 = vpop.f32.mrf.mxu1  ;;  %v871_v19 = vpack.c.bf16 %v827_v13, %v827_v13 }
 0x15e   : > { %v787_v20 = vpop.f32.mrf.mxu0  ;;  %v863_v21 = vpack.c.bf16 %v807_v17, %v807_v17 }
 0x15f   : > { %v976_v23 = vrot.slane %v868_v16, 7  ;;  %v855_v24 = vpack.c.bf16 %v787_v20, %v787_v20  ;;  %v7758_v32 = vrot.slane %v871_v19, 7 }
 0x160   : > { %v961_v27 = vrot.slane %v863_v21, 7 }
 0x161   : > { %v977_v30 = vsel %vm7679_vm4, %v975_v22, %v976_v23  ;;  %v937_v31 = vrot.slane %v855_v24, 7  ;;  %v978_v34 = vrot.slane %v976_v23, 4  ;;  %v987_v46 = vrot.slane %v7758_v32, 4 }
 0x162   : > { %1063 = vst [vmem:[#allocation2 + $0x54] sm:$0xf] %v977_v30  ;;  %v962_v7 = vsel %vm7679_vm4, %v960_v25, %v961_v27  ;;  %v963_v47 = vrot.slane %v961_v27, 4 }
 0x163   : > { %v938_v15 = vsel %vm7679_vm4, %v936_v28, %v937_v31  ;;  %1058 = vst [vmem:[#allocation2 + $0x40] sm:$0xf] %v962_v7  ;;  %v7764_v33 = vld [vmem:[#allocation2 + $0x18] sm:$0xff]  ;;  %v939_v63 = vrot.slane %v937_v31, 4 }
 0x164   : > { %1050 = vst [vmem:[#allocation2 + $0x20] sm:$0xf] %v938_v15  ;;  %v822_v35 = vpop.f32.mrf.mxu2  ;;  %v829_v36 = vpop.f32.mrf.mxu3  ;;  %1596 = vmatmul.bf16.gmra.mxu2 %v7764_v33  ;;  %v1688_v44 = vrot.slane %v7764_v33, 1  ;;  %v1248_v45 = vshll.u32 %v7764_v33, 16  ;;  %v1252_v50 = vshrl.u32 %v7764_v33, 16  ;;  %v2210_v14 = vrot.slane %v7764_v33, 2 }
 0x165   : > { %v869_v38 = vpack.c.bf16 %v822_v35, %v822_v35  ;;  %v872_v41 = vpack.c.bf16 %v829_v36, %v829_v36  ;;  %v809_v42 = vpop.f32.mrf.mxu1 }
 0x166   : > { %v789_v48 = vpop.f32.mrf.mxu0  ;;  %v864_v49 = vpack.c.bf16 %v809_v42, %v809_v42  ;;  %v1689_v56 = vsel %vm1682_vm5, %v1686_v55, %v1688_v44  ;;  %v1250_v58 = vrot.slane %v1248_v45, 1  ;;  %v1938_v59 = vrot.slane %v1252_v50, 1 }
 0x167   : > { %v979_v51 = vrot.slane %v869_v38, 7  ;;  %v988_v53 = vrot.slane %v872_v41, 7  ;;  %v856_v54 = vpack.c.bf16 %v789_v48, %v789_v48  ;;  %1798 = vmatmul.bf16.gmra.mxu3 %v1689_v56  ;;  %v1939_v60 = vrot.slane %v1248_v45, 2 }
 0x168   : > { %v964_v57 = vrot.slane %v864_v49, 7  ;;  %v1251_v55 = vsel %vm1223_vm6, %v1246_v37, %v1250_v58  ;;  %v1254_v41 = vor.u32 %v1252_v50, %v1250_v58 }
 0x169   : > { %v980_v61 = vsel %vm7679_vm4, %v978_v34, %v979_v51  ;;  %v989_v62 = vsel %vm7679_vm4, %v987_v46, %v988_v53  ;;  %v940_v0 = vrot.slane %v856_v54, 7  ;;  %1438 = vmatmul.bf16.gmra.mxu1 %v1251_v55  ;;  %v7785_v1 = vor.u32 %v1939_v60, %v1938_v59 }
 0x16a   : > { %1064 = vst [vmem:[#allocation2 + $0x58] sm:$0xf] %v980_v61  ;;  %v965_v39 = vsel %vm7679_vm4, %v963_v47, %v964_v57  ;;  %v981_v16 = vrot.slane %v979_v51, 4  ;;  %v990_v20 = vrot.slane %v988_v53, 4  ;;  %v966_v23 = vrot.slane %v964_v57, 4 }
 0x16b   : > { %1067 = vst [vmem:[#allocation2 + $0x64] sm:$0xf] %v989_v62  ;;  %v941_v43 = vsel %vm7679_vm4, %v939_v63, %v940_v0  ;;  %v942_v3 = vrot.slane %v940_v0, 4  ;;  %v1941_v12 = vsel %vm1921_vm8, %v7739_v8, %v7785_v1  ;;  %v7804_v8 = vsel %vm2204_vm7, %v2208_v11, %v2210_v14 }
 0x16c   : > { %1059 = vst [vmem:[#allocation2 + $0x44] sm:$0xf] %v965_v39  ;;  %v824_v4 = vpop.f32.mrf.mxu2  ;;  %v832_v5 = vpop.f32.mrf.mxu3  ;;  %2081 = vmatmul.bf16.gmra.mxu0 %v1941_v12 }
 0x16d   : > { %1051 = vst [vmem:[#allocation2 + $0x24] sm:$0xf] %v941_v43  ;;  %v870_v6 = vpack.c.bf16 %v824_v4, %v824_v4  ;;  %v873_v10 = vpack.c.bf16 %v832_v5, %v832_v5  ;;  %v812_v13 = vpop.f32.mrf.mxu1  ;;  %v944_v17 = vsel %vm7679_vm4, %v942_v3, %v7690_v40 }
 0x16e   : > { %v865_v19 = vpack.c.bf16 %v812_v13, %v812_v13  ;;  %1052 = vst [vmem:[#allocation2 + $0x28] sm:$0xf] %v944_v17 }
 0x16f   : > { %v982_v21 = vrot.slane %v870_v6, 7  ;;  %v991_v22 = vrot.slane %v873_v10, 7 }
 0x170   : > { %v967_v24 = vrot.slane %v865_v19, 7 }
 0x171   : > { %v983_v25 = vsel %vm7679_vm4, %v981_v16, %v982_v21  ;;  %v984_v27 = vrot.slane %v982_v21, 4  ;;  %v992_v40 = vsel %vm7679_vm4, %v990_v20, %v991_v22  ;;  %v993_v37 = vrot.slane %v991_v22, 4  ;;  %v6883_v16 = vld [vmem:[%s9603_s2 + $0x120] sm:$0xff] }
 0x172   : > { %1065 = vst [vmem:[#allocation2 + $0x5c] sm:$0xf] %v983_v25  ;;  %v968_v28 = vsel %vm7679_vm4, %v966_v23, %v967_v24  ;;  %v969_v38 = vrot.slane %v967_v24, 4  ;;  %2305 = vmatpush.bf16.msra.mxu1 %v6883_v16  ;;  %v7852_v23 = vld [vmem:[#allocation2 + $0x30] sm:$0xff] }
 0x173   : > { %v986_v52 = vsel %vm7679_vm4, %v984_v27, %v7758_v32  ;;  %1068 = vst [vmem:[#allocation2 + $0x68] sm:$0xf] %v992_v40 }
 0x174   : > { %1066 = vst [vmem:[#allocation2 + $0x60] sm:$0xf] %v986_v52  ;;  %v834_v11 = vpop.f32.mrf.mxu3  ;;  %v7815_v30 = vld [vmem:[#allocation2 + $0x20] sm:$0xff]  ;;  %v1272_v52 = vshll.u32 %v7852_v23, 16 }
 0x175   : > { %1060 = vst [vmem:[#allocation2 + $0x48] sm:$0xf] %v968_v28  ;;  %v874_v31 = vpack.c.bf16 %v834_v11, %v834_v11  ;;  %v814_v7 = vpop.f32.mrf.mxu1  ;;  %1601 = vmatmul.bf16.gmra.mxu2 %v7815_v30  ;;  %v1690_v34 = vrot.slane %v7815_v30, 1  ;;  %v1256_v35 = vshll.u32 %v7815_v30, 16  ;;  %v1260_v36 = vshrl.u32 %v7815_v30, 16  ;;  %v7836_v59 = vld [vmem:[#allocation2 + $0x28] sm:$0xff] }
 0x176   : > { %v866_v15 = vpack.c.bf16 %v814_v7, %v814_v7  ;;  %v1264_v63 = vshll.u32 %v7836_v59, 16  ;;  %v1268_v0 = vshrl.u32 %v7836_v59, 16  ;;  %v1692_v39 = vrot.slane %v7836_v59, 1 }
 0x177   : > { %v994_v32 = vrot.slane %v874_v31, 7  ;;  %v1691_v45 = vsel %vm1682_vm5, %v1688_v44, %v1690_v34  ;;  %v1258_v46 = vrot.slane %v1256_v35, 1  ;;  %v1942_v47 = vrot.slane %v1260_v36, 1 }
 0x178   : > { %v970_v42 = vrot.slane %v866_v15, 7  ;;  %1803 = vmatmul.bf16.gmra.mxu3 %v1691_v45  ;;  %v1943_v49 = vrot.slane %v1256_v35, 2  ;;  %v1946_v2 = vrot.slane %v1268_v0, 1  ;;  %v1947_v43 = vrot.slane %v1264_v63, 2 }
 0x179   : > { %v995_v48 = vsel %vm7679_vm4, %v993_v37, %v994_v32  ;;  %v1259_v54 = vsel %vm1223_vm6, %v1254_v41, %v1258_v46  ;;  %v996_v60 = vrot.slane %v994_v32, 4  ;;  %v1266_v3 = vrot.slane %v1264_v63, 1 }
 0x17a   : > { %1069 = vst [vmem:[#allocation2 + $0x6c] sm:$0xf] %v995_v48  ;;  %v971_v51 = vsel %vm7679_vm4, %v969_v38, %v970_v42  ;;  %v972_v53 = vrot.slane %v970_v42, 4  ;;  %1443 = vmatmul.bf16.gmra.mxu1 %v1259_v54  ;;  %v1944_v50 = vor.u32 %v1943_v49, %v1942_v47  ;;  %v1693_v6 = vsel %vm1682_vm5, %v1690_v34, %v1692_v39 }
 0x17b   : > { %1061 = vst [vmem:[#allocation2 + $0x4c] sm:$0xf] %v971_v51  ;;  %v1948_v12 = vor.u32 %v1947_v43, %v1946_v2  ;;  %v2212_v24 = vrot.slane %v7815_v30, 2  ;;  %v2214_v25 = vrot.slane %v7836_v59, 2  ;;  %v1276_v11 = vshrl.u32 %v7852_v23, 16 }
 0x17c   : > { %v974_v44 = vsel %vm7679_vm4, %v972_v53, %v7741_v9  ;;  %v837_v56 = vpop.f32.mrf.mxu3  ;;  %v1945_v58 = vsel %vm1921_vm8, %v7785_v1, %v1944_v50  ;;  %v1262_v1 = vor.u32 %v1260_v36, %v1258_v46  ;;  %v1694_v7 = vrot.slane %v7852_v23, 1  ;;  %v7877_v46 = vld [vmem:[#allocation2 + $0x38] sm:$0xff] }
 0x17d   : > { %1062 = vst [vmem:[#allocation2 + $0x50] sm:$0xf] %v974_v44  ;;  %v875_v57 = vpack.c.bf16 %v837_v56, %v837_v56  ;;  %2086 = vmatmul.bf16.gmra.mxu0 %v1945_v58  ;;  %v1949_v20 = vsel %vm1921_vm8, %v1944_v50, %v1948_v12  ;;  %v7861_v40 = vsel %vm2204_vm7, %v2210_v14, %v2212_v24  ;;  %v1950_v34 = vrot.slane %v1276_v11, 1  ;;  %v6882_v58 = vld [vmem:[%s9603_s2 + $0x118] sm:$0xff] }
 0x17e   : > { %v1267_v13 = vsel %vm1223_vm6, %v1262_v1, %v1266_v3  ;;  %v7866_v28 = vsel %vm2204_vm7, %v2212_v24, %v2214_v25  ;;  %v1270_v33 = vor.u32 %v1268_v0, %v1266_v3  ;;  %v1951_v35 = vrot.slane %v1272_v52, 2  ;;  %2306 = vmatpush.bf16.msra.mxu1 %v6882_v58 }
 0x17f   : > { %v997_v61 = vrot.slane %v875_v57, 7  ;;  %v1695_v36 = vsel %vm1682_vm5, %v1692_v39, %v1694_v7  ;;  %v1274_v37 = vrot.slane %v1272_v52, 1  ;;  %v1280_v47 = vshll.u32 %v7877_v46, 16 }
 0x180   : > { %v1952_v42 = vor.u32 %v1951_v35, %v1950_v34  ;;  %v1284_v48 = vshrl.u32 %v7877_v46, 16  ;;  %v1696_v49 = vrot.slane %v7877_v46, 1 }
 0x181   : > { %v998_v62 = vsel %vm7679_vm4, %v996_v60, %v997_v61  ;;  %v999_v4 = vrot.slane %v997_v61, 4  ;;  %v1275_v41 = vsel %vm1223_vm6, %v1270_v33, %v1274_v37  ;;  %v1955_v53 = vrot.slane %v1280_v47, 2  ;;  %v7889_v61 = vld [vmem:[#allocation2 + $0x40] sm:$0xff]  ;;  %v6881_v33 = vld [vmem:[%s9603_s2 + $0x110] sm:$0xff] }
 0x182   : > { %1070 = vst [vmem:[#allocation2 + $0x70] sm:$0xf] %v998_v62  ;;  %v1953_v45 = vsel %vm1921_vm8, %v1948_v12, %v1952_v42  ;;  %v1954_v51 = vrot.slane %v1284_v48, 1  ;;  %v1282_v54 = vrot.slane %v1280_v47, 1  ;;  %v1697_v50 = vsel %vm1682_vm5, %v1694_v7, %v1696_v49  ;;  %2307 = vmatpush.bf16.msra.mxu1 %v6881_v33 }
 0x183   : > { %v1278_v44 = vor.u32 %v1276_v11, %v1274_v37  ;;  %v1288_v62 = vshll.u32 %v7889_v61, 16  ;;  %v1292_v63 = vshrl.u32 %v7889_v61, 16  ;;  %v1698_v0 = vrot.slane %v7889_v61, 1 }
 0x184   : > { %v839_v9 = vpop.f32.mrf.mxu3  ;;  %v1956_v56 = vor.u32 %v1955_v53, %v1954_v51  ;;  %v1286_v1 = vor.u32 %v1284_v48, %v1282_v54  ;;  %v7910_v34 = vld [vmem:[#allocation2 + $0x50] sm:$0xff] }
 0x185   : > { %v876_v55 = vpack.c.bf16 %v839_v9, %v839_v9  ;;  %1606 = vmatmul.bf16.gmra.mxu2 %v7836_v59  ;;  %v1283_v57 = vsel %vm1223_vm6, %v1278_v44, %v1282_v54  ;;  %v1958_v9 = vrot.slane %v1292_v63, 1  ;;  %v1959_v39 = vrot.slane %v1288_v62, 2 }
 0x186   : > { %v1957_v60 = vsel %vm1921_vm8, %v1952_v42, %v1956_v56  ;;  %v1699_v43 = vsel %vm1682_vm5, %v1696_v49, %v1698_v0  ;;  %v1702_v48 = vrot.slane %v7910_v34, 1 }
 0x187   : > { %v1000_v5 = vrot.slane %v876_v55, 7  ;;  %v1290_v55 = vrot.slane %v1288_v62, 1  ;;  %v1960_v3 = vor.u32 %v1959_v39, %v1958_v9  ;;  %v6917_v9 = vld [vmem:[#allocation4 + $0x78] sm:$0xff] }
 0x188   : > { %1808 = vmatmul.bf16.gmra.mxu3 %v1693_v6  ;;  %v7898_v6 = vld [vmem:[#allocation2 + $0x48] sm:$0xff]  ;;  %3060 = vmatpush.bf16.msra.mxu2 %v6917_v9 }
 0x189   : > { %v1001_v10 = vsel %vm7679_vm4, %v999_v4, %v1000_v5  ;;  %v1002_v21 = vrot.slane %v1000_v5, 4  ;;  %v1291_v4 = vsel %vm1223_vm6, %v1286_v1, %v1290_v55  ;;  %v1961_v5 = vsel %vm1921_vm8, %v1956_v56, %v1960_v3  ;;  %v7925_v1 = vld [vmem:[#allocation2 + $0x58] sm:$0xff] }
 0x18a   : > { %1071 = vst [vmem:[#allocation2 + $0x74] sm:$0xf] %v1001_v10  ;;  %1448 = vmatmul.bf16.gmra.mxu1 %v1267_v13  ;;  %v1296_v12 = vshll.u32 %v7898_v6, 16  ;;  %v1300_v13 = vshrl.u32 %v7898_v6, 16  ;;  %v1700_v16 = vrot.slane %v7898_v6, 1  ;;  %v1294_v52 = vor.u32 %v1292_v63, %v1290_v55 }
 0x18c   : > { %v842_v17 = vpop.f32.mrf.mxu3  ;;  %v1703_v58 = vsel %vm1682_vm5, %v1700_v16, %v1702_v48 }
 0x18d   : > { %v877_v19 = vpack.c.bf16 %v842_v17, %v842_v17  ;;  %2091 = vmatmul.bf16.gmra.mxu0 %v1949_v20  ;;  %v1962_v17 = vrot.slane %v1300_v13, 1  ;;  %v1298_v20 = vrot.slane %v1296_v12, 1 }
 0x18f   : > { %v1003_v22 = vrot.slane %v877_v19, 7  ;;  %v1963_v19 = vrot.slane %v1296_v12, 2  ;;  %v1302_v53 = vor.u32 %v1300_v13, %v1298_v20  ;;  %v1312_v12 = vshll.u32 %v7925_v1, 16 }
 0x190   : > { %v1316_v13 = vshrl.u32 %v7925_v1, 16 }
 0x191   : > { %v1004_v27 = vsel %vm7679_vm4, %v1002_v21, %v1003_v22  ;;  %v1005_v15 = vrot.slane %v1003_v22, 4  ;;  %v1964_v11 = vor.u32 %v1963_v19, %v1962_v17  ;;  %v1704_v17 = vrot.slane %v7925_v1, 1 }
 0x192   : > { %1072 = vst [vmem:[#allocation2 + $0x78] sm:$0xf] %v1004_v27  ;;  %v1701_v27 = vsel %vm1682_vm5, %v1698_v0, %v1700_v16 }
 0x194   : > { %v844_v30 = vpop.f32.mrf.mxu3 }
 0x195   : > { %v878_v31 = vpack.c.bf16 %v844_v30, %v844_v30  ;;  %1611 = vmatmul.bf16.gmra.mxu2 %v7852_v23 }
 0x197   : > { %v1006_v14 = vrot.slane %v878_v31, 7  ;;  %v1299_v31 = vsel %vm1223_vm6, %v1294_v52, %v1298_v20  ;;  %v1705_v52 = vsel %vm1682_vm5, %v1702_v48, %v1704_v17 }
 0x198   : > { %1813 = vmatmul.bf16.gmra.mxu3 %v1695_v36 }
 0x199   : > { %v1007_v38 = vsel %vm7679_vm4, %v1005_v15, %v1006_v14  ;;  %v1008_v32 = vrot.slane %v1006_v14, 4  ;;  %v1965_v14 = vsel %vm1921_vm8, %v1960_v3, %v1964_v11 }
 0x19a   : > { %1073 = vst [vmem:[#allocation2 + $0x7c] sm:$0xf] %v1007_v38  ;;  %1453 = vmatmul.bf16.gmra.mxu1 %v1275_v41  ;;  %v1308_v41 = vshrl.u32 %v7910_v34, 16 }
 0x19b   : > { %1074 = vst [vmem:[#allocation2 + $0x80] sm:$0x1] %v1008_v32  ;;  %v1304_v32 = vshll.u32 %v7910_v34, 16 }
 0x19c   : > { %v1966_v49 = vrot.slane %v1308_v41, 1 }
 0x19d   : > { %2096 = vmatmul.bf16.gmra.mxu0 %v1953_v45  ;;  %v1967_v51 = vrot.slane %v1304_v32, 2  ;;  %v1306_v54 = vrot.slane %v1304_v32, 1 }
 0x19f   : > { %v1307_v63 = vsel %vm1223_vm6, %v1302_v53, %v1306_v54  ;;  %v1310_v19 = vor.u32 %v1308_v41, %v1306_v54 }
 0x1a5   : > { %1616 = vmatmul.bf16.gmra.mxu2 %v7877_v46 }
 0x1a8   : > { %1818 = vmatmul.bf16.gmra.mxu3 %v1697_v50 }
 0x1aa   : > { %1458 = vmatmul.bf16.gmra.mxu1 %v1283_v57 }
 0x1ad   : > { %2101 = vmatmul.bf16.gmra.mxu0 %v1957_v60  ;;  %v1968_v60 = vor.u32 %v1967_v51, %v1966_v49 }
 0x1af   : > { %v1969_v55 = vsel %vm1921_vm8, %v1964_v11, %v1968_v60  ;;  %v1314_v11 = vrot.slane %v1312_v12, 1 }
 0x1b5   : > { %1621 = vmatmul.bf16.gmra.mxu2 %v7889_v61 }
 0x1b7   : > { %v1582_v2 = vpop.f32.mrf.mxu2 }
 0x1b8   : > { %1823 = vmatmul.bf16.gmra.mxu3 %v1699_v43 }
 0x1ba   : > { %1463 = vmatmul.bf16.gmra.mxu1 %v1291_v4 }
 0x1bd   : > { %2106 = vmatmul.bf16.gmra.mxu0 %v1961_v5 }
 0x1bf   : > { %v1584_v10 = vpop.f32.mrf.mxu2 }
 0x1c5   : > { %1626 = vmatmul.bf16.gmra.mxu2 %v7898_v6 }
 0x1c6   : > { %v1429_v21 = vpop.f32.mrf.mxu1 }
 0x1c7   : > { %v1583_v22 = vadd.f32 %v1582_v2, %v1429_v21  ;;  %v1587_v24 = vpop.f32.mrf.mxu2  ;;  %v1970_v21 = vrot.slane %v1316_v13, 1 }
 0x1c8   : > { %1828 = vmatmul.bf16.gmra.mxu3 %v1701_v27 }
 0x1c9   : > { %v2072_v30 = vpop.f32.mrf.mxu0 }
 0x1ca   : > { %1468 = vmatmul.bf16.gmra.mxu1 %v1299_v31  ;;  %v1789_v7 = vpop.f32.mrf.mxu3  ;;  %v1315_v31 = vsel %vm1223_vm6, %v1310_v19, %v1314_v11 }
 0x1cb   : > { %v1869_v15 = vadd.f32 %v1789_v7, %v1583_v22  ;;  %v1971_v22 = vrot.slane %v1312_v12, 2  ;;  %v7952_v12 = vld [vmem:[#allocation2 + $0x68] sm:$0xff] }
 0x1cd   : > { %2111 = vmatmul.bf16.gmra.mxu0 %v1965_v14  ;;  %v7912_v35 = vadd.f32 %v2072_v30, %v1869_v15  ;;  %v1972_v15 = vor.u32 %v1971_v22, %v1970_v21  ;;  %v6880_v14 = vld [vmem:[%s9603_s2 + $0x108] sm:$0xff]  ;;  %v1328_v21 = vshll.u32 %v7952_v12, 16  ;;  %v1332_v22 = vshrl.u32 %v7952_v12, 16 }
 0x1ce   : > { %v1431_v36 = vpop.f32.mrf.mxu1  ;;  %2308 = vmatpush.bf16.msra.mxu1 %v6880_v14 }
 0x1cf   : > { %v1585_v37 = vadd.f32 %v1584_v10, %v1431_v36  ;;  %v1589_v38 = vpop.f32.mrf.mxu2 }
 0x1d1   : > { %v2074_v42 = vpop.f32.mrf.mxu0 }
 0x1d2   : > { %v1791_v45 = vpop.f32.mrf.mxu3 }
 0x1d3   : > { %v1870_v47 = vadd.f32 %v1791_v45, %v1585_v37  ;;  %v1973_v37 = vsel %vm1921_vm8, %v1968_v60, %v1972_v15 }
 0x1d5   : > { %1631 = vmatmul.bf16.gmra.mxu2 %v7910_v34  ;;  %v7918_v50 = vadd.f32 %v2074_v42, %v1870_v47 }
 0x1d6   : > { %v1434_v44 = vpop.f32.mrf.mxu1 }
 0x1d7   : > { %v1588_v56 = vadd.f32 %v1587_v24, %v1434_v44  ;;  %v1592_v57 = vpop.f32.mrf.mxu2 }
 0x1d8   : > { %1833 = vmatmul.bf16.gmra.mxu3 %v1703_v58 }
 0x1d9   : > { %v2077_v62 = vpop.f32.mrf.mxu0 }
 0x1da   : > { %1473 = vmatmul.bf16.gmra.mxu1 %v1307_v63  ;;  %v1794_v0 = vpop.f32.mrf.mxu3 }
 0x1db   : > { %v1871_v39 = vadd.f32 %v1794_v0, %v1588_v56 }
 0x1dd   : > { %2116 = vmatmul.bf16.gmra.mxu0 %v1969_v55  ;;  %v7923_v2 = vadd.f32 %v2077_v62, %v1871_v39 }
 0x1de   : > { %v1436_v43 = vpop.f32.mrf.mxu1 }
 0x1df   : > { %v1590_v3 = vadd.f32 %v1589_v38, %v1436_v43  ;;  %v1594_v4 = vpop.f32.mrf.mxu2  ;;  %v7939_v38 = vld [vmem:[#allocation2 + $0x60] sm:$0xff]  ;;  %v6916_v43 = vld [vmem:[#allocation4 + $0x70] sm:$0xff] }
 0x1e0   : > { %v1320_v47 = vshll.u32 %v7939_v38, 16  ;;  %v1324_v48 = vshrl.u32 %v7939_v38, 16  ;;  %v1706_v54 = vrot.slane %v7939_v38, 1  ;;  %3061 = vmatpush.bf16.msra.mxu2 %v6916_v43 }
 0x1e1   : > { %v2079_v5 = vpop.f32.mrf.mxu0 }
 0x1e2   : > { %v1796_v10 = vpop.f32.mrf.mxu3  ;;  %v1974_v44 = vrot.slane %v1324_v48, 1  ;;  %v1975_v56 = vrot.slane %v1320_v47, 2  ;;  %v1322_v58 = vrot.slane %v1320_v47, 1  ;;  %v1707_v63 = vsel %vm1682_vm5, %v1704_v17, %v1706_v54  ;;  %v6879_v47 = vld [vmem:[%s9603_s2 + $0x100] sm:$0xff] }
 0x1e3   : > { %v1872_v16 = vadd.f32 %v1796_v10, %v1590_v3  ;;  %2309 = vmatpush.bf16.msra.mxu1 %v6879_v47 }
 0x1e4   : > { %v1976_v39 = vor.u32 %v1975_v56, %v1974_v44 }
 0x1e5   : > { %1636 = vmatmul.bf16.gmra.mxu2 %v7925_v1  ;;  %v7931_v20 = vadd.f32 %v2079_v5, %v1872_v16 }
 0x1e6   : > { %v1439_v24 = vpop.f32.mrf.mxu1  ;;  %v1977_v10 = vsel %vm1921_vm8, %v1972_v15, %v1976_v39 }
 0x1e7   : > { %v1597_v27 = vpop.f32.mrf.mxu2  ;;  %v1593_v30 = vadd.f32 %v1592_v57, %v1439_v24  ;;  %v1318_v57 = vor.u32 %v1316_v13, %v1314_v11  ;;  %v1978_v11 = vrot.slane %v1332_v22, 1 }
 0x1e8   : > { %1838 = vmatmul.bf16.gmra.mxu3 %v1705_v52 }
 0x1e9   : > { %v2082_v7 = vpop.f32.mrf.mxu0  ;;  %v1323_v55 = vsel %vm1223_vm6, %v1318_v57, %v1322_v58 }
 0x1ea   : > { %1478 = vmatmul.bf16.gmra.mxu1 %v1315_v31  ;;  %v1799_v33 = vpop.f32.mrf.mxu3 }
 0x1eb   : > { %v1873_v36 = vadd.f32 %v1799_v33, %v1593_v30  ;;  %v1979_v30 = vrot.slane %v1328_v21, 2 }
 0x1ed   : > { %2121 = vmatmul.bf16.gmra.mxu0 %v1973_v37  ;;  %v7941_v32 = vadd.f32 %v2082_v7, %v1873_v36  ;;  %v1330_v7 = vrot.slane %v1328_v21, 1  ;;  %v1326_v36 = vor.u32 %v1324_v48, %v1322_v58 }
 0x1ee   : > { %v1441_v41 = vpop.f32.mrf.mxu1 }
 0x1ef   : > { %v1599_v42 = vpop.f32.mrf.mxu2  ;;  %v1595_v45 = vadd.f32 %v1594_v4, %v1441_v41 }
 0x1f1   : > { %v2084_v49 = vpop.f32.mrf.mxu0 }
 0x1f2   : > { %v1801_v51 = vpop.f32.mrf.mxu3 }
 0x1f3   : > { %v1874_v53 = vadd.f32 %v1801_v51, %v1595_v45  ;;  %v1331_v45 = vsel %vm1223_vm6, %v1326_v36, %v1330_v7  ;;  %v7970_v51 = vld [vmem:[#allocation2 + $0x70] sm:$0xff] }
 0x1f4   : > { %v1336_v44 = vshll.u32 %v7970_v51, 16  ;;  %v1340_v56 = vshrl.u32 %v7970_v51, 16  ;;  %v1710_v57 = vrot.slane %v7970_v51, 1 }
 0x1f5   : > { %1641 = vmatmul.bf16.gmra.mxu2 %v7939_v38  ;;  %v7947_v60 = vadd.f32 %v2084_v49, %v1874_v53 }
 0x1f6   : > { %v1982_v58 = vrot.slane %v1340_v56, 1 }
 0x1f7   : > { %v1444_v62 = vpop.f32.mrf.mxu1 }
 0x1f8   : > { %v1598_v0 = vadd.f32 %v1597_v27, %v1444_v62  ;;  %v1602_v9 = vpop.f32.mrf.mxu2  ;;  %1843 = vmatmul.bf16.gmra.mxu3 %v1707_v63  ;;  %v1708_v27 = vrot.slane %v7952_v12, 1  ;;  %v1983_v62 = vrot.slane %v1336_v44, 2  ;;  %v1338_v63 = vrot.slane %v1336_v44, 1 }
 0x1fa   : > { %1483 = vmatmul.bf16.gmra.mxu1 %v1323_v55  ;;  %v2087_v3 = vpop.f32.mrf.mxu0  ;;  %v1709_v14 = vsel %vm1682_vm5, %v1706_v54, %v1708_v27  ;;  %v1342_v36 = vor.u32 %v1340_v56, %v1338_v63 }
 0x1fb   : > { %v1804_v4 = vpop.f32.mrf.mxu3 }
 0x1fc   : > { %v1875_v5 = vadd.f32 %v1804_v4, %v1598_v0 }
 0x1fd   : > { %2126 = vmatmul.bf16.gmra.mxu0 %v1977_v10 }
 0x1fe   : > { %v7954_v13 = vadd.f32 %v2087_v3, %v1875_v5  ;;  %v1984_v3 = vor.u32 %v1983_v62, %v1982_v58  ;;  %v6915_v5 = vld [vmem:[#allocation4 + $0x68] sm:$0xff] }
 0x1ff   : > { %v1446_v16 = vpop.f32.mrf.mxu1  ;;  %3062 = vmatpush.bf16.msra.mxu2 %v6915_v5 }
 0x200   : > { %v1600_v17 = vadd.f32 %v1599_v42, %v1446_v16  ;;  %v1604_v19 = vpop.f32.mrf.mxu2  ;;  %v1980_v42 = vor.u32 %v1979_v30, %v1978_v11  ;;  %v7983_v16 = vld [vmem:[#allocation2 + $0x78] sm:$0xff] }
 0x202   : > { %v2089_v31 = vpop.f32.mrf.mxu0  ;;  %v1981_v49 = vsel %vm1921_vm8, %v1976_v39, %v1980_v42  ;;  %v1334_v39 = vor.u32 %v1332_v22, %v1330_v7  ;;  %v1985_v10 = vsel %vm1921_vm8, %v1980_v42, %v1984_v3  ;;  %v1344_v22 = vshll.u32 %v7983_v16, 16  ;;  %v1123_v7 = vld [vmem:[#allocation2 + $0x80] sm:$0x1] }
 0x203   : > { %v1806_v24 = vpop.f32.mrf.mxu3 }
 0x204   : > { %v1876_v52 = vadd.f32 %v1806_v24, %v1600_v17  ;;  %v1339_v4 = vsel %vm1223_vm6, %v1334_v39, %v1338_v63  ;;  %v1348_v24 = vshrl.u32 %v7983_v16, 16  ;;  %v1987_v11 = vrot.slane %v1344_v22, 2 }
 0x205   : > { %1646 = vmatmul.bf16.gmra.mxu2 %v7952_v12  ;;  %v1346_v30 = vrot.slane %v1344_v22, 1 }
 0x206   : > { %v7960_v33 = vadd.f32 %v2089_v31, %v1876_v52  ;;  %v1986_v52 = vrot.slane %v1348_v24, 1  ;;  %v1901_v31 = vld [vmem:[#allocation2 + $0x80] sm:$0x3] }
 0x207   : > { %v1449_v15 = vpop.f32.mrf.mxu1  ;;  %v1919_v47 = vunpack.c.l.b16 %v1901_v31  ;;  %v6914_v31 = vld [vmem:[#allocation4 + $0x60] sm:$0xff] }
 0x208   : > { %v7963_v37 = vadd.f32 %v1602_v9, %v1449_v15  ;;  %v1607_v41 = vpop.f32.mrf.mxu2  ;;  %1848 = vmatmul.bf16.gmra.mxu3 %v1709_v14  ;;  %v1711_v9 = vsel %vm1682_vm5, %v1708_v27, %v1710_v57  ;;  %v1712_v27 = vrot.slane %v7983_v16, 1  ;;  %3063 = vmatpush.bf16.msra.mxu2 %v6914_v31 }
 0x209   : > { %v7996_v44 = vpack.c.b16 %v1919_v47, %v1919_v47 }
 0x20a   : > { %1488 = vmatmul.bf16.gmra.mxu1 %v1331_v45  ;;  %v1713_v14 = vsel %vm1682_vm5, %v1710_v57, %v1712_v27  ;;  %v1988_v45 = vor.u32 %v1987_v11, %v1986_v52  ;;  %v8033_v31 = vpop.f32.mrf.mxu0 }
 0x20b   : > { %v1991_v57 = vshrl.u32 %v7996_v44, 16  ;;  %v1994_v63 = vshll.u32 %v7996_v44, 16 }
 0x20d   : > { %2131 = vmatmul.bf16.gmra.mxu0 %v1981_v49  ;;  %v1347_v49 = vsel %vm1223_vm6, %v1342_v36, %v1346_v30 }
 0x20f   : > { %v1451_v53 = vpop.f32.mrf.mxu1 }
 0x210   : > { %v7972_v48 = vadd.f32 %v1604_v19, %v1451_v53  ;;  %v1609_v54 = vpop.f32.mrf.mxu2  ;;  %v1205_v53 = vunpack.c.l.b16 %v1123_v7 }
 0x212   : > { %v1222_v58 = vpack.c.b16 %v1205_v53, %v1205_v53 }
 0x214   : > { %v1714_v39 = vrot.slane %v1222_v58, 1 }
 0x215   : > { %1651 = vmatmul.bf16.gmra.mxu2 %v7970_v51 }
 0x217   : > { %v1454_v0 = vpop.f32.mrf.mxu1 }
 0x218   : > { %v7979_v55 = vadd.f32 %v1607_v41, %v1454_v0  ;;  %v1612_v43 = vpop.f32.mrf.mxu2  ;;  %1853 = vmatmul.bf16.gmra.mxu3 %v1711_v9  ;;  %v1352_v9 = vshll.u32 %v1222_v58, 16  ;;  %v6913_v58 = vld [vmem:[#allocation4 + $0x58] sm:$0xff] }
 0x219   : > { %3064 = vmatpush.bf16.msra.mxu2 %v6913_v58 }
 0x21a   : > { %1493 = vmatmul.bf16.gmra.mxu1 %v1339_v4  ;;  %v1996_v4 = vrot.slane %v1994_v63, 2  ;;  %v1354_v5 = vrot.slane %v1352_v9, 1 }
 0x21d   : > { %2136 = vmatmul.bf16.gmra.mxu0 %v1985_v10 }
 0x21f   : > { %v1456_v17 = vpop.f32.mrf.mxu1 }
 0x220   : > { %v7985_v19 = vadd.f32 %v1609_v54, %v1456_v17  ;;  %v1614_v21 = vpop.f32.mrf.mxu2  ;;  %v1989_v54 = vsel %vm1921_vm8, %v1984_v3, %v1988_v45  ;;  %v1715_v3 = vsel %vm1682_vm5, %v1712_v27, %v1714_v39  ;;  %v1350_v17 = vor.u32 %v1348_v24, %v1346_v30 }
 0x222   : > { %v1355_v11 = vsel %vm1223_vm6, %v1350_v17, %v1354_v5  ;;  %v6912_v17 = vld [vmem:[#allocation4 + $0x50] sm:$0xff] }
 0x223   : > { %3065 = vmatpush.bf16.msra.mxu2 %v6912_v17 }
 0x225   : > { %1656 = vmatmul.bf16.gmra.mxu2 %v7983_v16 }
 0x227   : > { %v1459_v15 = vpop.f32.mrf.mxu1 }
 0x228   : > { %v7992_v41 = vadd.f32 %v1612_v43, %v1459_v15  ;;  %v1617_v42 = vpop.f32.mrf.mxu2  ;;  %1858 = vmatmul.bf16.gmra.mxu3 %v1713_v14  ;;  %v1993_v43 = vrot.slane %v1991_v57, 1 }
 0x22a   : > { %1498 = vmatmul.bf16.gmra.mxu1 %v1347_v49 }
 0x22d   : > { %2141 = vmatmul.bf16.gmra.mxu0 %v1989_v54 }
 0x22f   : > { %v1461_v62 = vpop.f32.mrf.mxu1 }
 0x230   : > { %v7998_v0 = vadd.f32 %v1614_v21, %v1461_v62  ;;  %v1619_v56 = vpop.f32.mrf.mxu2  ;;  %v1997_v21 = vor.u32 %v1996_v4, %v1993_v43 }
 0x232   : > { %v1998_v7 = vsel %vm1921_vm8, %v1988_v45, %v1997_v21 }
 0x237   : > { %v1464_v10 = vpop.f32.mrf.mxu1 }
 0x238   : > { %v8003_v22 = vadd.f32 %v1617_v42, %v1464_v10  ;;  %v1622_v52 = vpop.f32.mrf.mxu2  ;;  %1863 = vmatmul.bf16.gmra.mxu3 %v1715_v3  ;;  %v8024_v10 = vpop.f32.mrf.mxu3 }
 0x23a   : > { %1503 = vmatmul.bf16.gmra.mxu1 %v1355_v11 }
 0x23d   : > { %2146 = vmatmul.bf16.gmra.mxu0 %v1998_v7 }
 0x23f   : > { %v1466_v15 = vpop.f32.mrf.mxu1 }
 0x240   : > { %v8007_v14 = vadd.f32 %v1619_v56, %v1466_v15  ;;  %v1624_v36 = vpop.f32.mrf.mxu2  ;;  %v8031_v11 = vpop.f32.mrf.mxu3 }
 0x247   : > { %v1469_v47 = vpop.f32.mrf.mxu1 }
 0x248   : > { %v8009_v27 = vadd.f32 %v1622_v52, %v1469_v47  ;;  %v1627_v24 = vpop.f32.mrf.mxu2 }
 0x24a   : > { %2310 = vmatmul.bf16.vlgmr.msra.gmra.mxu1 %v7712_v29 }
 0x24f   : > { %v1471_v30 = vpop.f32.mrf.mxu1 }
 0x250   : > { %v8012_v42 = vadd.f32 %v1624_v36, %v1471_v30  ;;  %v1629_v49 = vpop.f32.mrf.mxu2  ;;  %v8038_v36 = vpop.f32.mrf.mxu3 }
 0x257   : > { %v1474_v53 = vpop.f32.mrf.mxu1 }
 0x258   : > { %v8014_v54 = vadd.f32 %v1627_v24, %v1474_v53  ;;  %v1632_v45 = vpop.f32.mrf.mxu2  ;;  %v8044_v53 = vpop.f32.mrf.mxu3 }
 0x25a   : > { %9620 = vst [vmem:[#allocation14_spill] sm:$0xff] %v8014_v54  ;;  %2315 = vmatmul.bf16.gmra.mxu1 %v7753_v18 }
 0x25f   : > { %v1476_v62 = vpop.f32.mrf.mxu1 }
 0x260   : > { %v8017_v56 = vadd.f32 %v1629_v49, %v1476_v62  ;;  %v1634_v57 = vpop.f32.mrf.mxu2  ;;  %v6909_v49 = vld [vmem:[#allocation4 + $0x38] sm:$0xff]  ;;  %v2216_v62 = vrot.slane %v7852_v23, 2  ;;  %v2218_v23 = vrot.slane %v7877_v46, 2 }
 0x261   : > { %3213 = vmatpush.bf16.msra.mxu3 %v6909_v49 }
 0x262   : > { %9621 = vst [vmem:[#allocation15_spill] sm:$0xff] %v8017_v56  ;;  %v2219_v59 = vsel %vm2204_vm7, %v2216_v62, %v2218_v23 }
 0x267   : > { %v1479_v63 = vpop.f32.mrf.mxu1 }
 0x268   : > { %v8019_v9 = vadd.f32 %v1632_v45, %v1479_v63  ;;  %v1637_v29 = vpop.f32.mrf.mxu2 }
 0x26a   : > { %9622 = vst [vmem:[#allocation16_spill] sm:$0xff] %v8019_v9  ;;  %2320 = vmatmul.bf16.gmra.mxu1 %v7804_v8 }
 0x26f   : > { %v1481_v39 = vpop.f32.mrf.mxu1 }
 0x270   : > { %v8022_v43 = vadd.f32 %v1634_v57, %v1481_v39  ;;  %v1639_v4 = vpop.f32.mrf.mxu2 }
 0x272   : > { %9623 = vst [vmem:[#allocation17_spill] sm:$0xff] %v8022_v43 }
 0x277   : > { %v1484_v5 = vpop.f32.mrf.mxu1 }
 0x278   : > { %v8026_v18 = vadd.f32 %v1637_v29, %v1484_v5  ;;  %v1642_v3 = vpop.f32.mrf.mxu2  ;;  %v6911_v29 = vld [vmem:[#allocation4 + $0x48] sm:$0xff] }
 0x279   : > { %3066 = vmatpush.bf16.msra.mxu2 %v6911_v29  ;;  %v2220_v29 = vrot.slane %v7889_v61, 2 }
 0x27a   : > { %9624 = vst [vmem:[#allocation18_spill] sm:$0xff] %v8026_v18  ;;  %2325 = vmatmul.bf16.gmra.mxu1 %v7861_v40  ;;  %v8040_v40 = vpop.f32.mrf.mxu0 }
 0x27f   : > { %v1486_v52 = vpop.f32.mrf.mxu1 }
 0x280   : > { %v8029_v21 = vadd.f32 %v1639_v4, %v1486_v52  ;;  %v1644_v8 = vpop.f32.mrf.mxu2  ;;  %v8054_v4 = vpop.f32.mrf.mxu3 }
 0x282   : > { %9625 = vst [vmem:[#allocation19_spill] sm:$0xff] %v8029_v21  ;;  %v8052_v63 = vpop.f32.mrf.mxu0 }
 0x287   : > { %v1489_v7 = vpop.f32.mrf.mxu1 }
 0x288   : > { %v8035_v15 = vadd.f32 %v1642_v3, %v1489_v7  ;;  %v1647_v47 = vpop.f32.mrf.mxu2 }
 0x28a   : > { %9626 = vst [vmem:[#allocation20_spill] sm:$0xff] %v8035_v15  ;;  %2330 = vmatmul.bf16.gmra.mxu1 %v7866_v28  ;;  %v2217_v28 = vsel %vm2204_vm7, %v2214_v25, %v2216_v62  ;;  %v8058_v17 = vpop.f32.mrf.mxu0  ;;  %v8064_v25 = vpop.f32.mrf.mxu3 }
 0x28f   : > { %v1491_v24 = vpop.f32.mrf.mxu1 }
 0x290   : > { %v8042_v30 = vadd.f32 %v1644_v8, %v1491_v24  ;;  %v1649_v45 = vpop.f32.mrf.mxu2 }
 0x292   : > { %9627 = vst [vmem:[#allocation21_spill] sm:$0xff] %v8042_v30 }
 0x297   : > { %v1494_v58 = vpop.f32.mrf.mxu1 }
 0x298   : > { %v8047_v57 = vadd.f32 %v1647_v47, %v1494_v58  ;;  %v1652_v3 = vpop.f32.mrf.mxu2  ;;  %v8066_v47 = vpop.f32.mrf.mxu0 }
 0x299   : > { %v8070_v58 = vpop.f32.mrf.mxu3 }
 0x29a   : > { %9628 = vst [vmem:[#allocation22_spill] sm:$0xff] %v8047_v57  ;;  %2335 = vmatmul.bf16.gmra.mxu1 %v2217_v28  ;;  %v6907_v28 = vld [vmem:[#allocation4 + $0x28] sm:$0xff]  ;;  %v6925_v57 = vld [vmem:[#allocation4 + $0xb8] sm:$0xff] }
 0x29b   : > { %3419 = vmatpush.bf16.msra.mxu0 %v6925_v57  ;;  %v6902_v57 = vld [vmem:[#allocation4] sm:$0xff] }
 0x29f   : > { %v1496_v39 = vpop.f32.mrf.mxu1 }
 0x2a0   : > { %v8056_v5 = vadd.f32 %v1649_v45, %v1496_v39  ;;  %v1654_v7 = vpop.f32.mrf.mxu2  ;;  %v6908_v45 = vld [vmem:[#allocation4 + $0x30] sm:$0xff] }
 0x2a1   : > { %3214 = vmatpush.bf16.msra.mxu3 %v6908_v45 }
 0x2a2   : > { %9629 = vst [vmem:[#allocation23_spill] sm:$0xff] %v8056_v5  ;;  %v6904_v5 = vld [vmem:[#allocation4 + $0x10] sm:$0xff] }
 0x2a5   : > { %3215 = vmatpush.bf16.msra.mxu3 %v6907_v28  ;;  %v2222_v28 = vrot.slane %v7898_v6, 2 }
 0x2a7   : > { %v1499_v52 = vpop.f32.mrf.mxu1 }
 0x2a8   : > { %v8061_v8 = vadd.f32 %v1652_v3, %v1499_v52  ;;  %v1657_v46 = vpop.f32.mrf.mxu2  ;;  %v8073_v3 = vpop.f32.mrf.mxu0  ;;  %v2221_v52 = vsel %vm2204_vm7, %v2218_v23, %v2220_v29  ;;  %v6903_v23 = vld [vmem:[#allocation4 + $0x8] sm:$0xff] }
 0x2aa   : > { %9630 = vst [vmem:[#allocation24_spill] sm:$0xff] %v8061_v8  ;;  %2340 = vmatmul.bf16.gmra.mxu1 %v2219_v59  ;;  %v6906_v59 = vld [vmem:[#allocation4 + $0x20] sm:$0xff] }
 0x2ab   : > { %3216 = vmatpush.bf16.msra.mxu3 %v6906_v59 }
 0x2af   : > { %v1501_v24 = vpop.f32.mrf.mxu1 }
 0x2b0   : > { %v8068_v49 = vadd.f32 %v1654_v7, %v1501_v24  ;;  %v6905_v7 = vld [vmem:[#allocation4 + $0x18] sm:$0xff]  ;;  %v8078_v24 = vpop.f32.mrf.mxu3  ;;  %v8082_v61 = vpop.f32.mrf.mxu0 }
 0x2b1   : > { %3217 = vmatpush.bf16.msra.mxu3 %v6905_v7 }
 0x2b2   : > { %9631 = vst [vmem:[#allocation25_spill] sm:$0xff] %v8068_v49  ;;  %v1659_v49 = vpop.f32.mrf.mxu2 }
 0x2b5   : > { %3218 = vmatpush.bf16.msra.mxu3 %v6904_v5  ;;  %v6923_v5 = vld [vmem:[#allocation4 + $0xa8] sm:$0xff] }
 0x2b7   : > { %v1504_v39 = vpop.f32.mrf.mxu1 }
 0x2b8   : > { %v8075_v62 = vadd.f32 %v1657_v46, %v1504_v39  ;;  %v6910_v46 = vld [vmem:[#allocation4 + $0x40] sm:$0xff]  ;;  %v6924_v39 = vld [vmem:[#allocation4 + $0xb0] sm:$0xff]  ;;  %v8090_v59 = vpop.f32.mrf.mxu3 }
 0x2b9   : > { %3067 = vmatpush.bf16.msra.mxu2 %v6910_v46  ;;  %3219 = vmatpush.bf16.msra.mxu3 %v6903_v23  ;;  %v6922_v46 = vld [vmem:[#allocation4 + $0xa0] sm:$0xff] }
 0x2ba   : > { %9632 = vst [vmem:[#allocation26_spill] sm:$0xff] %v8075_v62  ;;  %2345 = vmatmul.bf16.gmra.mxu1 %v2221_v52  ;;  %v8088_v52 = vld [vmem:[%s9604_s3] ss:$0 sm:$0xff]  ;;  %3420 = vmatpush.bf16.msra.mxu0 %v6924_v39 }
 0x2bb   : > { %v6921_v39 = vld [vmem:[#allocation4 + $0x98] sm:$0xff] }
 0x2bd   : > { %3220 = vmatpush.bf16.msra.mxu3 %v6902_v57 }
 0x2be   : > { %3421 = vmatpush.bf16.msra.mxu0 %v6923_v5 }
 0x2bf   : > { %v1506_v45 = vpop.f32.mrf.mxu1 }
 0x2c0   : > { %v8080_v8 = vadd.f32 %v1659_v49, %v1506_v45  ;;  %v2223_v45 = vsel %vm2204_vm7, %v2220_v29, %v2222_v28  ;;  %v8098_v29 = vpop.f32.mrf.mxu3 }
 0x2c2   : > { %9633 = vst [vmem:[#allocation27_spill] sm:$0xff] %v8080_v8  ;;  %v8095_v8 = vpop.f32.mrf.mxu0  ;;  %3422 = vmatpush.bf16.msra.mxu0 %v6922_v46 }
 0x2c6   : > { %3423 = vmatpush.bf16.msra.mxu0 %v6921_v39 }
 0x2c7   : > { %v2311_v49 = vpop.f32.mrf.mxu1 }
 0x2c8   : > { %v2391_v7 = vadd.f32 %v2311_v49, %v7912_v35 }
 0x2ca   : > { %v2427_v6 = vadd.f32 %v8088_v52, %v2391_v7  ;;  %2350 = vmatmul.bf16.gmra.mxu1 %v2223_v45  ;;  %v2224_v7 = vrot.slane %v7910_v34, 2  ;;  %v6920_v45 = vld [vmem:[#allocation4 + $0x90] sm:$0xff]  ;;  %v6919_v34 = vld [vmem:[#allocation4 + $0x88] sm:$0xff] }
 0x2cb   : > { %3424 = vmatpush.bf16.msra.mxu0 %v6920_v45 }
 0x2cc   : > { %v2459_v62 = vmax.f32 %v2427_v6, 0.0  ;;  %v8102_v6 = vpop.f32.mrf.mxu0 }
 0x2ce   : > { %v2491_v30 = vpack.c.bf16 %v2459_v62, %v2459_v62 }
 0x2cf   : > { %v2313_v15 = vpop.f32.mrf.mxu1  ;;  %3425 = vmatpush.bf16.msra.mxu0 %v6919_v34 }
 0x2d0   : > { %v2555_v21 = vrot.slane %v2491_v30, 7  ;;  %v2392_v35 = vadd.f32 %v2313_v15, %v7918_v50  ;;  %v2225_v15 = vsel %vm2204_vm7, %v2222_v28, %v2224_v7 }
 0x2d2   : > { %2683 = vst [vmem:[#allocation3] sm:$0xe] %v2555_v21  ;;  %v2428_v23 = vadd.f32 %v8088_v52, %v2392_v35  ;;  %v2556_v5 = vrot.slane %v2555_v21, 4 }
 0x2d4   : > { %v2460_v49 = vmax.f32 %v2428_v23, 0.0  ;;  %v8109_v23 = vpop.f32.mrf.mxu3  ;;  %v8111_v18 = vpop.f32.mrf.mxu0 }
 0x2d5   : > { %9634 = vst [vmem:[#allocation28_spill] sm:$0xff] %v8109_v23 }
 0x2d6   : > { %v2492_v57 = vpack.c.bf16 %v2460_v49, %v2460_v49  ;;  %v6918_v49 = vld [vmem:[#allocation4 + $0x80] sm:$0xff]  ;;  %9635 = vst [vmem:[#allocation29_spill] sm:$0xff] %v8111_v18 }
 0x2d7   : > { %v2316_v62 = vpop.f32.mrf.mxu1  ;;  %3426 = vmatpush.bf16.msra.mxu0 %v6918_v49 }
 0x2d8   : > { %v2557_v30 = vrot.slane %v2492_v57, 7  ;;  %v2393_v50 = vadd.f32 %v2316_v62, %v7923_v2 }
 0x2da   : > { %v2558_v46 = vsel %vm7679_vm4, %v2556_v5, %v2557_v30  ;;  %v2429_v35 = vadd.f32 %v8088_v52, %v2393_v50  ;;  %2355 = vmatmul.bf16.gmra.mxu1 %v2225_v15  ;;  %v2559_v2 = vrot.slane %v2557_v30, 4  ;;  %v6941_v15 = vld [vmem:[#allocation4 + $0x138] sm:$0xff] }
 0x2db   : > { %2684 = vst [vmem:[#allocation3 + $0x4] sm:$0xf] %v2558_v46  ;;  %v6933_v46 = vld [vmem:[#allocation4 + $0xf8] sm:$0xff]  ;;  %3939 = vmatpush.bf16.msrb.mxu2 %v6941_v15 }
 0x2dc   : > { %v2461_v39 = vmax.f32 %v2429_v35, 0.0  ;;  %3701 = vmatpush.bf16.msrb.mxu1 %v6933_v46  ;;  %v8120_v30 = vpop.f32.mrf.mxu3  ;;  %v8126_v43 = vpop.f32.mrf.mxu0 }
 0x2dd   : > { %9637 = vst [vmem:[#allocation31_spill] sm:$0xff] %v8120_v30 }
 0x2de   : > { %v2493_v21 = vpack.c.bf16 %v2461_v39, %v2461_v39  ;;  %v2226_v39 = vrot.slane %v7925_v1, 2  ;;  %9638 = vst [vmem:[#allocation32_spill] sm:$0xff] %v8126_v43 }
 0x2df   : > { %v2318_v57 = vpop.f32.mrf.mxu1 }
 0x2e0   : > { %v2560_v28 = vrot.slane %v2493_v21, 7  ;;  %v2394_v45 = vadd.f32 %v2318_v57, %v7931_v20 }
 0x2e2   : > { %v2561_v62 = vsel %vm7679_vm4, %v2559_v2, %v2560_v28  ;;  %v2430_v5 = vadd.f32 %v8088_v52, %v2394_v45  ;;  %v8117_v50 = vld [vmem:[#allocation3] sm:$0xff]   ;;  %v2562_v49 = vrot.slane %v2560_v28, 4  ;;  %v2227_v45 = vsel %vm2204_vm7, %v2224_v7, %v2226_v39 }
 0x2e3   : > { %9636 = vst [vmem:[#allocation30_spill] sm:$0xff] %v8117_v50  ;;  %3221 = vmatmul.bf16.vlgmr.msra.gmra.mxu3 %v8117_v50  ;;  %v3302_v2 = vld [vmem:[#allocation3] sm:$0xe] }
 0x2e4   : > { %2685 = vst [vmem:[#allocation3 + $0x8] sm:$0xf] %v2561_v62  ;;  %v2462_v35 = vmax.f32 %v2430_v5, 0.0  ;;  %v9612_v62 = vunpack.c.h.b16 %v8117_v50  ;;  %v3320_v46 = vunpack.c.l.b16 %v3302_v2 }
 0x2e6   : > { %v2494_v34 = vpack.c.bf16 %v2462_v35, %v2462_v35  ;;  %v3321_v28 = vpack.c.b16 %v9612_v62, %v3320_v46  ;;  %v2865_v46 = vshrl.u32 %v8117_v50, 16 }
 0x2e7   : > { %v2321_v20 = vpop.f32.mrf.mxu1 }
 0x2e8   : > { %v2563_v21 = vrot.slane %v2494_v34, 7  ;;  %v2395_v57 = vadd.f32 %v2321_v20, %v7941_v32  ;;  %v2867_v32 = vshll.u32 %v8117_v50, 16  ;;  %v8134_v34 = vpop.f32.mrf.mxu3  ;;  %v3561_v56 = vshrl.u32 %v3321_v28, 16 }
 0x2e9   : > { %9639 = vst [vmem:[#allocation33_spill] sm:$0xff] %v8134_v34 }
 0x2ea   : > { %v2564_v5 = vsel %vm7679_vm4, %v2562_v49, %v2563_v21  ;;  %v2431_v15 = vadd.f32 %v8088_v52, %v2395_v57  ;;  %2360 = vmatmul.bf16.gmra.mxu1 %v2227_v45  ;;  %v2565_v20 = vrot.slane %v2563_v21, 4  ;;  %v2869_v49 = vrot.slane %v2867_v32, 1 }
 0x2eb   : > { %2686 = vst [vmem:[#allocation3 + $0xc] sm:$0xf] %v2564_v5  ;;  %v3564_v57 = vshll.u32 %v3321_v28, 16 }
 0x2ec   : > { %v2463_v1 = vmax.f32 %v2431_v15, 0.0  ;;  %v3322_v15 = vrot.slane %v3321_v28, 1 }
 0x2ed   : > { %v3566_v62 = vrot.slane %v3564_v57, 2 }
 0x2ee   : > { %v2495_v35 = vpack.c.bf16 %v2463_v1, %v2463_v1  ;;  %v8143_v1 = vpop.f32.mrf.mxu0 }
 0x2ef   : > { %v2323_v7 = vpop.f32.mrf.mxu1  ;;  %9640 = vst [vmem:[#allocation34_spill] sm:$0xff] %v8143_v1 }
 0x2f0   : > { %v2566_v9 = vrot.slane %v2495_v35, 7  ;;  %v2396_v30 = vadd.f32 %v2323_v7, %v7947_v60  ;;  %v2228_v7 = vrot.slane %v7939_v38, 2 }
 0x2f2   : > { %v2567_v2 = vsel %vm7679_vm4, %v2565_v20, %v2566_v9  ;;  %v2432_v45 = vadd.f32 %v8088_v52, %v2396_v30  ;;  %v8140_v5 = vld [vmem:[#allocation3 + $0x8] sm:$0xff]  ;;  %v2870_v30 = vor.u32 %v2869_v49, %v2865_v46  ;;  %v3563_v20 = vrot.slane %v3561_v56, 1 }
 0x2f3   : > { %2687 = vst [vmem:[#allocation3 + $0x10] sm:$0xf] %v2567_v2  ;;  %3226 = vmatmul.bf16.gmra.mxu3 %v8140_v5  ;;  %v3323_v60 = vrot.slane %v8140_v5, 1  ;;  %v2872_v32 = vshll.u32 %v8140_v5, 16  ;;  %v2876_v35 = vshrl.u32 %v8140_v5, 16  ;;  %v2568_v43 = vrot.slane %v2566_v9, 4  ;;  %v8156_v5 = vpop.f32.mrf.mxu3 }
 0x2f4   : > { %v2464_v21 = vmax.f32 %v2432_v45, 0.0  ;;  %v2229_v49 = vsel %vm2204_vm7, %v2226_v39, %v2228_v7  ;;  %v3567_v56 = vor.u32 %v3566_v62, %v3563_v20  ;;  %v6940_v20 = vld [vmem:[#allocation4 + $0x130] sm:$0xff] }
 0x2f5   : > { %v3324_v28 = vsel %vm1682_vm5, %v3322_v15, %v3323_v60  ;;  %v2874_v50 = vrot.slane %v2872_v32, 1  ;;  %v3568_v34 = vrot.slane %v2876_v35, 1  ;;  %v3569_v45 = vrot.slane %v2872_v32, 2  ;;  %3940 = vmatpush.bf16.msrb.mxu2 %v6940_v20 }
 0x2f6   : > { %v2496_v2 = vpack.c.bf16 %v2464_v21, %v2464_v21  ;;  %3427 = vmatmul.bf16.vlgmr.msra.gmra.mxu0 %v3324_v28  ;;  %v1877_v32 = vadd.f32 %v8024_v10, %v7963_v37  ;;  %v2230_v37 = vrot.slane %v7952_v12, 2 }
 0x2f7   : > { %v2326_v1 = vpop.f32.mrf.mxu1  ;;  %v2875_v18 = vsel %vm1223_vm6, %v2870_v30, %v2874_v50  ;;  %v3570_v57 = vor.u32 %v3569_v45, %v3568_v34  ;;  %v2878_v10 = vor.u32 %v2876_v35, %v2874_v50 }
 0x2f8   : > { %v2569_v23 = vrot.slane %v2496_v2, 7  ;;  %v2397_v54 = vadd.f32 %v2326_v1, %v7954_v13  ;;  %3068 = vmatmul.bf16.vlgmr.msra.gmra.mxu2 %v2875_v18  ;;  %v8164_v1 = vpop.f32.mrf.mxu0  ;;  %v6932_v2 = vld [vmem:[#allocation4 + $0xf0] sm:$0xff]  ;;  %v2231_v12 = vsel %vm2204_vm7, %v2228_v7, %v2230_v37 }
 0x2f9   : > { %v8162_v13 = vsel %vm1921_vm8, %v3567_v56, %v3570_v57  ;;  %3702 = vmatpush.bf16.msrb.mxu1 %v6932_v2 }
 0x2fa   : > { %v2570_v15 = vsel %vm7679_vm4, %v2568_v43, %v2569_v23  ;;  %v2433_v46 = vadd.f32 %v8088_v52, %v2397_v54  ;;  %2365 = vmatmul.bf16.gmra.mxu1 %v2229_v49  ;;  %v2571_v18 = vrot.slane %v2569_v23, 4 }
 0x2fb   : > { %2688 = vst [vmem:[#allocation3 + $0x14] sm:$0xf] %v2570_v15  ;;  %v8172_v28 = vpop.f32.mrf.mxu3 }
 0x2fc   : > { %v2465_v9 = vmax.f32 %v2433_v46, 0.0 }
 0x2fe   : > { %v2497_v21 = vpack.c.bf16 %v2465_v9, %v2465_v9 }
 0x2ff   : > { %v2328_v39 = vpop.f32.mrf.mxu1 }
 0x300   : > { %v2572_v62 = vrot.slane %v2497_v21, 7  ;;  %v2398_v34 = vadd.f32 %v2328_v39, %v7960_v33  ;;  %v2160_v33 = vadd.f32 %v8033_v31, %v1877_v32 }
 0x302   : > { %v2573_v54 = vsel %vm7679_vm4, %v2571_v18, %v2572_v62  ;;  %v2434_v43 = vadd.f32 %v8088_v52, %v2398_v34  ;;  %v6888_v30 = vld [vmem:[#allocation3 + $0x10] sm:$0xff]  ;;  %v8177_v34 = vpop.f32.mrf.mxu0 }
 0x303   : > { %2689 = vst [vmem:[#allocation3 + $0x18] sm:$0xf] %v2573_v54  ;;  %3231 = vmatmul.bf16.gmra.mxu3 %v6888_v30  ;;  %v3325_v23 = vrot.slane %v6888_v30, 1  ;;  %v2880_v49 = vshll.u32 %v6888_v30, 16  ;;  %v2884_v56 = vshrl.u32 %v6888_v30, 16  ;;  %v2574_v54 = vrot.slane %v2572_v62, 4  ;;  %v8191_v2 = vpop.f32.mrf.mxu3 }
 0x304   : > { %v2466_v45 = vmax.f32 %v2434_v43, 0.0 }
 0x305   : > { %v3326_v46 = vsel %vm1682_vm5, %v3323_v60, %v3325_v23  ;;  %v2882_v9 = vrot.slane %v2880_v49, 1  ;;  %v3572_v21 = vrot.slane %v2884_v56, 1  ;;  %v3573_v18 = vrot.slane %v2880_v49, 2 }
 0x306   : > { %v2498_v15 = vpack.c.bf16 %v2466_v45, %v2466_v45  ;;  %3432 = vmatmul.bf16.gmra.mxu0 %v3326_v46  ;;  %v1878_v60 = vadd.f32 %v8031_v11, %v7972_v48  ;;  %v1879_v11 = vadd.f32 %v8038_v36, %v7979_v55  ;;  %v2232_v36 = vrot.slane %v7970_v51, 2 }
 0x307   : > { %v2331_v39 = vpop.f32.mrf.mxu1  ;;  %v2883_v31 = vsel %vm1223_vm6, %v2878_v10, %v2882_v9  ;;  %v3574_v50 = vor.u32 %v3573_v18, %v3572_v21 }
 0x308   : > { %v2575_v43 = vrot.slane %v2498_v15, 7  ;;  %v2399_v30 = vadd.f32 %v2331_v39, %v2160_v33  ;;  %3073 = vmatmul.bf16.gmra.mxu2 %v2883_v31  ;;  %v2161_v7 = vadd.f32 %v8040_v40, %v1878_v60  ;;  %v2162_v55 = vadd.f32 %v8052_v63, %v1879_v11 }
 0x309   : > { %v8189_v62 = vsel %vm1921_vm8, %v3570_v57, %v3574_v50  ;;  %v2233_v63 = vsel %vm2204_vm7, %v2230_v37, %v2232_v36 }
 0x30a   : > { %v2576_v35 = vsel %vm7679_vm4, %v2574_v54, %v2575_v43  ;;  %v2435_v32 = vadd.f32 %v8088_v52, %v2399_v30  ;;  %2370 = vmatmul.bf16.gmra.mxu1 %v2231_v12  ;;  %v2577_v49 = vrot.slane %v2575_v43, 4  ;;  %v8196_v10 = vpop.f32.mrf.mxu0  ;;  %v2886_v54 = vor.u32 %v2884_v56, %v2882_v9 }
 0x30b   : > { %2690 = vst [vmem:[#allocation3 + $0x1c] sm:$0xf] %v2576_v35 }
 0x30c   : > { %v2467_v20 = vmax.f32 %v2435_v32, 0.0  ;;  %v8210_v32 = vpop.f32.mrf.mxu3 }
 0x30e   : > { %v2499_v38 = vpack.c.bf16 %v2467_v20, %v2467_v20 }
 0x30f   : > { %v2333_v45 = vpop.f32.mrf.mxu1 }
 0x310   : > { %v2578_v33 = vrot.slane %v2499_v38, 7  ;;  %v2400_v48 = vadd.f32 %v2333_v45, %v2161_v7 }
 0x312   : > { %v2579_v15 = vsel %vm7679_vm4, %v2577_v49, %v2578_v33  ;;  %v2436_v57 = vadd.f32 %v8088_v52, %v2400_v48  ;;  %v8201_v46 = vld [vmem:[#allocation3 + $0x18] sm:$0xff]  ;;  %v2580_v20 = vrot.slane %v2578_v33, 4  ;;  %v6931_v33 = vld [vmem:[#allocation4 + $0xe8] sm:$0xff]  ;;  %v8224_v11 = vpop.f32.mrf.mxu0 }
 0x313   : > { %2691 = vst [vmem:[#allocation3 + $0x20] sm:$0xf] %v2579_v15  ;;  %3236 = vmatmul.bf16.gmra.mxu3 %v8201_v46  ;;  %v3327_v40 = vrot.slane %v8201_v46, 1  ;;  %v2888_v39 = vshll.u32 %v8201_v46, 16  ;;  %v2892_v18 = vshrl.u32 %v8201_v46, 16  ;;  %3703 = vmatpush.bf16.msrb.mxu1 %v6931_v33 }
 0x314   : > { %v2468_v21 = vmax.f32 %v2436_v57, 0.0 }
 0x315   : > { %v3328_v30 = vsel %vm1682_vm5, %v3325_v23, %v3327_v40  ;;  %v2890_v31 = vrot.slane %v2888_v39, 1  ;;  %v3576_v12 = vrot.slane %v2892_v18, 1  ;;  %v3577_v35 = vrot.slane %v2888_v39, 2 }
 0x316   : > { %v2500_v43 = vpack.c.bf16 %v2468_v21, %v2468_v21  ;;  %3437 = vmatmul.bf16.gmra.mxu0 %v3328_v30  ;;  %v1880_v23 = vadd.f32 %v8044_v53, %v7985_v19  ;;  %v1881_v39 = vadd.f32 %v8054_v4, %v7992_v41  ;;  %v6930_v30 = vld [vmem:[#allocation4 + $0xe0] sm:$0xff] }
 0x317   : > { %v2336_v60 = vpop.f32.mrf.mxu1  ;;  %v2891_v45 = vsel %vm1223_vm6, %v2886_v54, %v2890_v31  ;;  %v3578_v56 = vor.u32 %v3577_v35, %v3576_v12  ;;  %v6939_v12 = vld [vmem:[#allocation4 + $0x128] sm:$0xff]  ;;  %3704 = vmatpush.bf16.msrb.mxu1 %v6930_v30 }
 0x318   : > { %v2581_v38 = vrot.slane %v2500_v43, 7  ;;  %v2401_v7 = vadd.f32 %v2336_v60, %v2162_v55  ;;  %3078 = vmatmul.bf16.gmra.mxu2 %v2891_v45  ;;  %v2163_v57 = vadd.f32 %v8058_v17, %v1880_v23  ;;  %v8229_v55 = vpop.f32.mrf.mxu3  ;;  %v2164_v4 = vadd.f32 %v8066_v47, %v1881_v39 }
 0x319   : > { %v8222_v48 = vsel %vm1921_vm8, %v3574_v50, %v3578_v56  ;;  %3941 = vmatpush.bf16.msrb.mxu2 %v6939_v12 }
 0x31a   : > { %v2582_v9 = vsel %vm7679_vm4, %v2580_v20, %v2581_v38  ;;  %v2437_v49 = vadd.f32 %v8088_v52, %v2401_v7  ;;  %2375 = vmatmul.bf16.gmra.mxu1 %v2233_v63  ;;  %v2583_v19 = vrot.slane %v2581_v38, 4  ;;  %v2234_v20 = vrot.slane %v7983_v16, 2  ;;  %v6929_v7 = vld [vmem:[#allocation4 + $0xd8] sm:$0xff]  ;;  %v8242_v45 = vpop.f32.mrf.mxu0 }
 0x31b   : > { %2692 = vst [vmem:[#allocation3 + $0x24] sm:$0xf] %v2582_v9  ;;  %v2894_v38 = vor.u32 %v2892_v18, %v2890_v31  ;;  %3705 = vmatpush.bf16.msrb.mxu1 %v6929_v7  ;;  %v6926_v7 = vld [vmem:[#allocation4 + $0xc0] sm:$0xff] }
 0x31c   : > { %v2469_v15 = vmax.f32 %v2437_v49, 0.0  ;;  %v2235_v18 = vsel %vm2204_vm7, %v2232_v36, %v2234_v20 }
 0x31e   : > { %v2501_v37 = vpack.c.bf16 %v2469_v15, %v2469_v15 }
 0x31f   : > { %v2338_v46 = vpop.f32.mrf.mxu1 }
 0x320   : > { %v2584_v53 = vrot.slane %v2501_v37, 7  ;;  %v2402_v21 = vadd.f32 %v2338_v46, %v2163_v57  ;;  %v8259_v51 = vpop.f32.mrf.mxu3 }
 0x322   : > { %v2585_v50 = vsel %vm7679_vm4, %v2583_v19, %v2584_v53  ;;  %v2438_v54 = vadd.f32 %v8088_v52, %v2402_v21  ;;  %v8234_v43 = vld [vmem:[#allocation3 + $0x20] sm:$0xff]  ;;  %v2586_v37 = vrot.slane %v2584_v53, 4  ;;  %v6928_v21 = vld [vmem:[#allocation4 + $0xd0] sm:$0xff] }
 0x323   : > { %2693 = vst [vmem:[#allocation3 + $0x28] sm:$0xf] %v2585_v50  ;;  %3241 = vmatmul.bf16.gmra.mxu3 %v8234_v43  ;;  %v3329_v60 = vrot.slane %v8234_v43, 1  ;;  %v2896_v35 = vshll.u32 %v8234_v43, 16  ;;  %v2900_v41 = vshrl.u32 %v8234_v43, 16  ;;  %3706 = vmatpush.bf16.msrb.mxu1 %v6928_v21  ;;  %v6927_v50 = vld [vmem:[#allocation4 + $0xc8] sm:$0xff] }
 0x324   : > { %v2470_v17 = vmax.f32 %v2438_v54, 0.0 }
 0x325   : > { %v3330_v23 = vsel %vm1682_vm5, %v3327_v40, %v3329_v60  ;;  %v2898_v9 = vrot.slane %v2896_v35, 1  ;;  %v3580_v49 = vrot.slane %v2900_v41, 1  ;;  %v3581_v15 = vrot.slane %v2896_v35, 2 }
 0x326   : > { %v2502_v63 = vpack.c.bf16 %v2470_v17, %v2470_v17  ;;  %3442 = vmatmul.bf16.gmra.mxu0 %v3330_v23  ;;  %v1882_v40 = vadd.f32 %v8064_v25, %v7998_v0  ;;  %v8262_v25 = vpop.f32.mrf.mxu0  ;;  %v1883_v35 = vadd.f32 %v8070_v58, %v8003_v22 }
 0x327   : > { %v2341_v33 = vpop.f32.mrf.mxu1  ;;  %v2899_v47 = vsel %vm1223_vm6, %v2894_v38, %v2898_v9  ;;  %v3582_v31 = vor.u32 %v3581_v15, %v3580_v49  ;;  %3707 = vmatpush.bf16.msrb.mxu1 %v6927_v50  ;;  %v2236_v15 = vrot.slane %v7996_v44, 2 }
 0x328   : > { %v2587_v57 = vrot.slane %v2502_v63, 7  ;;  %v2403_v46 = vadd.f32 %v2341_v33, %v2164_v4  ;;  %3083 = vmatmul.bf16.gmra.mxu2 %v2899_v47  ;;  %v2165_v43 = vadd.f32 %v8073_v3, %v1882_v40  ;;  %v2166_v33 = vadd.f32 %v8082_v61, %v1883_v35  ;;  %v8271_v22 = vpop.f32.mrf.mxu3 }
 0x329   : > { %v8257_v39 = vsel %vm1921_vm8, %v3578_v56, %v3582_v31  ;;  %v2237_v44 = vsel %vm2204_vm7, %v2234_v20, %v2236_v15 }
 0x32a   : > { %v2588_v19 = vsel %vm7679_vm4, %v2586_v37, %v2587_v57  ;;  %v2439_v53 = vadd.f32 %v8088_v52, %v2403_v46  ;;  %2380 = vmatmul.bf16.gmra.mxu1 %v2235_v18  ;;  %v2589_v30 = vrot.slane %v2587_v57, 4  ;;  %v2902_v37 = vor.u32 %v2900_v41, %v2898_v9 }
 0x32b   : > { %2694 = vst [vmem:[#allocation3 + $0x2c] sm:$0xf] %v2588_v19  ;;  %3708 = vmatpush.bf16.msrb.mxu1 %v6926_v7  ;;  %v1884_v41 = vadd.f32 %v8078_v24, %v8007_v14 }
 0x32c   : > { %v2471_v36 = vmax.f32 %v2439_v53, 0.0 }
 0x32d   : > { %v2167_v20 = vadd.f32 %v8095_v8, %v1884_v41 }
 0x32e   : > { %v2503_v54 = vpack.c.bf16 %v2471_v36, %v2471_v36 }
 0x32f   : > { %v2343_v0 = vpop.f32.mrf.mxu1 }
 0x330   : > { %v2590_v12 = vrot.slane %v2503_v54, 7  ;;  %v2404_v17 = vadd.f32 %v2343_v0, %v2165_v43 }
 0x332   : > { %v2591_v56 = vsel %vm7679_vm4, %v2589_v30, %v2590_v12  ;;  %v2440_v4 = vadd.f32 %v8088_v52, %v2404_v17  ;;  %v6891_v38 = vld [vmem:[#allocation3 + $0x28] sm:$0xff]  ;;  %v2592_v19 = vrot.slane %v2590_v12, 4  ;;  %v8289_v30 = vpop.f32.mrf.mxu3  ;;  %v1885_v17 = vadd.f32 %v8090_v59, %v8009_v27 }
 0x333   : > { %2695 = vst [vmem:[#allocation3 + $0x30] sm:$0xf] %v2591_v56  ;;  %3246 = vmatmul.bf16.gmra.mxu3 %v6891_v38  ;;  %v3331_v3 = vrot.slane %v6891_v38, 1  ;;  %v2904_v23 = vshll.u32 %v6891_v38, 16  ;;  %v2908_v49 = vshrl.u32 %v6891_v38, 16 }
 0x334   : > { %v2472_v63 = vmax.f32 %v2440_v4, 0.0  ;;  %v6938_v4 = vld [vmem:[#allocation4 + $0x120] sm:$0xff] }
 0x335   : > { %v3332_v57 = vsel %vm1682_vm5, %v3329_v60, %v3331_v3  ;;  %v2906_v46 = vrot.slane %v2904_v23, 1  ;;  %v3584_v47 = vrot.slane %v2908_v49, 1  ;;  %v3585_v40 = vrot.slane %v2904_v23, 2  ;;  %v8280_v60 = vpop.f32.mrf.mxu0  ;;  %3942 = vmatpush.bf16.msrb.mxu2 %v6938_v4 }
 0x336   : > { %v2504_v58 = vpack.c.bf16 %v2472_v63, %v2472_v63  ;;  %3447 = vmatmul.bf16.gmra.mxu0 %v3332_v57 }
 0x337   : > { %v2346_v18 = vpop.f32.mrf.mxu1  ;;  %v2907_v36 = vsel %vm1223_vm6, %v2902_v37, %v2906_v46  ;;  %v3586_v61 = vor.u32 %v3585_v40, %v3584_v47  ;;  %v2910_v15 = vor.u32 %v2908_v49, %v2906_v46 }
 0x338   : > { %v2593_v53 = vrot.slane %v2504_v58, 7  ;;  %v2405_v21 = vadd.f32 %v2346_v18, %v2166_v33  ;;  %3088 = vmatmul.bf16.gmra.mxu2 %v2907_v36  ;;  %v2168_v33 = vadd.f32 %v8102_v6, %v1885_v17  ;;  %v1886_v6 = vadd.f32 %v8098_v29, %v8012_v42 }
 0x339   : > { %v8286_v54 = vsel %vm1921_vm8, %v3582_v31, %v3586_v61 }
 0x33a   : > { %v2594_v9 = vsel %vm7679_vm4, %v2592_v19, %v2593_v53  ;;  %v2441_v50 = vadd.f32 %v8088_v52, %v2405_v21  ;;  %2385 = vmatmul.bf16.gmra.mxu1 %v2237_v44  ;;  %v2595_v14 = vrot.slane %v2593_v53, 4  ;;  %v8303_v49 = vpop.f32.mrf.mxu3 }
 0x33b   : > { %2696 = vst [vmem:[#allocation3 + $0x34] sm:$0xf] %v2594_v9 }
 0x33c   : > { %v2473_v16 = vmax.f32 %v2441_v50, 0.0  ;;  %v9641_v50 = vld [vmem:[#allocation29_spill] sm:$0xff] }
 0x33d   : > { %v8296_v38 = vpop.f32.mrf.mxu0 }
 0x33e   : > { %v2505_v43 = vpack.c.bf16 %v2473_v16, %v2473_v16  ;;  %v2169_v16 = vadd.f32 %v9641_v50, %v1886_v6 }
 0x33f   : > { %v2348_v0 = vpop.f32.mrf.mxu1 }
 0x340   : > { %v2596_v24 = vrot.slane %v2505_v43, 7  ;;  %v2406_v12 = vadd.f32 %v2348_v0, %v2167_v20  ;;  %v9642_v0 = vld [vmem:[#allocation14_spill] sm:$0xff] }
 0x342   : > { %v2597_v35 = vsel %vm7679_vm4, %v2595_v14, %v2596_v24  ;;  %v2442_v56 = vadd.f32 %v8088_v52, %v2406_v12  ;;  %v6892_v31 = vld [vmem:[#allocation3 + $0x30] sm:$0xff]  ;;  %v2598_v18 = vrot.slane %v2596_v24, 4  ;;  %v8322_v17 = vpop.f32.mrf.mxu3 }
 0x343   : > { %2697 = vst [vmem:[#allocation3 + $0x38] sm:$0xf] %v2597_v35  ;;  %3251 = vmatmul.bf16.gmra.mxu3 %v6892_v31  ;;  %v3333_v7 = vrot.slane %v6892_v31, 1  ;;  %v2912_v63 = vshll.u32 %v6892_v31, 16  ;;  %v2916_v23 = vshrl.u32 %v6892_v31, 16  ;;  %v9643_v14 = vld [vmem:[#allocation28_spill] sm:$0xff] }
 0x344   : > { %v2474_v8 = vmax.f32 %v2442_v56, 0.0  ;;  %v1887_v24 = vadd.f32 %v9643_v14, %v9642_v0 }
 0x345   : > { %v3334_v59 = vsel %vm1682_vm5, %v3331_v3, %v3333_v7  ;;  %v2914_v37 = vrot.slane %v2912_v63, 1  ;;  %v3588_v58 = vrot.slane %v2916_v23, 1  ;;  %v3589_v47 = vrot.slane %v2912_v63, 2  ;;  %v8312_v41 = vpop.f32.mrf.mxu0 }
 0x346   : > { %v2506_v27 = vpack.c.bf16 %v2474_v8, %v2474_v8  ;;  %3452 = vmatmul.bf16.gmra.mxu0 %v3334_v59  ;;  %v9644_v8 = vld [vmem:[#allocation32_spill] sm:$0xff] }
 0x347   : > { %v2351_v57 = vpop.f32.mrf.mxu1  ;;  %v2915_v53 = vsel %vm1223_vm6, %v2910_v15, %v2914_v37  ;;  %v3590_v21 = vor.u32 %v3589_v47, %v3588_v58  ;;  %v2170_v63 = vadd.f32 %v9644_v8, %v1887_v24 }
 0x348   : > { %v2599_v40 = vrot.slane %v2506_v27, 7  ;;  %v2407_v19 = vadd.f32 %v2351_v57, %v2168_v33  ;;  %3093 = vmatmul.bf16.gmra.mxu2 %v2915_v53  ;;  %v2918_v33 = vor.u32 %v2916_v23, %v2914_v37 }
 0x349   : > { %v8310_v36 = vsel %vm1921_vm8, %v3586_v61, %v3590_v21 }
 0x34a   : > { %v2600_v3 = vsel %vm7679_vm4, %v2598_v18, %v2599_v40  ;;  %v2443_v46 = vadd.f32 %v8088_v52, %v2407_v19  ;;  %3709 = vmatmul.bf16.vlgmr.msrb.gmra.mxu1 %v8162_v13  ;;  %v2601_v29 = vrot.slane %v2599_v40, 4 }
 0x34b   : > { %2698 = vst [vmem:[#allocation3 + $0x3c] sm:$0xf] %v2600_v3 }
 0x34c   : > { %v2475_v44 = vmax.f32 %v2443_v46, 0.0  ;;  %v9645_v46 = vld [vmem:[#allocation15_spill] sm:$0xff] }
 0x34d   : > { %v8330_v18 = vpop.f32.mrf.mxu0 }
 0x34e   : > { %v2507_v9 = vpack.c.bf16 %v2475_v44, %v2475_v44  ;;  %v9646_v44 = vld [vmem:[#allocation31_spill] sm:$0xff] }
 0x34f   : > { %v2353_v42 = vpop.f32.mrf.mxu1  ;;  %v1888_v23 = vadd.f32 %v9646_v44, %v9645_v46 }
 0x350   : > { %v2602_v43 = vrot.slane %v2507_v9, 7  ;;  %v2408_v20 = vadd.f32 %v2353_v42, %v2169_v16  ;;  %v8342_v16 = vpop.f32.mrf.mxu3 }
 0x352   : > { %v2603_v13 = vsel %vm7679_vm4, %v2601_v29, %v2602_v43  ;;  %v2444_v12 = vadd.f32 %v8088_v52, %v2408_v20  ;;  %v8320_v61 = vld [vmem:[#allocation3 + $0x38] sm:$0xff]  ;;  %v2604_v40 = vrot.slane %v2602_v43, 4  ;;  %v9647_v29 = vld [vmem:[#allocation34_spill] sm:$0xff] }
 0x353   : > { %2699 = vst [vmem:[#allocation3 + $0x40] sm:$0xf] %v2603_v13  ;;  %3256 = vmatmul.bf16.gmra.mxu3 %v8320_v61  ;;  %v3335_v56 = vrot.slane %v8320_v61, 1  ;;  %v2920_v31 = vshll.u32 %v8320_v61, 16  ;;  %v2924_v4 = vshrl.u32 %v8320_v61, 16  ;;  %v2171_v43 = vadd.f32 %v9647_v29, %v1888_v23  ;;  %v9648_v13 = vld [vmem:[#allocation16_spill] sm:$0xff] }
 0x354   : > { %v2476_v35 = vmax.f32 %v2444_v12, 0.0  ;;  %v9649_v12 = vld [vmem:[#allocation33_spill] sm:$0xff] }
 0x355   : > { %v3336_v27 = vsel %vm1682_vm5, %v3333_v7, %v3335_v56  ;;  %v2922_v59 = vrot.slane %v2920_v31, 1  ;;  %v3592_v58 = vrot.slane %v2924_v4, 1  ;;  %v3593_v47 = vrot.slane %v2920_v31, 2  ;;  %v8347_v31 = vpop.f32.mrf.mxu0 }
 0x356   : > { %v2508_v15 = vpack.c.bf16 %v2476_v35, %v2476_v35  ;;  %3457 = vmatmul.bf16.gmra.mxu0 %v3336_v27  ;;  %v1889_v35 = vadd.f32 %v9649_v12, %v9648_v13 }
 0x357   : > { %v2356_v57 = vpop.f32.mrf.mxu1  ;;  %v2923_v6 = vsel %vm1223_vm6, %v2918_v33, %v2922_v59  ;;  %v3594_v3 = vor.u32 %v3593_v47, %v3592_v58  ;;  %v2926_v47 = vor.u32 %v2924_v4, %v2922_v59 }
 0x358   : > { %v2605_v19 = vrot.slane %v2508_v15, 7  ;;  %v2409_v53 = vadd.f32 %v2356_v57, %v2170_v63  ;;  %3098 = vmatmul.bf16.gmra.mxu2 %v2923_v6  ;;  %v6937_v63 = vld [vmem:[#allocation4 + $0x118] sm:$0xff]  ;;  %v2172_v57 = vadd.f32 %v8164_v1, %v1889_v35 }
 0x359   : > { %v8340_v9 = vsel %vm1921_vm8, %v3590_v21, %v3594_v3  ;;  %3943 = vmatpush.bf16.msrb.mxu2 %v6937_v63  ;;  %v9650_v1 = vld [vmem:[#allocation17_spill] sm:$0xff] }
 0x35a   : > { %v2606_v7 = vsel %vm7679_vm4, %v2604_v40, %v2605_v19  ;;  %v2445_v37 = vadd.f32 %v8088_v52, %v2409_v53  ;;  %3714 = vmatmul.bf16.gmra.mxu1 %v8189_v62  ;;  %v2607_v0 = vrot.slane %v2605_v19, 4  ;;  %v1890_v4 = vadd.f32 %v8156_v5, %v9650_v1 }
 0x35b   : > { %2700 = vst [vmem:[#allocation3 + $0x44] sm:$0xf] %v2606_v7 }
 0x35c   : > { %v2477_v50 = vmax.f32 %v2445_v37, 0.0  ;;  %v2173_v13 = vadd.f32 %v8177_v34, %v1890_v4 }
 0x35e   : > { %v2509_v42 = vpack.c.bf16 %v2477_v50, %v2477_v50 }
 0x35f   : > { %v2358_v20 = vpop.f32.mrf.mxu1 }
 0x360   : > { %v2608_v14 = vrot.slane %v2509_v42, 7  ;;  %v2410_v24 = vadd.f32 %v2358_v20, %v2171_v43  ;;  %v8372_v20 = vpop.f32.mrf.mxu0 }
 0x362   : > { %v2609_v62 = vsel %vm7679_vm4, %v2607_v0, %v2608_v14  ;;  %v2446_v21 = vadd.f32 %v8088_v52, %v2410_v24  ;;  %v8352_v8 = vld [vmem:[#allocation3 + $0x40] sm:$0xff]  ;;  %v2610_v7 = vrot.slane %v2608_v14, 4 }
 0x363   : > { %2701 = vst [vmem:[#allocation3 + $0x48] sm:$0xf] %v2609_v62  ;;  %3261 = vmatmul.bf16.gmra.mxu3 %v8352_v8  ;;  %v3337_v15 = vrot.slane %v8352_v8, 1  ;;  %v2928_v27 = vshll.u32 %v8352_v8, 16  ;;  %v2932_v58 = vshrl.u32 %v8352_v8, 16 }
 0x364   : > { %v2478_v33 = vmax.f32 %v2446_v21, 0.0  ;;  %v9651_v21 = vld [vmem:[#allocation18_spill] sm:$0xff] }
 0x365   : > { %v3338_v53 = vsel %vm1682_vm5, %v3335_v56, %v3337_v15  ;;  %v2930_v6 = vrot.slane %v2928_v27, 1  ;;  %v3596_v46 = vrot.slane %v2932_v58, 1  ;;  %v3597_v23 = vrot.slane %v2928_v27, 2 }
 0x366   : > { %v2510_v40 = vpack.c.bf16 %v2478_v33, %v2478_v33  ;;  %v8359_v19 = vpop.f32.mrf.mxu3  ;;  %3462 = vmatmul.bf16.gmra.mxu0 %v3338_v53  ;;  %v1891_v63 = vadd.f32 %v8172_v28, %v9651_v21 }
 0x367   : > { %v2361_v44 = vpop.f32.mrf.mxu1  ;;  %v2931_v42 = vsel %vm1223_vm6, %v2926_v47, %v2930_v6  ;;  %v3598_v29 = vor.u32 %v3597_v23, %v3596_v46  ;;  %v2934_v53 = vor.u32 %v2932_v58, %v2930_v6 }
 0x368   : > { %v2611_v37 = vrot.slane %v2510_v40, 7  ;;  %v2411_v50 = vadd.f32 %v2361_v44, %v2172_v57  ;;  %3103 = vmatmul.bf16.gmra.mxu2 %v2931_v42  ;;  %v2174_v28 = vadd.f32 %v8196_v10, %v1891_v63 }
 0x369   : > { %v8370_v43 = vsel %vm1921_vm8, %v3594_v3, %v3598_v29 }
 0x36a   : > { %v2612_v59 = vsel %vm7679_vm4, %v2610_v7, %v2611_v37  ;;  %v2447_v56 = vadd.f32 %v8088_v52, %v2411_v50  ;;  %3719 = vmatmul.bf16.gmra.mxu1 %v8222_v48  ;;  %v2613_v12 = vrot.slane %v2611_v37, 4 }
 0x36b   : > { %2702 = vst [vmem:[#allocation3 + $0x4c] sm:$0xf] %v2612_v59 }
 0x36c   : > { %v2479_v0 = vmax.f32 %v2447_v56, 0.0 }
 0x36e   : > { %v2511_v14 = vpack.c.bf16 %v2479_v0, %v2479_v0  ;;  %v8374_v24 = vpop.f32.mrf.mxu3 }
 0x36f   : > { %v2363_v5 = vpop.f32.mrf.mxu1 }
 0x370   : > { %v2614_v35 = vrot.slane %v2511_v14, 7  ;;  %v2412_v62 = vadd.f32 %v2363_v5, %v2173_v13  ;;  %v9652_v14 = vld [vmem:[#allocation19_spill] sm:$0xff] }
 0x371   : > { %v1892_v10 = vadd.f32 %v8191_v2, %v9652_v14 }
 0x372   : > { %v2615_v48 = vsel %vm7679_vm4, %v2613_v12, %v2614_v35  ;;  %v2448_v3 = vadd.f32 %v8088_v52, %v2412_v62  ;;  %v8382_v33 = vld [vmem:[#allocation3 + $0x48] sm:$0xff]  ;;  %v2616_v1 = vrot.slane %v2614_v35, 4 }
 0x373   : > { %2703 = vst [vmem:[#allocation3 + $0x50] sm:$0xf] %v2615_v48  ;;  %3266 = vmatmul.bf16.gmra.mxu3 %v8382_v33  ;;  %v3428_v57 = vpop.f32.mrf.mxu0  ;;  %v3339_v34 = vrot.slane %v8382_v33, 1  ;;  %v2936_v47 = vshll.u32 %v8382_v33, 16  ;;  %v2940_v40 = vshrl.u32 %v8382_v33, 16  ;;  %v2175_v21 = vadd.f32 %v8224_v11, %v1892_v10  ;;  %v6936_v11 = vld [vmem:[#allocation4 + $0x110] sm:$0xff] }
 0x374   : > { %v2480_v27 = vmax.f32 %v2448_v3, 0.0  ;;  %3944 = vmatpush.bf16.msrb.mxu2 %v6936_v11 }
 0x375   : > { %v3340_v44 = vsel %vm1682_vm5, %v3337_v15, %v3339_v34  ;;  %v2938_v23 = vrot.slane %v2936_v47, 1  ;;  %v3600_v7 = vrot.slane %v2940_v40, 1  ;;  %v3601_v42 = vrot.slane %v2936_v47, 2  ;;  %v9653_v47 = vld [vmem:[#allocation20_spill] sm:$0xff] }
 0x376   : > { %v2512_v46 = vpack.c.bf16 %v2480_v27, %v2480_v27  ;;  %v8390_v50 = vpop.f32.mrf.mxu3  ;;  %3467 = vmatmul.bf16.gmra.mxu0 %v3340_v44 }
 0x377   : > { %v2366_v37 = vpop.f32.mrf.mxu1  ;;  %v2939_v56 = vsel %vm1223_vm6, %v2934_v53, %v2938_v23  ;;  %v3602_v0 = vor.u32 %v3601_v42, %v3600_v7 }
 0x378   : > { %v2617_v4 = vrot.slane %v2512_v46, 7  ;;  %v2413_v59 = vadd.f32 %v2366_v37, %v2174_v28  ;;  %3108 = vmatmul.bf16.gmra.mxu2 %v2939_v56 }
 0x379   : > { %v8400_v6 = vsel %vm1921_vm8, %v3598_v29, %v3602_v0  ;;  %v1893_v29 = vadd.f32 %v8210_v32, %v9653_v47 }
 0x37a   : > { %v2618_v15 = vsel %vm7679_vm4, %v2616_v1, %v2617_v4  ;;  %v2449_v58 = vadd.f32 %v8088_v52, %v2413_v59  ;;  %3724 = vmatmul.bf16.gmra.mxu1 %v8257_v39  ;;  %v2619_v3 = vrot.slane %v2617_v4, 4 }
 0x37b   : > { %2704 = vst [vmem:[#allocation3 + $0x54] sm:$0xf] %v2618_v15  ;;  %v3069_v5 = vpop.f32.mrf.mxu2  ;;  %v3430_v12 = vpop.f32.mrf.mxu0  ;;  %v2176_v1 = vadd.f32 %v8242_v45, %v1893_v29 }
 0x37c   : > { %v2481_v13 = vmax.f32 %v2449_v58, 0.0  ;;  %v3223_v35 = vadd.f32 %v8359_v19, %v3069_v5 }
 0x37e   : > { %v2513_v62 = vpack.c.bf16 %v2481_v13, %v2481_v13  ;;  %v8404_v63 = vpop.f32.mrf.mxu3  ;;  %v8406_v48 = vadd.f32 %v3428_v57, %v3223_v35 }
 0x37f   : > { %v2368_v2 = vpop.f32.mrf.mxu1 }
 0x380   : > { %v2620_v27 = vrot.slane %v2513_v62, 7  ;;  %v2414_v39 = vadd.f32 %v2368_v2, %v2175_v21  ;;  %v8434_v21 = vld [vmem:[%s9604_s3] ss:$0 sm:$0xff] }
 0x382   : > { %v2621_v28 = vsel %vm7679_vm4, %v2619_v3, %v2620_v27  ;;  %v2450_v53 = vadd.f32 %v8088_v52, %v2414_v39  ;;  %v8413_v19 = vld [vmem:[#allocation3 + $0x50] sm:$0xff]  ;;  %v2942_v52 = vor.u32 %v2940_v40, %v2938_v23  ;;  %v2622_v5 = vrot.slane %v2620_v27, 4  ;;  %v9654_v40 = vld [vmem:[#allocation21_spill] sm:$0xff] }
 0x383   : > { %2705 = vst [vmem:[#allocation3 + $0x58] sm:$0xf] %v2621_v28  ;;  %v3071_v44 = vpop.f32.mrf.mxu2  ;;  %3271 = vmatmul.bf16.gmra.mxu3 %v8413_v19  ;;  %v3433_v57 = vpop.f32.mrf.mxu0  ;;  %v3341_v7 = vrot.slane %v8413_v19, 1  ;;  %v2944_v37 = vshll.u32 %v8413_v19, 16  ;;  %v2948_v32 = vshrl.u32 %v8413_v19, 16  ;;  %v1894_v23 = vadd.f32 %v8229_v55, %v9654_v40 }
 0x384   : > { %v2482_v46 = vmax.f32 %v2450_v53, 0.0  ;;  %v3225_v42 = vadd.f32 %v8374_v24, %v3071_v44 }
 0x385   : > { %v3342_v59 = vsel %vm1682_vm5, %v3339_v34, %v3341_v7  ;;  %v2946_v56 = vrot.slane %v2944_v37, 1  ;;  %v3604_v14 = vrot.slane %v2948_v32, 1  ;;  %v3605_v13 = vrot.slane %v2944_v37, 2  ;;  %v9655_v37 = vld [vmem:[#allocation22_spill] sm:$0xff] }
 0x386   : > { %v2514_v4 = vpack.c.bf16 %v2482_v46, %v2482_v46  ;;  %v8422_v15 = vpop.f32.mrf.mxu3  ;;  %3472 = vmatmul.bf16.gmra.mxu0 %v3342_v59  ;;  %v8424_v58 = vadd.f32 %v3430_v12, %v3225_v42  ;;  %v2177_v29 = vadd.f32 %v8262_v25, %v1894_v23 }
 0x387   : > { %v2371_v10 = vpop.f32.mrf.mxu1  ;;  %v2947_v24 = vsel %vm1223_vm6, %v2942_v52, %v2946_v56  ;;  %v3606_v45 = vor.u32 %v3605_v13, %v3604_v14 }
 0x388   : > { %v2623_v35 = vrot.slane %v2514_v4, 7  ;;  %v2415_v62 = vadd.f32 %v2371_v10, %v2176_v1  ;;  %3113 = vmatmul.bf16.gmra.mxu2 %v2947_v24  ;;  %v2950_v10 = vor.u32 %v2948_v32, %v2946_v56  ;;  %v9656_v32 = vld [vmem:[#allocation23_spill] sm:$0xff] }
 0x389   : > { %v8439_v2 = vsel %vm1921_vm8, %v3602_v0, %v3606_v45  ;;  %v1895_v0 = vadd.f32 %v8259_v51, %v9655_v37 }
 0x38a   : > { %v2624_v34 = vsel %vm7679_vm4, %v2622_v5, %v2623_v35  ;;  %v2451_v12 = vadd.f32 %v8434_v21, %v2415_v62  ;;  %3729 = vmatmul.bf16.gmra.mxu1 %v8286_v54  ;;  %v2625_v46 = vrot.slane %v2623_v35, 4 }
 0x38b   : > { %2706 = vst [vmem:[#allocation3 + $0x5c] sm:$0xf] %v2624_v34  ;;  %v3074_v27 = vpop.f32.mrf.mxu2  ;;  %v3435_v47 = vpop.f32.mrf.mxu0  ;;  %v2178_v14 = vadd.f32 %v8280_v60, %v1895_v0 }
 0x38c   : > { %v2483_v3 = vmax.f32 %v2451_v12, 0.0  ;;  %v3228_v55 = vadd.f32 %v8390_v50, %v3074_v27 }
 0x38e   : > { %v2515_v39 = vpack.c.bf16 %v2483_v3, %v2483_v3  ;;  %v8443_v53 = vpop.f32.mrf.mxu3  ;;  %v8445_v11 = vadd.f32 %v3433_v57, %v3228_v55 }
 0x38f   : > { %v2373_v28 = vpop.f32.mrf.mxu1 }
 0x390   : > { %v2626_v44 = vrot.slane %v2515_v39, 7  ;;  %v2416_v54 = vadd.f32 %v2373_v28, %v2177_v29 }
 0x392   : > { %v2627_v42 = vsel %vm7679_vm4, %v2625_v46, %v2626_v44  ;;  %v2452_v50 = vadd.f32 %v8434_v21, %v2416_v54  ;;  %v8452_v1 = vld [vmem:[#allocation3 + $0x58] sm:$0xff]  ;;  %v2628_v12 = vrot.slane %v2626_v44, 4 }
 0x393   : > { %2707 = vst [vmem:[#allocation3 + $0x60] sm:$0xf] %v2627_v42  ;;  %v3076_v52 = vpop.f32.mrf.mxu2  ;;  %3276 = vmatmul.bf16.gmra.mxu3 %v8452_v1  ;;  %v3343_v57 = vrot.slane %v8452_v1, 1  ;;  %v2952_v4 = vshll.u32 %v8452_v1, 16  ;;  %v2956_v59 = vshrl.u32 %v8452_v1, 16  ;;  %v3438_v27 = vpop.f32.mrf.mxu0 }
 0x394   : > { %v2484_v25 = vmax.f32 %v2452_v50, 0.0  ;;  %v3230_v51 = vadd.f32 %v8404_v63, %v3076_v52  ;;  %v9657_v52 = vld [vmem:[#allocation24_spill] sm:$0xff] }
 0x395   : > { %v3344_v5 = vsel %vm1682_vm5, %v3341_v7, %v3343_v57  ;;  %v2954_v35 = vrot.slane %v2952_v4, 1  ;;  %v3608_v62 = vrot.slane %v2956_v59, 1  ;;  %v3609_v34 = vrot.slane %v2952_v4, 2 }
 0x396   : > { %v2516_v13 = vpack.c.bf16 %v2484_v25, %v2484_v25  ;;  %v8461_v40 = vpop.f32.mrf.mxu3  ;;  %3477 = vmatmul.bf16.gmra.mxu0 %v3344_v5  ;;  %v8463_v23 = vadd.f32 %v3435_v47, %v3230_v51  ;;  %v1896_v7 = vadd.f32 %v8271_v22, %v9656_v32  ;;  %v6972_v47 = vld [vmem:[#allocation7 + $0x78] sm:$0xff] }
 0x397   : > { %v2376_v24 = vpop.f32.mrf.mxu1  ;;  %v2955_v63 = vsel %vm1223_vm6, %v2950_v10, %v2954_v35  ;;  %v3610_v60 = vor.u32 %v3609_v34, %v3608_v62  ;;  %4697 = vmatpush.bf16.msrb.mxu3 %v6972_v47 }
 0x398   : > { %v2629_v3 = vrot.slane %v2516_v13, 7  ;;  %v2417_v55 = vadd.f32 %v2376_v24, %v2178_v14  ;;  %3118 = vmatmul.bf16.gmra.mxu2 %v2955_v63  ;;  %v2179_v22 = vadd.f32 %v8296_v38, %v1896_v7  ;;  %v6935_v38 = vld [vmem:[#allocation4 + $0x108] sm:$0xff] }
 0x399   : > { %v8473_v29 = vsel %vm1921_vm8, %v3606_v45, %v3610_v60  ;;  %v1897_v45 = vadd.f32 %v8289_v30, %v9657_v52  ;;  %3945 = vmatpush.bf16.msrb.mxu2 %v6935_v38  ;;  %v6971_v38 = vld [vmem:[#allocation7 + $0x70] sm:$0xff] }
 0x39a   : > { %v2630_v56 = vsel %vm7679_vm4, %v2628_v12, %v2629_v3  ;;  %v2453_v39 = vadd.f32 %v8434_v21, %v2417_v55  ;;  %3734 = vmatmul.bf16.gmra.mxu1 %v8310_v36  ;;  %v2631_v50 = vrot.slane %v2629_v3, 4  ;;  %v2958_v12 = vor.u32 %v2956_v59, %v2954_v35  ;;  %v9658_v59 = vld [vmem:[#allocation25_spill] sm:$0xff] }
 0x39b   : > { %2708 = vst [vmem:[#allocation3 + $0x64] sm:$0xf] %v2630_v56  ;;  %v3079_v46 = vpop.f32.mrf.mxu2  ;;  %v3440_v51 = vpop.f32.mrf.mxu0  ;;  %v2180_v34 = vadd.f32 %v8312_v41, %v1897_v45  ;;  %v1898_v35 = vadd.f32 %v8303_v49, %v9658_v59  ;;  %4698 = vmatpush.bf16.msrb.mxu3 %v6971_v38 }
 0x39c   : > { %v2485_v28 = vmax.f32 %v2453_v39, 0.0  ;;  %v3233_v44 = vadd.f32 %v8422_v15, %v3079_v46 }
 0x39d   : > { %v2181_v52 = vadd.f32 %v8330_v18, %v1898_v35 }
 0x39e   : > { %v2517_v54 = vpack.c.bf16 %v2485_v28, %v2485_v28  ;;  %v8477_v0 = vpop.f32.mrf.mxu3  ;;  %v8479_v42 = vadd.f32 %v3438_v27, %v3233_v44 }
 0x39f   : > { %v2378_v37 = vpop.f32.mrf.mxu1 }
 0x3a0   : > { %v2632_v36 = vrot.slane %v2517_v54, 7  ;;  %v2418_v25 = vadd.f32 %v2378_v37, %v2179_v22 }
 0x3a2   : > { %v2633_v4 = vsel %vm7679_vm4, %v2631_v50, %v2632_v36  ;;  %v2454_v15 = vadd.f32 %v8434_v21, %v2418_v25  ;;  %v8486_v14 = vld [vmem:[#allocation3 + $0x60] sm:$0xff]  ;;  %v2634_v47 = vrot.slane %v2632_v36, 4 }
 0x3a3   : > { %2709 = vst [vmem:[#allocation3 + $0x68] sm:$0xf] %v2633_v4  ;;  %v3081_v13 = vpop.f32.mrf.mxu2  ;;  %3281 = vmatmul.bf16.gmra.mxu3 %v8486_v14  ;;  %v3345_v5 = vrot.slane %v8486_v14, 1  ;;  %v2960_v62 = vshll.u32 %v8486_v14, 16  ;;  %v2964_v30 = vshrl.u32 %v8486_v14, 16  ;;  %v3443_v22 = vpop.f32.mrf.mxu0 }
 0x3a4   : > { %v2486_v10 = vmax.f32 %v2454_v15, 0.0  ;;  %v3235_v24 = vadd.f32 %v8443_v53, %v3081_v13 }
 0x3a5   : > { %v3346_v27 = vsel %vm1682_vm5, %v3343_v57, %v3345_v5  ;;  %v2962_v55 = vrot.slane %v2960_v62, 1  ;;  %v3612_v63 = vrot.slane %v2964_v30, 1  ;;  %v3613_v39 = vrot.slane %v2960_v62, 2 }
 0x3a6   : > { %v2518_v3 = vpack.c.bf16 %v2486_v10, %v2486_v10  ;;  %v8495_v7 = vpop.f32.mrf.mxu3  ;;  %3482 = vmatmul.bf16.gmra.mxu0 %v3346_v27  ;;  %v8497_v56 = vadd.f32 %v3440_v51, %v3235_v24  ;;  %v9659_v10 = vld [vmem:[#allocation26_spill] sm:$0xff] }
 0x3a7   : > { %v2381_v32 = vpop.f32.mrf.mxu1  ;;  %v2963_v53 = vsel %vm1223_vm6, %v2958_v12, %v2962_v55  ;;  %v3614_v41 = vor.u32 %v3613_v39, %v3612_v63  ;;  %v2966_v63 = vor.u32 %v2964_v30, %v2962_v55  ;;  %v9660_v30 = vld [vmem:[#allocation27_spill] sm:$0xff] }
 0x3a8   : > { %v2635_v28 = vrot.slane %v2518_v3, 7  ;;  %v2419_v46 = vadd.f32 %v2381_v32, %v2180_v34  ;;  %3123 = vmatmul.bf16.gmra.mxu2 %v2963_v53  ;;  %v1900_v55 = vadd.f32 %v8342_v16, %v9660_v30 }
 0x3a9   : > { %v8507_v54 = vsel %vm1921_vm8, %v3610_v60, %v3614_v41  ;;  %v1899_v60 = vadd.f32 %v8322_v17, %v9659_v10 }
 0x3aa   : > { %v2636_v57 = vsel %vm7679_vm4, %v2634_v47, %v2635_v28  ;;  %v2455_v44 = vadd.f32 %v8434_v21, %v2419_v46  ;;  %3739 = vmatmul.bf16.gmra.mxu1 %v8340_v9  ;;  %v2637_v51 = vrot.slane %v2635_v28, 4  ;;  %v2183_v16 = vadd.f32 %v8372_v20, %v1900_v55 }
 0x3ab   : > { %2710 = vst [vmem:[#allocation3 + $0x6c] sm:$0xf] %v2636_v57  ;;  %v3084_v50 = vpop.f32.mrf.mxu2  ;;  %v2182_v27 = vadd.f32 %v8347_v31, %v1899_v60  ;;  %v3445_v32 = vpop.f32.mrf.mxu0 }
 0x3ac   : > { %v2487_v37 = vmax.f32 %v2455_v44, 0.0  ;;  %v3238_v36 = vadd.f32 %v8461_v40, %v3084_v50 }
 0x3ae   : > { %v2519_v25 = vpack.c.bf16 %v2487_v37, %v2487_v37  ;;  %v8511_v45 = vpop.f32.mrf.mxu3  ;;  %v8513_v4 = vadd.f32 %v3443_v22, %v3238_v36  ;;  %v6934_v36 = vld [vmem:[#allocation4 + $0x100] sm:$0xff] }
 0x3af   : > { %v2383_v49 = vpop.f32.mrf.mxu1  ;;  %3946 = vmatpush.bf16.msrb.mxu2 %v6934_v36 }
 0x3b0   : > { %v2638_v15 = vrot.slane %v2519_v25, 7  ;;  %v2420_v9 = vadd.f32 %v2383_v49, %v2181_v52 }
 0x3b2   : > { %v2639_v13 = vsel %vm7679_vm4, %v2637_v51, %v2638_v15  ;;  %v2456_v40 = vadd.f32 %v8434_v21, %v2420_v9  ;;  %v8520_v62 = vld [vmem:[#allocation3 + $0x68] sm:$0xff]  ;;  %v2640_v44 = vrot.slane %v2638_v15, 4 }
 0x3b3   : > { %2711 = vst [vmem:[#allocation3 + $0x70] sm:$0xf] %v2639_v13  ;;  %v3086_v24 = vpop.f32.mrf.mxu2  ;;  %3286 = vmatmul.bf16.gmra.mxu3 %v8520_v62  ;;  %v3347_v34 = vrot.slane %v8520_v62, 1  ;;  %v2968_v12 = vshll.u32 %v8520_v62, 16  ;;  %v2972_v3 = vshrl.u32 %v8520_v62, 16 }
 0x3b4   : > { %v2488_v18 = vmax.f32 %v2456_v40, 0.0  ;;  %v3240_v17 = vadd.f32 %v8477_v0, %v3086_v24 }
 0x3b5   : > { %v3348_v47 = vsel %vm1682_vm5, %v3345_v5, %v3347_v34  ;;  %v2970_v28 = vrot.slane %v2968_v12, 1  ;;  %v3616_v46 = vrot.slane %v2972_v3, 1  ;;  %v3617_v57 = vrot.slane %v2968_v12, 2 }
 0x3b6   : > { %v2520_v39 = vpack.c.bf16 %v2488_v18, %v2488_v18  ;;  %v3247_v59 = vpop.f32.mrf.mxu3  ;;  %3487 = vmatmul.bf16.gmra.mxu0 %v3348_v47  ;;  %v8529_v35 = vadd.f32 %v3445_v32, %v3240_v17 }
 0x3b7   : > { %v2386_v53 = vpop.f32.mrf.mxu1  ;;  %v2971_v0 = vsel %vm1223_vm6, %v2966_v63, %v2970_v28  ;;  %v3618_v31 = vor.u32 %v3617_v57, %v3616_v46 }
 0x3b8   : > { %v2641_v22 = vrot.slane %v2520_v39, 7  ;;  %v2421_v37 = vadd.f32 %v2386_v53, %v2182_v27  ;;  %3128 = vmatmul.bf16.gmra.mxu2 %v2971_v0  ;;  %v2974_v27 = vor.u32 %v2972_v3, %v2970_v28 }
 0x3b9   : > { %v8539_v25 = vsel %vm1921_vm8, %v3614_v41, %v3618_v31 }
 0x3ba   : > { %v2642_v5 = vsel %vm7679_vm4, %v2640_v44, %v2641_v22  ;;  %v2457_v50 = vadd.f32 %v8434_v21, %v2421_v37  ;;  %3744 = vmatmul.bf16.gmra.mxu1 %v8370_v43  ;;  %v2643_v10 = vrot.slane %v2641_v22, 4 }
 0x3bb   : > { %2712 = vst [vmem:[#allocation3 + $0x74] sm:$0xf] %v2642_v5  ;;  %v3089_v49 = vpop.f32.mrf.mxu2 }
 0x3bc   : > { %v2489_v52 = vmax.f32 %v2457_v50, 0.0  ;;  %v8542_v51 = vadd.f32 %v8495_v7, %v3089_v49  ;;  %v6970_v50 = vld [vmem:[#allocation7 + $0x68] sm:$0xff] }
 0x3bd   : > { %4699 = vmatpush.bf16.msrb.mxu3 %v6970_v50 }
 0x3be   : > { %v2521_v15 = vpack.c.bf16 %v2489_v52, %v2489_v52  ;;  %v3249_v38 = vpop.f32.mrf.mxu3 }
 0x3bf   : > { %v2388_v9 = vpop.f32.mrf.mxu1 }
 0x3c0   : > { %v2644_v60 = vrot.slane %v2521_v15, 7  ;;  %v2422_v13 = vadd.f32 %v2388_v9, %v2183_v16 }
 0x3c2   : > { %v2645_v43 = vsel %vm7679_vm4, %v2643_v10, %v2644_v60  ;;  %v2458_v41 = vadd.f32 %v8434_v21, %v2422_v13  ;;  %v8548_v40 = vld [vmem:[#allocation3 + $0x70] sm:$0xff]  ;;  %v2646_v57 = vrot.slane %v2644_v60, 4 }
 0x3c3   : > { %2713 = vst [vmem:[#allocation3 + $0x78] sm:$0xf] %v2645_v43  ;;  %v3091_v24 = vpop.f32.mrf.mxu2  ;;  %3291 = vmatmul.bf16.gmra.mxu3 %v8548_v40  ;;  %v3349_v7 = vrot.slane %v8548_v40, 1  ;;  %v2976_v20 = vshll.u32 %v8548_v40, 16  ;;  %v2980_v12 = vshrl.u32 %v8548_v40, 16 }
 0x3c4   : > { %v2490_v18 = vmax.f32 %v2458_v41, 0.0  ;;  %v8555_v17 = vadd.f32 %v8511_v45, %v3091_v24 }
 0x3c5   : > { %v3350_v21 = vsel %vm1682_vm5, %v3347_v34, %v3349_v7  ;;  %v2978_v32 = vrot.slane %v2976_v20, 1  ;;  %v3620_v39 = vrot.slane %v2980_v12, 1  ;;  %v3621_v53 = vrot.slane %v2976_v20, 2 }
 0x3c6   : > { %v2522_v63 = vpack.c.bf16 %v2490_v18, %v2490_v18  ;;  %v3252_v46 = vpop.f32.mrf.mxu3  ;;  %3492 = vmatmul.bf16.gmra.mxu0 %v3350_v21 }
 0x3c7   : > { %v3710_v47 = vpop.f32.mrf.mxu1  ;;  %v2979_v37 = vsel %vm1223_vm6, %v2974_v27, %v2978_v32  ;;  %v3622_v45 = vor.u32 %v3621_v53, %v3620_v39 }
 0x3c8   : > { %v2647_v44 = vrot.slane %v2522_v63, 7  ;;  %v8559_v22 = vadd.f32 %v3710_v47, %v8406_v48  ;;  %3133 = vmatmul.bf16.gmra.mxu2 %v2979_v37 }
 0x3c9   : > { %v8566_v34 = vsel %vm1921_vm8, %v3618_v31, %v3622_v45 }
 0x3ca   : > { %v2648_v3 = vsel %vm7679_vm4, %v2646_v57, %v2647_v44  ;;  %v2649_v28 = vrot.slane %v2647_v44, 4  ;;  %3749 = vmatmul.bf16.gmra.mxu1 %v8400_v6 }
 0x3cb   : > { %2714 = vst [vmem:[#allocation3 + $0x7c] sm:$0xf] %v2648_v3  ;;  %v3094_v0 = vpop.f32.mrf.mxu2 }
 0x3cc   : > { %2715 = vst [vmem:[#allocation3 + $0x80] sm:$0x1] %v2649_v28  ;;  %v8568_v30 = vadd.f32 %v3247_v59, %v3094_v0  ;;  %v3822_v0 = vld [vmem:[#allocation3] sm:$0xc] }
 0x3ce   : > { %v3254_v55 = vpop.f32.mrf.mxu3 }
 0x3cf   : > { %v3712_v48 = vpop.f32.mrf.mxu1 }
 0x3d0   : > { %v8571_v5 = vadd.f32 %v3712_v48, %v8424_v58  ;;  %v2982_v58 = vor.u32 %v2980_v12, %v2978_v32 }
 0x3d2   : > { %v8573_v36 = vld [vmem:[#allocation3 + $0x78] sm:$0xff] }
 0x3d3   : > { %v3096_v52 = vpop.f32.mrf.mxu2  ;;  %3296 = vmatmul.bf16.gmra.mxu3 %v8573_v36  ;;  %v3351_v6 = vrot.slane %v8573_v36, 1  ;;  %v2984_v31 = vshll.u32 %v8573_v36, 16  ;;  %v2988_v49 = vshrl.u32 %v8573_v36, 16  ;;  %v2764_v15 = vld [vmem:[#allocation3 + $0x80] sm:$0x1] }
 0x3d4   : > { %v8579_v59 = vadd.f32 %v3249_v38, %v3096_v52  ;;  %v2846_v24 = vunpack.c.l.b16 %v2764_v15  ;;  %v3840_v52 = vunpack.c.l.b16 %v3822_v0 }
 0x3d5   : > { %v3352_v16 = vsel %vm1682_vm5, %v3349_v7, %v3351_v6  ;;  %v2986_v9 = vrot.slane %v2984_v31, 1  ;;  %v3624_v10 = vrot.slane %v2988_v49, 1  ;;  %v3625_v43 = vrot.slane %v2984_v31, 2  ;;  %v9661_v31 = vld [vmem:[#allocation30_spill] sm:$0xff] }
 0x3d6   : > { %v3257_v13 = vpop.f32.mrf.mxu3  ;;  %3497 = vmatmul.bf16.gmra.mxu0 %v3352_v16  ;;  %v2863_v12 = vpack.c.b16 %v2846_v24, %v2846_v24  ;;  %v7103_v16 = vld [vmem:[#allocation3 + $0x8] sm:$0xff] }
 0x3d7   : > { %v3715_v60 = vpop.f32.mrf.mxu1  ;;  %v2987_v18 = vsel %vm1223_vm6, %v2982_v58, %v2986_v9  ;;  %v8586_v20 = vor.u32 %v3625_v43, %v3624_v10  ;;  %v2990_v44 = vor.u32 %v2988_v49, %v2986_v9  ;;  %v9662_v49 = vunpack.c.h.b16 %v9661_v31  ;;  %v7106_v31 = vld [vmem:[#allocation3 + $0x20] sm:$0xff] }
 0x3d8   : > { %v8583_v41 = vadd.f32 %v3715_v60, %v8445_v11  ;;  %3138 = vmatmul.bf16.gmra.mxu2 %v2987_v18  ;;  %v2992_v32 = vshll.u32 %v2863_v12, 16  ;;  %v3353_v39 = vrot.slane %v2863_v12, 1  ;;  %v3843_v58 = vrot.slane %v7103_v16, 2  ;;  %v8639_v16 = vpop.f32.mrf.mxu0 }
 0x3d9   : > { %v8591_v38 = vsel %vm1921_vm8, %v3622_v45, %v8586_v20 }
 0x3da   : > { %3754 = vmatmul.bf16.gmra.mxu1 %v8439_v2  ;;  %v2994_v53 = vrot.slane %v2992_v32, 1  ;;  %v3354_v2 = vsel %vm1682_vm5, %v3351_v6, %v3353_v39  ;;  %v6969_v6 = vld [vmem:[#allocation7 + $0x60] sm:$0xff] }
 0x3db   : > { %v3099_v7 = vpop.f32.mrf.mxu2  ;;  %4700 = vmatpush.bf16.msrb.mxu3 %v6969_v6 }
 0x3dc   : > { %v8593_v27 = vadd.f32 %v3252_v46, %v3099_v7  ;;  %v2995_v3 = vsel %vm1223_vm6, %v2990_v44, %v2994_v53  ;;  %v6968_v44 = vld [vmem:[#allocation7 + $0x58] sm:$0xff] }
 0x3de   : > { %v3259_v21 = vpop.f32.mrf.mxu3 }
 0x3df   : > { %v3717_v63 = vpop.f32.mrf.mxu1  ;;  %4701 = vmatpush.bf16.msrb.mxu3 %v6968_v44 }
 0x3e0   : > { %v8596_v11 = vadd.f32 %v3717_v63, %v8463_v23 }
 0x3e3   : > { %v3101_v47 = vpop.f32.mrf.mxu2 }
 0x3e4   : > { %v8598_v57 = vadd.f32 %v3254_v55, %v3101_v47 }
 0x3e6   : > { %v3262_v45 = vpop.f32.mrf.mxu3  ;;  %3502 = vmatmul.bf16.gmra.mxu0 %v3354_v2 }
 0x3e7   : > { %v3720_v37 = vpop.f32.mrf.mxu1 }
 0x3e8   : > { %v8602_v46 = vadd.f32 %v3720_v37, %v8479_v42  ;;  %3143 = vmatmul.bf16.gmra.mxu2 %v2995_v3  ;;  %v3841_v42 = vpack.c.b16 %v9662_v49, %v3840_v52  ;;  %v3849_v49 = vrot.slane %v7106_v31, 2 }
 0x3ea   : > { %3759 = vmatmul.bf16.gmra.mxu1 %v8473_v29  ;;  %v3842_v29 = vrot.slane %v3841_v42, 2 }
 0x3eb   : > { %v3104_v23 = vpop.f32.mrf.mxu2 }
 0x3ec   : > { %v8606_v28 = vadd.f32 %v3257_v13, %v3104_v23 }
 0x3ee   : > { %v3264_v55 = vpop.f32.mrf.mxu3 }
 0x3ef   : > { %v3722_v48 = vpop.f32.mrf.mxu1 }
 0x3f0   : > { %v8609_v50 = vadd.f32 %v3722_v48, %v8497_v56  ;;  %v3844_v56 = vsel %vm2204_vm7, %v3842_v29, %v3843_v58 }
 0x3f3   : > { %v3106_v15 = vpop.f32.mrf.mxu2 }
 0x3f4   : > { %v8613_v9 = vadd.f32 %v3259_v21, %v3106_v15  ;;  %v7104_v21 = vld [vmem:[#allocation3 + $0x10] sm:$0xff] }
 0x3f5   : > { %v3845_v32 = vrot.slane %v7104_v21, 2 }
 0x3f6   : > { %v3267_v60 = vpop.f32.mrf.mxu3 }
 0x3f7   : > { %v3725_v10 = vpop.f32.mrf.mxu1  ;;  %v3846_v47 = vsel %vm2204_vm7, %v3843_v58, %v3845_v32 }
 0x3f8   : > { %v8616_v13 = vadd.f32 %v3725_v10, %v8513_v4  ;;  %3947 = vmatmul.bf16.vlgmr.msrb.gmra.mxu2 %v3844_v56 }
 0x3fa   : > { %3764 = vmatmul.bf16.gmra.mxu1 %v8507_v54 }
 0x3fb   : > { %v3109_v43 = vpop.f32.mrf.mxu2 }
 0x3fc   : > { %v8620_v18 = vadd.f32 %v3262_v45, %v3109_v43 }
 0x3fe   : > { %v3269_v7 = vpop.f32.mrf.mxu3 }
 0x3ff   : > { %v3727_v24 = vpop.f32.mrf.mxu1 }
 0x400   : > { %v8623_v12 = vadd.f32 %v3727_v24, %v8529_v35  ;;  %v7105_v35 = vld [vmem:[#allocation3 + $0x18] sm:$0xff] }
 0x401   : > { %v3847_v45 = vrot.slane %v7105_v35, 2  ;;  %v6967_v24 = vld [vmem:[#allocation7 + $0x50] sm:$0xff]  ;;  %v6964_v35 = vld [vmem:[#allocation7 + $0x38] sm:$0xff] }
 0x402   : > { %4702 = vmatpush.bf16.msrb.mxu3 %v6967_v24  ;;  %4850 = vmatpush.bf16.msrb.mxu0 %v6964_v35 }
 0x403   : > { %v3111_v63 = vpop.f32.mrf.mxu2  ;;  %v3848_v23 = vsel %vm2204_vm7, %v3845_v32, %v3847_v45  ;;  %v3850_v58 = vsel %vm2204_vm7, %v3847_v45, %v3849_v49 }
 0x404   : > { %v8625_v39 = vadd.f32 %v3264_v55, %v3111_v63 }
 0x406   : > { %v3272_v4 = vpop.f32.mrf.mxu3 }
 0x408   : > { %3952 = vmatmul.bf16.gmra.mxu2 %v3846_v47 }
 0x40a   : > { %3769 = vmatmul.bf16.gmra.mxu1 %v8539_v25  ;;  %v3540_v25 = vld [vmem:[#allocation3 + $0x80] sm:$0x3] }
 0x40b   : > { %v3114_v54 = vpop.f32.mrf.mxu2  ;;  %v3558_v15 = vunpack.c.l.b16 %v3540_v25 }
 0x40c   : > { %v8629_v53 = vadd.f32 %v3267_v60, %v3114_v54 }
 0x40d   : > { %v8642_v29 = vpack.c.b16 %v3558_v15, %v3558_v15 }
 0x40e   : > { %9663 = vst [vmem:[#allocation29_spill] sm:$0xff] %v8629_v53  ;;  %v3274_v2 = vpop.f32.mrf.mxu3 }
 0x40f   : > { %v3629_v60 = vshrl.u32 %v8642_v29, 16  ;;  %v3632_v56 = vshll.u32 %v8642_v29, 16 }
 0x411   : > { %v3631_v63 = vrot.slane %v3629_v60, 1  ;;  %v3634_v21 = vrot.slane %v3632_v56, 2 }
 0x413   : > { %v3116_v37 = vpop.f32.mrf.mxu2 }
 0x414   : > { %v8631_v3 = vadd.f32 %v3269_v7, %v3116_v37  ;;  %v8649_v7 = vpop.f32.mrf.mxu0 }
 0x416   : > { %9664 = vst [vmem:[#allocation14_spill] sm:$0xff] %v8631_v3  ;;  %v3277_v0 = vpop.f32.mrf.mxu3 }
 0x418   : > { %3957 = vmatmul.bf16.gmra.mxu2 %v3848_v23  ;;  %v8658_v23 = vpop.f32.mrf.mxu1 }
 0x41a   : > { %3774 = vmatmul.bf16.gmra.mxu1 %v8566_v34 }
 0x41b   : > { %v3119_v48 = vpop.f32.mrf.mxu2 }
 0x41c   : > { %v8635_v55 = vadd.f32 %v3272_v4, %v3119_v48  ;;  %v7107_v4 = vld [vmem:[#allocation3 + $0x28] sm:$0xff]  ;;  %v8656_v45 = vpop.f32.mrf.mxu0 }
 0x41d   : > { %v3851_v47 = vrot.slane %v7107_v4, 2 }
 0x41e   : > { %9665 = vst [vmem:[#allocation28_spill] sm:$0xff] %v8635_v55  ;;  %v3279_v52 = vpop.f32.mrf.mxu3 }
 0x41f   : > { %v3852_v44 = vsel %vm2204_vm7, %v3849_v49, %v3851_v47 }
 0x420   : > { %v8664_v49 = vpop.f32.mrf.mxu1 }
 0x423   : > { %v3121_v6 = vpop.f32.mrf.mxu2 }
 0x424   : > { %v8637_v42 = vadd.f32 %v3274_v2, %v3121_v6  ;;  %v7108_v6 = vld [vmem:[#allocation3 + $0x30] sm:$0xff]  ;;  %v8662_v15 = vpop.f32.mrf.mxu0 }
 0x425   : > { %v3853_v31 = vrot.slane %v7108_v6, 2 }
 0x426   : > { %9666 = vst [vmem:[#allocation32_spill] sm:$0xff] %v8637_v42  ;;  %v3282_v43 = vpop.f32.mrf.mxu3 }
 0x428   : > { %3962 = vmatmul.bf16.gmra.mxu2 %v3850_v58  ;;  %v3854_v58 = vsel %vm2204_vm7, %v3851_v47, %v3853_v31 }
 0x42a   : > { %3779 = vmatmul.bf16.gmra.mxu1 %v8591_v38  ;;  %v3635_v38 = vor.u32 %v3634_v21, %v3631_v63  ;;  %v6966_v63 = vld [vmem:[#allocation7 + $0x48] sm:$0xff] }
 0x42b   : > { %v3124_v34 = vpop.f32.mrf.mxu2  ;;  %4703 = vmatpush.bf16.msrb.mxu3 %v6966_v63 }
 0x42c   : > { %v8645_v10 = vadd.f32 %v3277_v0, %v3124_v34  ;;  %v3636_v37 = vsel %vm1921_vm8, %v8586_v20, %v3635_v38  ;;  %v8671_v24 = vpop.f32.mrf.mxu0 }
 0x42e   : > { %9667 = vst [vmem:[#allocation15_spill] sm:$0xff] %v8645_v10  ;;  %v3284_v2 = vpop.f32.mrf.mxu3 }
 0x433   : > { %v3126_v32 = vpop.f32.mrf.mxu2 }
 0x434   : > { %v8651_v54 = vadd.f32 %v3279_v52, %v3126_v32  ;;  %v3855_v32 = vrot.slane %v8320_v61, 2  ;;  %v8679_v47 = vpop.f32.mrf.mxu0 }
 0x436   : > { %9668 = vst [vmem:[#allocation31_spill] sm:$0xff] %v8651_v54  ;;  %v3287_v25 = vpop.f32.mrf.mxu3 }
 0x438   : > { %3967 = vmatmul.bf16.gmra.mxu2 %v3852_v44 }
 0x43a   : > { %3784 = vmatmul.bf16.gmra.mxu1 %v3636_v37  ;;  %v6963_v37 = vld [vmem:[#allocation7 + $0x30] sm:$0xff] }
 0x43b   : > { %v3129_v0 = vpop.f32.mrf.mxu2  ;;  %4851 = vmatpush.bf16.msrb.mxu0 %v6963_v37 }
 0x43c   : > { %v8660_v48 = vadd.f32 %v3282_v43, %v3129_v0  ;;  %v8673_v43 = vpop.f32.mrf.mxu1 }
 0x43e   : > { %9669 = vst [vmem:[#allocation34_spill] sm:$0xff] %v8660_v48  ;;  %v3289_v34 = vpop.f32.mrf.mxu3 }
 0x443   : > { %v3131_v52 = vpop.f32.mrf.mxu2 }
 0x444   : > { %v8666_v20 = vadd.f32 %v3284_v2, %v3131_v52  ;;  %v3856_v2 = vsel %vm2204_vm7, %v3853_v31, %v3855_v32  ;;  %v8681_v44 = vpop.f32.mrf.mxu1  ;;  %v8685_v52 = vpop.f32.mrf.mxu0  ;;  %v6962_v31 = vld [vmem:[#allocation7 + $0x28] sm:$0xff] }
 0x445   : > { %4852 = vmatpush.bf16.msrb.mxu0 %v6962_v31 }
 0x446   : > { %9670 = vst [vmem:[#allocation16_spill] sm:$0xff] %v8666_v20  ;;  %v3292_v38 = vpop.f32.mrf.mxu3 }
 0x448   : > { %3972 = vmatmul.bf16.gmra.mxu2 %v3854_v58  ;;  %v3857_v58 = vrot.slane %v8352_v8, 2 }
 0x44b   : > { %v3134_v60 = vpop.f32.mrf.mxu2 }
 0x44c   : > { %v8669_v56 = vadd.f32 %v3287_v25, %v3134_v60  ;;  %v8687_v6 = vpop.f32.mrf.mxu1  ;;  %v3858_v60 = vsel %vm2204_vm7, %v3855_v32, %v3857_v58 }
 0x44e   : > { %9671 = vst [vmem:[#allocation33_spill] sm:$0xff] %v8669_v56  ;;  %v3294_v25 = vpop.f32.mrf.mxu3  ;;  %v6980_v56 = vld [vmem:[#allocation7 + $0xb8] sm:$0xff] }
 0x44f   : > { %5056 = vmatpush.bf16.msra.mxu1 %v6980_v56 }
 0x453   : > { %v3136_v21 = vpop.f32.mrf.mxu2 }
 0x454   : > { %v8676_v4 = vadd.f32 %v3289_v34, %v3136_v21 }
 0x456   : > { %9672 = vst [vmem:[#allocation17_spill] sm:$0xff] %v8676_v4  ;;  %v3297_v63 = vpop.f32.mrf.mxu3 }
 0x458   : > { %3977 = vmatmul.bf16.gmra.mxu2 %v3856_v2  ;;  %v8693_v2 = vpop.f32.mrf.mxu0 }
 0x45b   : > { %v3139_v35 = vpop.f32.mrf.mxu2 }
 0x45c   : > { %v8683_v0 = vadd.f32 %v3292_v38, %v3139_v35  ;;  %v8695_v38 = vpop.f32.mrf.mxu1  ;;  %v6961_v35 = vld [vmem:[#allocation7 + $0x20] sm:$0xff] }
 0x45d   : > { %4853 = vmatpush.bf16.msrb.mxu0 %v6961_v35  ;;  %v6979_v35 = vld [vmem:[#allocation7 + $0xb0] sm:$0xff] }
 0x45e   : > { %9673 = vst [vmem:[#allocation18_spill] sm:$0xff] %v8683_v0  ;;  %v6960_v0 = vld [vmem:[#allocation7 + $0x18] sm:$0xff]  ;;  %v3299_v4 = vpop.f32.mrf.mxu3  ;;  %5057 = vmatpush.bf16.msra.mxu1 %v6979_v35 }
 0x460   : > { %v8702_v32 = vpop.f32.mrf.mxu0 }
 0x461   : > { %4854 = vmatpush.bf16.msrb.mxu0 %v6960_v0 }
 0x463   : > { %v3141_v61 = vpop.f32.mrf.mxu2 }
 0x464   : > { %v8690_v34 = vadd.f32 %v3294_v25, %v3141_v61  ;;  %v3859_v25 = vrot.slane %v8382_v33, 2  ;;  %v8704_v31 = vpop.f32.mrf.mxu1  ;;  %v8710_v33 = vld [vmem:[%s9606_s5] ss:$0 sm:$0xff] }
 0x466   : > { %9674 = vst [vmem:[#allocation19_spill] sm:$0xff] %v8690_v34  ;;  %v6959_v34 = vld [vmem:[#allocation7 + $0x10] sm:$0xff] }
 0x467   : > { %4855 = vmatpush.bf16.msrb.mxu0 %v6959_v34 }
 0x468   : > { %3982 = vmatmul.bf16.gmra.mxu2 %v3858_v60  ;;  %v3860_v60 = vsel %vm2204_vm7, %v3857_v58, %v3859_v25 }
 0x46b   : > { %v3144_v21 = vpop.f32.mrf.mxu2 }
 0x46c   : > { %v8697_v37 = vadd.f32 %v3297_v63, %v3144_v21  ;;  %v6965_v63 = vld [vmem:[#allocation7 + $0x40] sm:$0xff]  ;;  %v6958_v21 = vld [vmem:[#allocation7 + $0x8] sm:$0xff]  ;;  %v8716_v56 = vpop.f32.mrf.mxu1 }
 0x46d   : > { %4704 = vmatpush.bf16.msrb.mxu3 %v6965_v63  ;;  %4856 = vmatpush.bf16.msrb.mxu0 %v6958_v21  ;;  %v3861_v63 = vrot.slane %v8413_v19, 2 }
 0x46e   : > { %9675 = vst [vmem:[#allocation20_spill] sm:$0xff] %v8697_v37  ;;  %v6977_v37 = vld [vmem:[#allocation7 + $0xa0] sm:$0xff] }
 0x46f   : > { %v3862_v35 = vsel %vm2204_vm7, %v3859_v25, %v3861_v63  ;;  %v6974_v25 = vld [vmem:[#allocation7 + $0x88] sm:$0xff] }
 0x473   : > { %v3146_v8 = vpop.f32.mrf.mxu2 }
 0x474   : > { %v8700_v61 = vadd.f32 %v3299_v4, %v3146_v8  ;;  %v6957_v8 = vld [vmem:[#allocation7] sm:$0xff] }
 0x475   : > { %4857 = vmatpush.bf16.msrb.mxu0 %v6957_v8  ;;  %v8724_v8 = vpop.f32.mrf.mxu1 }
 0x476   : > { %9676 = vst [vmem:[#allocation21_spill] sm:$0xff] %v8700_v61  ;;  %v6978_v61 = vld [vmem:[#allocation7 + $0xa8] sm:$0xff] }
 0x477   : > { %5058 = vmatpush.bf16.msra.mxu1 %v6978_v61 }
 0x478   : > { %3987 = vmatmul.bf16.gmra.mxu2 %v3860_v60  ;;  %v8714_v60 = vpop.f32.mrf.mxu0 }
 0x47b   : > { %v3948_v4 = vpop.f32.mrf.mxu2  ;;  %5059 = vmatpush.bf16.msra.mxu1 %v6977_v37 }
 0x47c   : > { %v4028_v0 = vadd.f32 %v3948_v4, %v8559_v22  ;;  %v6976_v4 = vld [vmem:[#allocation7 + $0x98] sm:$0xff] }
 0x47e   : > { %v4064_v58 = vadd.f32 %v8710_v33, %v4028_v0 }
 0x47f   : > { %5060 = vmatpush.bf16.msra.mxu1 %v6976_v4 }
 0x480   : > { %v4096_v34 = vmax.f32 %v4064_v58, 0.0  ;;  %v6975_v58 = vld [vmem:[#allocation7 + $0x90] sm:$0xff]  ;;  %v8722_v61 = vpop.f32.mrf.mxu0 }
 0x481   : > { %9677 = vst [vmem:[#allocation22_spill] sm:$0xff] %v8722_v61 }
 0x482   : > { %v4128_v20 = vpack.c.bf16 %v4096_v34, %v4096_v34 }
 0x483   : > { %v3950_v48 = vpop.f32.mrf.mxu2  ;;  %5061 = vmatpush.bf16.msra.mxu1 %v6975_v58 }
 0x484   : > { %v4192_v54 = vrot.slane %v4128_v20, 7  ;;  %v4029_v22 = vadd.f32 %v3950_v48, %v8571_v5 }
 0x486   : > { %4320 = vst [vmem:[#allocation3] sm:$0xe] %v4192_v54  ;;  %v4065_v21 = vadd.f32 %v8710_v33, %v4029_v22  ;;  %v4193_v20 = vrot.slane %v4192_v54, 4  ;;  %v8733_v54 = vpop.f32.mrf.mxu1 }
 0x487   : > { %5062 = vmatpush.bf16.msra.mxu1 %v6974_v25 }
 0x488   : > { %v4097_v0 = vmax.f32 %v4065_v21, 0.0  ;;  %3992 = vmatmul.bf16.gmra.mxu2 %v3862_v35  ;;  %v6973_v21 = vld [vmem:[#allocation7 + $0x80] sm:$0xff]  ;;  %v8731_v42 = vpop.f32.mrf.mxu0 }
 0x489   : > { %9678 = vst [vmem:[#allocation23_spill] sm:$0xff] %v8731_v42 }
 0x48a   : > { %v4129_v34 = vpack.c.bf16 %v4097_v0, %v4097_v0  ;;  %v3863_v0 = vrot.slane %v8452_v1, 2  ;;  %v6988_v1 = vld [vmem:[#allocation7 + $0xf8] sm:$0xff] }
 0x48b   : > { %v3953_v19 = vpop.f32.mrf.mxu2  ;;  %5063 = vmatpush.bf16.msra.mxu1 %v6973_v21  ;;  %5338 = vmatpush.bf16.msra.mxu2 %v6988_v1 }
 0x48c   : > { %v4194_v10 = vrot.slane %v4129_v34, 7  ;;  %v4030_v5 = vadd.f32 %v3953_v19, %v8583_v41 }
 0x48e   : > { %v4195_v48 = vsel %vm7679_vm4, %v4193_v20, %v4194_v10  ;;  %v4066_v37 = vadd.f32 %v8710_v33, %v4030_v5  ;;  %v4196_v41 = vrot.slane %v4194_v10, 4 }
 0x48f   : > { %4321 = vst [vmem:[#allocation3 + $0x4] sm:$0xf] %v4195_v48  ;;  %v3864_v48 = vsel %vm2204_vm7, %v3861_v63, %v3863_v0 }
 0x490   : > { %v4098_v22 = vmax.f32 %v4066_v37, 0.0  ;;  %v6996_v37 = vld [vmem:[#allocation7 + $0x138] sm:$0xff] }
 0x491   : > { %5576 = vmatpush.bf16.msra.mxu3 %v6996_v37 }
 0x492   : > { %v4130_v35 = vpack.c.bf16 %v4098_v22, %v4098_v22 }
 0x493   : > { %v3955_v4 = vpop.f32.mrf.mxu2 }
 0x494   : > { %v4197_v58 = vrot.slane %v4130_v35, 7  ;;  %v4031_v34 = vadd.f32 %v3955_v4, %v8596_v11  ;;  %v4939_v35 = vld [vmem:[#allocation3] sm:$0xe] }
 0x495   : > { %v4957_v1 = vunpack.c.l.b16 %v4939_v35 }
 0x496   : > { %v4198_v19 = vsel %vm7679_vm4, %v4196_v41, %v4197_v58  ;;  %v4067_v20 = vadd.f32 %v8710_v33, %v4031_v34  ;;  %v7015_v5 = vld [vmem:[#allocation3] sm:$0xff]   ;;  %v4199_v11 = vrot.slane %v4197_v58, 4  ;;  %v8741_v34 = vpop.f32.mrf.mxu0 }
 0x497   : > { %4322 = vst [vmem:[#allocation3 + $0x8] sm:$0xf] %v4198_v19  ;;  %4858 = vmatmul.bf16.vlgmr.msrb.gmra.mxu0 %v7015_v5  ;;  %v7017_v41 = vunpack.c.h.b16 %v7015_v5  ;;  %v8743_v19 = vpop.f32.mrf.mxu1  ;;  %v4502_v61 = vshrl.u32 %v7015_v5, 16 }
 0x498   : > { %v4099_v25 = vmax.f32 %v4067_v20, 0.0  ;;  %3997 = vmatmul.bf16.gmra.mxu2 %v3864_v48  ;;  %9679 = vst [vmem:[#allocation24_spill] sm:$0xff] %v8741_v34  ;;  %v4504_v48 = vshll.u32 %v7015_v5, 16 }
 0x499   : > { %9680 = vst [vmem:[#allocation25_spill] sm:$0xff] %v8743_v19  ;;  %v4958_v58 = vpack.c.b16 %v7017_v41, %v4957_v1 }
 0x49a   : > { %v4131_v10 = vpack.c.bf16 %v4099_v25, %v4099_v25  ;;  %v5459_v25 = vld [vmem:[#allocation3] sm:$0xc]  ;;  %v4506_v55 = vrot.slane %v4504_v48, 1 }
 0x49b   : > { %v3958_v22 = vpop.f32.mrf.mxu2  ;;  %v5201_v53 = vshll.u32 %v4958_v58, 16 }
 0x49c   : > { %v4200_v21 = vrot.slane %v4131_v10, 7  ;;  %v4032_v4 = vadd.f32 %v3958_v22, %v8602_v46  ;;  %v3865_v46 = vrot.slane %v8486_v14, 2  ;;  %v5477_v22 = vunpack.c.l.b16 %v5459_v25 }
 0x49d   : > { %v4959_v14 = vrot.slane %v4958_v58, 1  ;;  %v4507_v1 = vor.u32 %v4506_v55, %v4502_v61 }
 0x49e   : > { %v4201_v63 = vsel %vm7679_vm4, %v4199_v11, %v4200_v21  ;;  %v4068_v20 = vadd.f32 %v8710_v33, %v4032_v4  ;;  %v4202_v34 = vrot.slane %v4200_v21, 4  ;;  %v5198_v11 = vshrl.u32 %v4958_v58, 16  ;;  %v8756_v21 = vpop.f32.mrf.mxu0 }
 0x49f   : > { %4323 = vst [vmem:[#allocation3 + $0xc] sm:$0xf] %v4201_v63  ;;  %v5478_v4 = vpack.c.b16 %v7017_v41, %v5477_v22  ;;  %v3866_v48 = vsel %vm2204_vm7, %v3863_v0, %v3865_v46 }
 0x4a0   : > { %v4100_v37 = vmax.f32 %v4068_v20, 0.0  ;;  %9681 = vst [vmem:[#allocation26_spill] sm:$0xff] %v8756_v21 }
 0x4a1   : > { %v5479_v25 = vrot.slane %v5478_v4, 2 }
 0x4a2   : > { %v4132_v10 = vpack.c.bf16 %v4100_v37, %v4100_v37  ;;  %v8758_v37 = vpop.f32.mrf.mxu1 }
 0x4a3   : > { %v3960_v42 = vpop.f32.mrf.mxu2  ;;  %9682 = vst [vmem:[#allocation27_spill] sm:$0xff] %v8758_v37 }
 0x4a4   : > { %v4203_v3 = vrot.slane %v4132_v10, 7  ;;  %v4033_v19 = vadd.f32 %v3960_v42, %v8609_v50 }
 0x4a6   : > { %v4204_v35 = vsel %vm7679_vm4, %v4202_v34, %v4203_v3  ;;  %v4069_v63 = vadd.f32 %v8710_v33, %v4033_v19  ;;  %v8753_v20 = vld [vmem:[#allocation3 + $0x8] sm:$0xff]  ;;  %v5200_v34 = vrot.slane %v5198_v11, 1  ;;  %v5203_v19 = vrot.slane %v5201_v53, 2 }
 0x4a7   : > { %4324 = vst [vmem:[#allocation3 + $0x10] sm:$0xf] %v4204_v35  ;;  %4863 = vmatmul.bf16.gmra.mxu0 %v8753_v20  ;;  %v4960_v42 = vrot.slane %v8753_v20, 1  ;;  %v4509_v5 = vshll.u32 %v8753_v20, 16  ;;  %v4513_v41 = vshrl.u32 %v8753_v20, 16  ;;  %v5480_v0 = vrot.slane %v8753_v20, 2 }
 0x4a8   : > { %v4101_v50 = vmax.f32 %v4069_v63, 0.0  ;;  %4002 = vmatmul.bf16.gmra.mxu2 %v3866_v48  ;;  %v4205_v48 = vrot.slane %v4203_v3, 4  ;;  %v5204_v11 = vor.u32 %v5203_v19, %v5200_v34 }
 0x4a9   : > { %v4961_v61 = vsel %vm1682_vm5, %v4959_v14, %v4960_v42  ;;  %v4511_v58 = vrot.slane %v4509_v5, 1  ;;  %v5205_v10 = vrot.slane %v4513_v41, 1  ;;  %v5206_v35 = vrot.slane %v4509_v5, 2 }
 0x4aa   : > { %v4133_v55 = vpack.c.bf16 %v4101_v50, %v4101_v50  ;;  %5064 = vmatmul.bf16.vlgmr.msra.gmra.mxu1 %v4961_v61  ;;  %v8767_v63 = vsel %vm2204_vm7, %v5479_v25, %v5480_v0  ;;  %v8777_v25 = vpop.f32.mrf.mxu0  ;;  %v8779_v3 = vpop.f32.mrf.mxu1 }
 0x4ab   : > { %v3963_v22 = vpop.f32.mrf.mxu2  ;;  %v4512_v53 = vsel %vm1223_vm6, %v4507_v1, %v4511_v58  ;;  %v5207_v4 = vor.u32 %v5206_v35, %v5205_v10  ;;  %v3867_v1 = vrot.slane %v8520_v62, 2  ;;  %v3516_v35 = vadd.f32 %v8639_v16, %v8542_v51 }
 0x4ac   : > { %v4206_v21 = vrot.slane %v4133_v55, 7  ;;  %v4034_v37 = vadd.f32 %v3963_v22, %v8616_v13  ;;  %4705 = vmatmul.bf16.vlgmr.msrb.gmra.mxu3 %v4512_v53  ;;  %v6987_v53 = vld [vmem:[#allocation7 + $0xf0] sm:$0xff] }
 0x4ad   : > { %v8775_v50 = vsel %vm1921_vm8, %v5204_v11, %v5207_v4  ;;  %v6995_v11 = vld [vmem:[#allocation7 + $0x130] sm:$0xff]  ;;  %5339 = vmatpush.bf16.msra.mxu2 %v6987_v53 }
 0x4ae   : > { %v4207_v20 = vsel %vm7679_vm4, %v4205_v48, %v4206_v21  ;;  %v4070_v14 = vadd.f32 %v8710_v33, %v4034_v37  ;;  %v4208_v34 = vrot.slane %v4206_v21, 4  ;;  %v3868_v48 = vsel %vm2204_vm7, %v3865_v46, %v3867_v1  ;;  %5577 = vmatpush.bf16.msra.mxu3 %v6995_v11 }
 0x4af   : > { %4325 = vst [vmem:[#allocation3 + $0x14] sm:$0xf] %v4207_v20  ;;  %v3517_v11 = vadd.f32 %v8649_v7, %v8555_v17  ;;  %v3518_v7 = vadd.f32 %v8656_v45, %v8568_v30 }
 0x4b0   : > { %v4102_v5 = vmax.f32 %v4070_v14, 0.0  ;;  %v3798_v14 = vadd.f32 %v8658_v23, %v3516_v35 }
 0x4b2   : > { %v4134_v13 = vpack.c.bf16 %v4102_v5, %v4102_v5  ;;  %v4515_v5 = vor.u32 %v4513_v41, %v4511_v58 }
 0x4b3   : > { %v3965_v55 = vpop.f32.mrf.mxu2 }
 0x4b4   : > { %v4209_v19 = vrot.slane %v4134_v13, 7  ;;  %v4035_v61 = vadd.f32 %v3965_v55, %v8623_v12 }
 0x4b6   : > { %v4210_v37 = vsel %vm7679_vm4, %v4208_v34, %v4209_v19  ;;  %v4071_v10 = vadd.f32 %v8710_v33, %v4035_v61  ;;  %v8786_v22 = vld [vmem:[#allocation3 + $0x10] sm:$0xff]  ;;  %v4211_v23 = vrot.slane %v4209_v19, 4  ;;  %v3799_v19 = vadd.f32 %v8664_v49, %v3517_v11 }
 0x4b7   : > { %4326 = vst [vmem:[#allocation3 + $0x18] sm:$0xf] %v4210_v37  ;;  %4868 = vmatmul.bf16.gmra.mxu0 %v8786_v22  ;;  %v4962_v12 = vrot.slane %v8786_v22, 1  ;;  %v4517_v21 = vshll.u32 %v8786_v22, 16  ;;  %v4521_v20 = vshrl.u32 %v8786_v22, 16  ;;  %v5482_v51 = vrot.slane %v8786_v22, 2 }
 0x4b8   : > { %v4103_v62 = vmax.f32 %v4071_v10, 0.0  ;;  %4007 = vmatmul.bf16.gmra.mxu2 %v3868_v48  ;;  %v8801_v10 = vpop.f32.mrf.mxu0  ;;  %v8803_v48 = vpop.f32.mrf.mxu1  ;;  %v6986_v49 = vld [vmem:[#allocation7 + $0xe8] sm:$0xff] }
 0x4b9   : > { %v4963_v46 = vsel %vm1682_vm5, %v4960_v42, %v4962_v12  ;;  %v4519_v13 = vrot.slane %v4517_v21, 1  ;;  %v5209_v55 = vrot.slane %v4521_v20, 1  ;;  %v5210_v61 = vrot.slane %v4517_v21, 2  ;;  %5340 = vmatpush.bf16.msra.mxu2 %v6986_v49 }
 0x4ba   : > { %v4135_v16 = vpack.c.bf16 %v4103_v62, %v4103_v62  ;;  %5069 = vmatmul.bf16.gmra.mxu1 %v4963_v46  ;;  %v8799_v37 = vsel %vm2204_vm7, %v5480_v0, %v5482_v51 }
 0x4bb   : > { %v3968_v34 = vpop.f32.mrf.mxu2  ;;  %v4520_v22 = vsel %vm1223_vm6, %v4515_v5, %v4519_v13  ;;  %v5211_v35 = vor.u32 %v5210_v61, %v5209_v55  ;;  %v3869_v5 = vrot.slane %v8548_v40, 2  ;;  %v4523_v11 = vor.u32 %v4521_v20, %v4519_v13 }
 0x4bc   : > { %v4212_v41 = vrot.slane %v4135_v16, 7  ;;  %v4036_v58 = vadd.f32 %v3968_v34, %v3798_v14  ;;  %4710 = vmatmul.bf16.gmra.mxu3 %v4520_v22 }
 0x4bd   : > { %v8810_v0 = vsel %vm1921_vm8, %v5207_v4, %v5211_v35  ;;  %v3870_v40 = vsel %vm2204_vm7, %v3867_v1, %v3869_v5 }
 0x4be   : > { %v4213_v42 = vsel %vm7679_vm4, %v4211_v23, %v4212_v41  ;;  %v4072_v53 = vadd.f32 %v8710_v33, %v4036_v58  ;;  %v4214_v16 = vrot.slane %v4212_v41, 4 }
 0x4bf   : > { %4327 = vst [vmem:[#allocation3 + $0x1c] sm:$0xf] %v4213_v42 }
 0x4c0   : > { %v4104_v62 = vmax.f32 %v4072_v53, 0.0  ;;  %v8816_v34 = vpop.f32.mrf.mxu0  ;;  %v8818_v61 = vpop.f32.mrf.mxu1  ;;  %v3800_v53 = vadd.f32 %v8673_v43, %v3518_v7  ;;  %v6985_v7 = vld [vmem:[#allocation7 + $0xe0] sm:$0xff] }
 0x4c1   : > { %5341 = vmatpush.bf16.msra.mxu2 %v6985_v7 }
 0x4c2   : > { %v4136_v21 = vpack.c.bf16 %v4104_v62, %v4104_v62 }
 0x4c3   : > { %v3970_v14 = vpop.f32.mrf.mxu2 }
 0x4c4   : > { %v4215_v46 = vrot.slane %v4136_v21, 7  ;;  %v4037_v55 = vadd.f32 %v3970_v14, %v3799_v19 }
 0x4c6   : > { %v4216_v4 = vsel %vm7679_vm4, %v4214_v16, %v4215_v46  ;;  %v4073_v23 = vadd.f32 %v8710_v33, %v4037_v55  ;;  %v8823_v17 = vld [vmem:[#allocation3 + $0x18] sm:$0xff]  ;;  %v4217_v43 = vrot.slane %v4215_v46, 4 }
 0x4c7   : > { %4328 = vst [vmem:[#allocation3 + $0x20] sm:$0xf] %v4216_v4  ;;  %4873 = vmatmul.bf16.gmra.mxu0 %v8823_v17  ;;  %v4964_v58 = vrot.slane %v8823_v17, 1  ;;  %v4525_v22 = vshll.u32 %v8823_v17, 16  ;;  %v4529_v42 = vshrl.u32 %v8823_v17, 16  ;;  %v5484_v30 = vrot.slane %v8823_v17, 2 }
 0x4c8   : > { %v4105_v41 = vmax.f32 %v4073_v23, 0.0  ;;  %4012 = vmatmul.bf16.gmra.mxu2 %v3870_v40  ;;  %v8851_v46 = vpop.f32.mrf.mxu0  ;;  %v8853_v49 = vpop.f32.mrf.mxu1 }
 0x4c9   : > { %v4965_v1 = vsel %vm1682_vm5, %v4962_v12, %v4964_v58  ;;  %v4527_v62 = vrot.slane %v4525_v22, 1  ;;  %v5213_v19 = vrot.slane %v4529_v42, 1  ;;  %v5214_v14 = vrot.slane %v4525_v22, 2  ;;  %v6984_v22 = vld [vmem:[#allocation7 + $0xd8] sm:$0xff] }
 0x4ca   : > { %v4137_v45 = vpack.c.bf16 %v4105_v41, %v4105_v41  ;;  %5074 = vmatmul.bf16.gmra.mxu1 %v4965_v1  ;;  %v8840_v16 = vsel %vm2204_vm7, %v5482_v51, %v5484_v30  ;;  %v3519_v51 = vadd.f32 %v8662_v15, %v8579_v59  ;;  %v3871_v1 = vrot.slane %v8573_v36, 2  ;;  %5342 = vmatpush.bf16.msra.mxu2 %v6984_v22 }
 0x4cb   : > { %v3973_v21 = vpop.f32.mrf.mxu2  ;;  %v4528_v55 = vsel %vm1223_vm6, %v4523_v11, %v4527_v62  ;;  %v5215_v4 = vor.u32 %v5214_v14, %v5213_v19 }
 0x4cc   : > { %v4218_v20 = vrot.slane %v4137_v45, 7  ;;  %v4038_v13 = vadd.f32 %v3973_v21, %v3800_v53  ;;  %4715 = vmatmul.bf16.gmra.mxu3 %v4528_v55  ;;  %v3801_v53 = vadd.f32 %v8681_v44, %v3519_v51  ;;  %v3872_v44 = vsel %vm2204_vm7, %v3869_v5, %v3871_v1 }
 0x4cd   : > { %v8847_v40 = vsel %vm1921_vm8, %v5211_v35, %v5215_v4 }
 0x4ce   : > { %v4219_v12 = vsel %vm7679_vm4, %v4217_v43, %v4218_v20  ;;  %v4074_v23 = vadd.f32 %v8710_v33, %v4038_v13  ;;  %v4220_v19 = vrot.slane %v4218_v20, 4  ;;  %v3520_v43 = vadd.f32 %v8671_v24, %v8593_v27  ;;  %v6983_v13 = vld [vmem:[#allocation7 + $0xd0] sm:$0xff]  ;;  %v6994_v20 = vld [vmem:[#allocation7 + $0x128] sm:$0xff] }
 0x4cf   : > { %4329 = vst [vmem:[#allocation3 + $0x24] sm:$0xf] %v4219_v12  ;;  %v4531_v27 = vor.u32 %v4529_v42, %v4527_v62  ;;  %5343 = vmatpush.bf16.msra.mxu2 %v6983_v13  ;;  %5578 = vmatpush.bf16.msra.mxu3 %v6994_v20  ;;  %v6982_v24 = vld [vmem:[#allocation7 + $0xc8] sm:$0xff]  ;;  %v6981_v13 = vld [vmem:[#allocation7 + $0xc0] sm:$0xff] }
 0x4d0   : > { %v4106_v41 = vmax.f32 %v4074_v23, 0.0  ;;  %v3802_v51 = vadd.f32 %v8687_v6, %v3520_v43  ;;  %v8875_v22 = vpop.f32.mrf.mxu1 }
 0x4d2   : > { %v4138_v11 = vpack.c.bf16 %v4106_v41, %v4106_v41  ;;  %v8873_v41 = vpop.f32.mrf.mxu0 }
 0x4d3   : > { %v3975_v45 = vpop.f32.mrf.mxu2  ;;  %5344 = vmatpush.bf16.msra.mxu2 %v6982_v24 }
 0x4d4   : > { %v4221_v21 = vrot.slane %v4138_v11, 7  ;;  %v4039_v35 = vadd.f32 %v3975_v45, %v3801_v53 }
 0x4d6   : > { %v4222_v59 = vsel %vm7679_vm4, %v4220_v19, %v4221_v21  ;;  %v4075_v15 = vadd.f32 %v8710_v33, %v4039_v35  ;;  %v8860_v14 = vld [vmem:[#allocation3 + $0x20] sm:$0xff]  ;;  %v4223_v62 = vrot.slane %v4221_v21, 4 }
 0x4d7   : > { %4330 = vst [vmem:[#allocation3 + $0x28] sm:$0xf] %v4222_v59  ;;  %4878 = vmatmul.bf16.gmra.mxu0 %v8860_v14  ;;  %v4966_v12 = vrot.slane %v8860_v14, 1  ;;  %v4533_v23 = vshll.u32 %v8860_v14, 16  ;;  %v4537_v7 = vshrl.u32 %v8860_v14, 16  ;;  %v5486_v5 = vrot.slane %v8860_v14, 2  ;;  %5345 = vmatpush.bf16.msra.mxu2 %v6981_v13 }
 0x4d8   : > { %v4107_v55 = vmax.f32 %v4075_v15, 0.0  ;;  %4017 = vmatmul.bf16.gmra.mxu2 %v3872_v44  ;;  %v8898_v24 = vpop.f32.mrf.mxu1 }
 0x4d9   : > { %v4967_v11 = vsel %vm1682_vm5, %v4964_v58, %v4966_v12  ;;  %v4535_v45 = vrot.slane %v4533_v23, 1  ;;  %v5217_v19 = vrot.slane %v4537_v7, 1  ;;  %v5218_v6 = vrot.slane %v4533_v23, 2 }
 0x4da   : > { %v4139_v53 = vpack.c.bf16 %v4107_v55, %v4107_v55  ;;  %5079 = vmatmul.bf16.gmra.mxu1 %v4967_v11  ;;  %v8883_v42 = vsel %vm2204_vm7, %v5484_v30, %v5486_v5  ;;  %v3521_v30 = vadd.f32 %v8679_v47, %v8598_v57 }
 0x4db   : > { %v3978_v35 = vpop.f32.mrf.mxu2  ;;  %v4536_v14 = vsel %vm1223_vm6, %v4531_v27, %v4535_v45  ;;  %v5219_v43 = vor.u32 %v5218_v6, %v5217_v19  ;;  %v8896_v27 = vpop.f32.mrf.mxu0 }
 0x4dc   : > { %v4224_v59 = vrot.slane %v4139_v53, 7  ;;  %v4040_v15 = vadd.f32 %v3978_v35, %v3802_v51  ;;  %4720 = vmatmul.bf16.gmra.mxu3 %v4536_v14  ;;  %v3803_v20 = vadd.f32 %v8695_v38, %v3521_v30  ;;  %v3873_v51 = vrot.slane %v8642_v29, 2 }
 0x4dd   : > { %v8890_v17 = vsel %vm1921_vm8, %v5215_v4, %v5219_v43  ;;  %v3522_v38 = vadd.f32 %v8685_v52, %v8606_v28  ;;  %v4539_v14 = vor.u32 %v4537_v7, %v4535_v45 }
 0x4de   : > { %v4225_v58 = vsel %vm7679_vm4, %v4223_v62, %v4224_v59  ;;  %v4076_v44 = vadd.f32 %v8710_v33, %v4040_v15  ;;  %v4226_v53 = vrot.slane %v4224_v59, 4  ;;  %v3874_v29 = vsel %vm2204_vm7, %v3871_v1, %v3873_v51 }
 0x4df   : > { %4331 = vst [vmem:[#allocation3 + $0x2c] sm:$0xf] %v4225_v58  ;;  %v3804_v15 = vadd.f32 %v8704_v31, %v3522_v38 }
 0x4e0   : > { %v4108_v21 = vmax.f32 %v4076_v44, 0.0  ;;  %v8923_v45 = vpop.f32.mrf.mxu1 }
 0x4e2   : > { %v4140_v55 = vpack.c.bf16 %v4108_v21, %v4108_v21 }
 0x4e3   : > { %v3980_v23 = vpop.f32.mrf.mxu2  ;;  %v8921_v7 = vpop.f32.mrf.mxu0 }
 0x4e4   : > { %v4227_v11 = vrot.slane %v4140_v55, 7  ;;  %v4041_v19 = vadd.f32 %v3980_v23, %v3803_v20 }
 0x4e6   : > { %v4228_v4 = vsel %vm7679_vm4, %v4226_v53, %v4227_v11  ;;  %v4077_v57 = vadd.f32 %v8710_v33, %v4041_v19  ;;  %v8903_v47 = vld [vmem:[#allocation3 + $0x28] sm:$0xff]  ;;  %v4229_v21 = vrot.slane %v4227_v11, 4  ;;  %v3523_v53 = vadd.f32 %v8693_v2, %v8613_v9 }
 0x4e7   : > { %4332 = vst [vmem:[#allocation3 + $0x30] sm:$0xf] %v4228_v4  ;;  %4883 = vmatmul.bf16.gmra.mxu0 %v8903_v47  ;;  %v4968_v6 = vrot.slane %v8903_v47, 1  ;;  %v4541_v62 = vshll.u32 %v8903_v47, 16  ;;  %v4545_v59 = vshrl.u32 %v8903_v47, 16  ;;  %v5488_v28 = vrot.slane %v8903_v47, 2 }
 0x4e8   : > { %v4109_v35 = vmax.f32 %v4077_v57, 0.0  ;;  %4022 = vmatmul.bf16.gmra.mxu2 %v3874_v29  ;;  %v3805_v19 = vadd.f32 %v8716_v56, %v3523_v53  ;;  %v6993_v9 = vld [vmem:[#allocation7 + $0x120] sm:$0xff]  ;;  %v8943_v56 = vpop.f32.mrf.mxu1 }
 0x4e9   : > { %v4969_v36 = vsel %vm1682_vm5, %v4966_v12, %v4968_v6  ;;  %v4543_v58 = vrot.slane %v4541_v62, 1  ;;  %v5221_v1 = vrot.slane %v4545_v59, 1  ;;  %v5222_v13 = vrot.slane %v4541_v62, 2  ;;  %5579 = vmatpush.bf16.msra.mxu3 %v6993_v9 }
 0x4ea   : > { %v4141_v52 = vpack.c.bf16 %v4109_v35, %v4109_v35  ;;  %5084 = vmatmul.bf16.gmra.mxu1 %v4969_v36  ;;  %v8918_v30 = vsel %vm2204_vm7, %v5486_v5, %v5488_v28 }
 0x4eb   : > { %v3983_v44 = vpop.f32.mrf.mxu2  ;;  %v4544_v23 = vsel %vm1223_vm6, %v4539_v14, %v4543_v58  ;;  %v5223_v31 = vor.u32 %v5222_v13, %v5221_v1  ;;  %v8941_v2 = vpop.f32.mrf.mxu0 }
 0x4ec   : > { %v4230_v20 = vrot.slane %v4141_v52, 7  ;;  %v4042_v55 = vadd.f32 %v3983_v44, %v3804_v15  ;;  %4725 = vmatmul.bf16.gmra.mxu3 %v4544_v23 }
 0x4ed   : > { %v8929_v5 = vsel %vm1921_vm8, %v5219_v43, %v5223_v31  ;;  %v3524_v43 = vadd.f32 %v8702_v32, %v8620_v18  ;;  %v4547_v18 = vor.u32 %v4545_v59, %v4543_v58 }
 0x4ee   : > { %v4231_v12 = vsel %vm7679_vm4, %v4229_v21, %v4230_v20  ;;  %v4078_v51 = vadd.f32 %v8710_v33, %v4042_v55  ;;  %v4232_v47 = vrot.slane %v4230_v20, 4 }
 0x4ef   : > { %4333 = vst [vmem:[#allocation3 + $0x34] sm:$0xf] %v4231_v12  ;;  %v3806_v44 = vadd.f32 %v8724_v8, %v3524_v43 }
 0x4f0   : > { %v4110_v11 = vmax.f32 %v4078_v51, 0.0 }
 0x4f2   : > { %v4142_v4 = vpack.c.bf16 %v4110_v11, %v4110_v11 }
 0x4f3   : > { %v3985_v57 = vpop.f32.mrf.mxu2 }
 0x4f4   : > { %v4233_v38 = vrot.slane %v4142_v4, 7  ;;  %v4043_v29 = vadd.f32 %v3985_v57, %v3805_v19 }
 0x4f6   : > { %v4234_v35 = vsel %vm7679_vm4, %v4232_v47, %v4233_v38  ;;  %v4079_v62 = vadd.f32 %v8710_v33, %v4043_v29  ;;  %v8937_v15 = vld [vmem:[#allocation3 + $0x30] sm:$0xff]  ;;  %v4235_v51 = vrot.slane %v4233_v38, 4  ;;  %v8966_v47 = vpop.f32.mrf.mxu0  ;;  %v8968_v38 = vpop.f32.mrf.mxu1 }
 0x4f7   : > { %4334 = vst [vmem:[#allocation3 + $0x38] sm:$0xf] %v4234_v35  ;;  %4888 = vmatmul.bf16.gmra.mxu0 %v8937_v15  ;;  %v4970_v52 = vrot.slane %v8937_v15, 1  ;;  %v4549_v36 = vshll.u32 %v8937_v15, 16  ;;  %v4553_v1 = vshrl.u32 %v8937_v15, 16  ;;  %v5490_v32 = vrot.slane %v8937_v15, 2 }
 0x4f8   : > { %v4111_v14 = vmax.f32 %v4079_v62, 0.0  ;;  %5346 = vmatmul.bf16.vlgmr.msra.gmra.mxu2 %v8775_v50 }
 0x4f9   : > { %v4971_v21 = vsel %vm1682_vm5, %v4968_v6, %v4970_v52  ;;  %v4551_v20 = vrot.slane %v4549_v36, 1  ;;  %v5225_v55 = vrot.slane %v4553_v1, 1  ;;  %v5226_v23 = vrot.slane %v4549_v36, 2 }
 0x4fa   : > { %v4143_v13 = vpack.c.bf16 %v4111_v14, %v4111_v14  ;;  %5089 = vmatmul.bf16.gmra.mxu1 %v4971_v21  ;;  %v8954_v12 = vsel %vm2204_vm7, %v5488_v28, %v5490_v32  ;;  %v3525_v28 = vadd.f32 %v8714_v60, %v8625_v39  ;;  %v9683_v39 = vld [vmem:[#allocation29_spill] sm:$0xff]  ;;  %v9684_v60 = vld [vmem:[#allocation22_spill] sm:$0xff] }
 0x4fb   : > { %v3988_v50 = vpop.f32.mrf.mxu2  ;;  %v4552_v8 = vsel %vm1223_vm6, %v4547_v18, %v4551_v20  ;;  %v5227_v59 = vor.u32 %v5226_v23, %v5225_v55  ;;  %v3526_v36 = vadd.f32 %v9684_v60, %v9683_v39  ;;  %v9685_v21 = vld [vmem:[#allocation25_spill] sm:$0xff] }
 0x4fc   : > { %v4236_v53 = vrot.slane %v4143_v13, 7  ;;  %v4044_v11 = vadd.f32 %v3988_v50, %v3806_v44  ;;  %4730 = vmatmul.bf16.gmra.mxu3 %v4552_v8  ;;  %v3807_v57 = vadd.f32 %v8733_v54, %v3525_v28  ;;  %v4555_v50 = vor.u32 %v4553_v1, %v4551_v20 }
 0x4fd   : > { %v8961_v19 = vsel %vm1921_vm8, %v5223_v31, %v5227_v59  ;;  %v3808_v55 = vadd.f32 %v9685_v21, %v3526_v36 }
 0x4fe   : > { %v4237_v58 = vsel %vm7679_vm4, %v4235_v51, %v4236_v53  ;;  %v4080_v6 = vadd.f32 %v8710_v33, %v4044_v11  ;;  %v4238_v62 = vrot.slane %v4236_v53, 4  ;;  %v8988_v28 = vpop.f32.mrf.mxu0 }
 0x4ff   : > { %4335 = vst [vmem:[#allocation3 + $0x3c] sm:$0xf] %v4237_v58 }
 0x500   : > { %v4112_v4 = vmax.f32 %v4080_v6, 0.0 }
 0x502   : > { %v4144_v29 = vpack.c.bf16 %v4112_v4, %v4112_v4  ;;  %v8990_v4 = vpop.f32.mrf.mxu1 }
 0x503   : > { %v3990_v35 = vpop.f32.mrf.mxu2 }
 0x504   : > { %v4239_v15 = vrot.slane %v4144_v29, 7  ;;  %v4045_v43 = vadd.f32 %v3990_v35, %v3807_v57 }
 0x506   : > { %v4240_v9 = vsel %vm7679_vm4, %v4238_v62, %v4239_v15  ;;  %v4081_v31 = vadd.f32 %v8710_v33, %v4045_v43  ;;  %v8973_v14 = vld [vmem:[#allocation3 + $0x38] sm:$0xff]  ;;  %v4241_v57 = vrot.slane %v4239_v15, 4  ;;  %v9686_v43 = vld [vmem:[#allocation14_spill] sm:$0xff]  ;;  %v9688_v15 = vld [vmem:[#allocation27_spill] sm:$0xff] }
 0x507   : > { %4336 = vst [vmem:[#allocation3 + $0x40] sm:$0xf] %v4240_v9  ;;  %4893 = vmatmul.bf16.gmra.mxu0 %v8973_v14  ;;  %v4972_v44 = vrot.slane %v8973_v14, 1  ;;  %v4557_v18 = vshll.u32 %v8973_v14, 16  ;;  %v4561_v13 = vshrl.u32 %v8973_v14, 16  ;;  %v5492_v23 = vrot.slane %v8973_v14, 2 }
 0x508   : > { %v4113_v54 = vmax.f32 %v4081_v31, 0.0  ;;  %5351 = vmatmul.bf16.gmra.mxu2 %v8810_v0  ;;  %v9687_v9 = vld [vmem:[#allocation23_spill] sm:$0xff] }
 0x509   : > { %v4973_v53 = vsel %vm1682_vm5, %v4970_v52, %v4972_v44  ;;  %v4559_v11 = vrot.slane %v4557_v18, 1  ;;  %v5229_v8 = vrot.slane %v4561_v13, 1  ;;  %v5230_v0 = vrot.slane %v4557_v18, 2 }
 0x50a   : > { %v4145_v51 = vpack.c.bf16 %v4113_v54, %v4113_v54  ;;  %5094 = vmatmul.bf16.gmra.mxu1 %v4973_v53  ;;  %v8986_v6 = vsel %vm2204_vm7, %v5490_v32, %v5492_v23  ;;  %v3527_v31 = vadd.f32 %v9687_v9, %v9686_v43 }
 0x50b   : > { %v3993_v58 = vpop.f32.mrf.mxu2  ;;  %v4560_v20 = vsel %vm1223_vm6, %v4555_v50, %v4559_v11  ;;  %v5231_v35 = vor.u32 %v5230_v0, %v5229_v8  ;;  %v9004_v50 = vpop.f32.mrf.mxu1  ;;  %v9689_v8 = vld [vmem:[#allocation28_spill] sm:$0xff]  ;;  %v4563_v43 = vor.u32 %v4561_v13, %v4559_v11 }
 0x50c   : > { %v4242_v29 = vrot.slane %v4145_v51, 7  ;;  %v4046_v1 = vadd.f32 %v3993_v58, %v3808_v55  ;;  %4735 = vmatmul.bf16.gmra.mxu3 %v4560_v20  ;;  %v3809_v39 = vadd.f32 %v9688_v15, %v3527_v31  ;;  %v9690_v58 = vld [vmem:[#allocation24_spill] sm:$0xff] }
 0x50d   : > { %v8997_v32 = vsel %vm1921_vm8, %v5227_v59, %v5231_v35  ;;  %v3528_v0 = vadd.f32 %v9690_v58, %v9689_v8  ;;  %v9692_v8 = vld [vmem:[#allocation26_spill] sm:$0xff] }
 0x50e   : > { %v4243_v52 = vsel %vm7679_vm4, %v4241_v57, %v4242_v29  ;;  %v4082_v62 = vadd.f32 %v8710_v33, %v4046_v1  ;;  %v4244_v54 = vrot.slane %v4242_v29, 4  ;;  %v6992_v57 = vld [vmem:[#allocation7 + $0x118] sm:$0xff] }
 0x50f   : > { %4337 = vst [vmem:[#allocation3 + $0x44] sm:$0xf] %v4243_v52  ;;  %5580 = vmatpush.bf16.msra.mxu3 %v6992_v57 }
 0x510   : > { %v4114_v14 = vmax.f32 %v4082_v62, 0.0  ;;  %v3810_v62 = vadd.f32 %v8779_v3, %v3528_v0 }
 0x512   : > { %v4146_v60 = vpack.c.bf16 %v4114_v14, %v4114_v14 }
 0x513   : > { %v3995_v36 = vpop.f32.mrf.mxu2  ;;  %v9035_v58 = vpop.f32.mrf.mxu1 }
 0x514   : > { %v4245_v18 = vrot.slane %v4146_v60, 7  ;;  %v4047_v21 = vadd.f32 %v3995_v36, %v3809_v39  ;;  %v9002_v55 = vpop.f32.mrf.mxu0 }
 0x516   : > { %v4246_v51 = vsel %vm7679_vm4, %v4244_v54, %v4245_v18  ;;  %v4083_v59 = vadd.f32 %v8710_v33, %v4047_v21  ;;  %v9009_v53 = vld [vmem:[#allocation3 + $0x40] sm:$0xff]  ;;  %v4247_v54 = vrot.slane %v4245_v18, 4 }
 0x517   : > { %4338 = vst [vmem:[#allocation3 + $0x48] sm:$0xf] %v4246_v51  ;;  %4898 = vmatmul.bf16.gmra.mxu0 %v9009_v53  ;;  %v4974_v29 = vrot.slane %v9009_v53, 1  ;;  %v4565_v20 = vshll.u32 %v9009_v53, 16  ;;  %v4569_v52 = vshrl.u32 %v9009_v53, 16  ;;  %v5494_v9 = vrot.slane %v9009_v53, 2 }
 0x518   : > { %v4115_v1 = vmax.f32 %v4083_v59, 0.0  ;;  %5356 = vmatmul.bf16.gmra.mxu2 %v8847_v40 }
 0x519   : > { %v4975_v14 = vsel %vm1682_vm5, %v4972_v44, %v4974_v29  ;;  %v4567_v15 = vrot.slane %v4565_v20, 1  ;;  %v5233_v39 = vrot.slane %v4569_v52, 1  ;;  %v5234_v60 = vrot.slane %v4565_v20, 2 }
 0x51a   : > { %v4147_v31 = vpack.c.bf16 %v4115_v1, %v4115_v1  ;;  %5099 = vmatmul.bf16.gmra.mxu1 %v4975_v14  ;;  %v9022_v36 = vsel %vm2204_vm7, %v5492_v23, %v5494_v9  ;;  %v9691_v23 = vld [vmem:[#allocation32_spill] sm:$0xff] }
 0x51b   : > { %v3998_v40 = vpop.f32.mrf.mxu2  ;;  %v4568_v3 = vsel %vm1223_vm6, %v4563_v43, %v4567_v15  ;;  %v5235_v13 = vor.u32 %v5234_v60, %v5233_v39  ;;  %v3529_v18 = vadd.f32 %v9692_v8, %v9691_v23  ;;  %v9693_v60 = vld [vmem:[#allocation15_spill] sm:$0xff]  ;;  %v4571_v23 = vor.u32 %v4569_v52, %v4567_v15 }
 0x51c   : > { %v4248_v21 = vrot.slane %v4147_v31, 7  ;;  %v4048_v51 = vadd.f32 %v3998_v40, %v3810_v62  ;;  %v9024_v59 = vpop.f32.mrf.mxu0  ;;  %4740 = vmatmul.bf16.gmra.mxu3 %v4568_v3 }
 0x51d   : > { %v9031_v53 = vsel %vm1921_vm8, %v5231_v35, %v5235_v13  ;;  %v3811_v57 = vadd.f32 %v8803_v48, %v3529_v18 }
 0x51e   : > { %v4249_v44 = vsel %vm7679_vm4, %v4247_v54, %v4248_v21  ;;  %v4084_v11 = vadd.f32 %v8710_v33, %v4048_v51  ;;  %v4250_v62 = vrot.slane %v4248_v21, 4  ;;  %v3530_v54 = vadd.f32 %v8777_v25, %v9693_v60 }
 0x51f   : > { %4339 = vst [vmem:[#allocation3 + $0x4c] sm:$0xf] %v4249_v44 }
 0x520   : > { %v4116_v0 = vmax.f32 %v4084_v11, 0.0  ;;  %v3812_v11 = vadd.f32 %v8818_v61, %v3530_v54 }
 0x522   : > { %v4148_v1 = vpack.c.bf16 %v4116_v0, %v4116_v0 }
 0x523   : > { %v4000_v20 = vpop.f32.mrf.mxu2 }
 0x524   : > { %v4251_v43 = vrot.slane %v4148_v1, 7  ;;  %v4049_v31 = vadd.f32 %v4000_v20, %v3811_v57  ;;  %v9038_v14 = vpop.f32.mrf.mxu0 }
 0x526   : > { %v4252_v39 = vsel %vm7679_vm4, %v4250_v62, %v4251_v43  ;;  %v4085_v35 = vadd.f32 %v8710_v33, %v4049_v31  ;;  %v9043_v40 = vld [vmem:[#allocation3 + $0x48] sm:$0xff]  ;;  %v4253_v62 = vrot.slane %v4251_v43, 4 }
 0x527   : > { %4340 = vst [vmem:[#allocation3 + $0x50] sm:$0xf] %v4252_v39  ;;  %4903 = vmatmul.bf16.gmra.mxu0 %v9043_v40  ;;  %v5065_v48 = vpop.f32.mrf.mxu1  ;;  %v4976_v21 = vrot.slane %v9043_v40, 1  ;;  %v4573_v3 = vshll.u32 %v9043_v40, 16  ;;  %v4577_v44 = vshrl.u32 %v9043_v40, 16  ;;  %v5496_v8 = vrot.slane %v9043_v40, 2 }
 0x528   : > { %v4117_v51 = vmax.f32 %v4085_v35, 0.0  ;;  %5361 = vmatmul.bf16.gmra.mxu2 %v8890_v17 }
 0x529   : > { %v4977_v25 = vsel %vm1682_vm5, %v4974_v29, %v4976_v21  ;;  %v4575_v0 = vrot.slane %v4573_v3, 1  ;;  %v5237_v57 = vrot.slane %v4577_v44, 1  ;;  %v5238_v1 = vrot.slane %v4573_v3, 2 }
 0x52a   : > { %v4149_v18 = vpack.c.bf16 %v4117_v51, %v4117_v51  ;;  %5104 = vmatmul.bf16.gmra.mxu1 %v4977_v25  ;;  %v9056_v20 = vsel %vm2204_vm7, %v5494_v9, %v5496_v8  ;;  %v9694_v9 = vld [vmem:[#allocation31_spill] sm:$0xff] }
 0x52b   : > { %v4003_v17 = vpop.f32.mrf.mxu2  ;;  %v4576_v35 = vsel %vm1223_vm6, %v4571_v23, %v4575_v0  ;;  %v5239_v52 = vor.u32 %v5238_v1, %v5237_v57  ;;  %v3531_v43 = vadd.f32 %v8801_v10, %v9694_v9  ;;  %v9080_v10 = vld [vmem:[%s9606_s5] ss:$0 sm:$0xff] }
 0x52c   : > { %v4254_v31 = vrot.slane %v4149_v18, 7  ;;  %v4050_v39 = vadd.f32 %v4003_v17, %v3812_v11  ;;  %4745 = vmatmul.bf16.gmra.mxu3 %v4576_v35  ;;  %v9059_v61 = vpop.f32.mrf.mxu0 }
 0x52d   : > { %v9065_v40 = vsel %vm1921_vm8, %v5235_v13, %v5239_v52  ;;  %v3813_v11 = vadd.f32 %v8853_v49, %v3531_v43 }
 0x52e   : > { %v4255_v29 = vsel %vm7679_vm4, %v4253_v62, %v4254_v31  ;;  %v4086_v15 = vadd.f32 %v8710_v33, %v4050_v39  ;;  %v4256_v57 = vrot.slane %v4254_v31, 4  ;;  %v9695_v62 = vld [vmem:[#allocation34_spill] sm:$0xff]  ;;  %v6991_v31 = vld [vmem:[#allocation7 + $0x110] sm:$0xff] }
 0x52f   : > { %4341 = vst [vmem:[#allocation3 + $0x54] sm:$0xf] %v4255_v29  ;;  %v4706_v54 = vpop.f32.mrf.mxu3  ;;  %v5067_v51 = vpop.f32.mrf.mxu1  ;;  %5581 = vmatpush.bf16.msra.mxu3 %v6991_v31 }
 0x530   : > { %v4118_v60 = vmax.f32 %v4086_v15, 0.0  ;;  %v4860_v3 = vadd.f32 %v9002_v55, %v4706_v54 }
 0x532   : > { %v4150_v23 = vpack.c.bf16 %v4118_v60, %v4118_v60  ;;  %v9071_v25 = vadd.f32 %v5065_v48, %v4860_v3  ;;  %v3532_v48 = vadd.f32 %v8816_v34, %v9695_v62  ;;  %v4579_v34 = vor.u32 %v4577_v44, %v4575_v0 }
 0x533   : > { %v4005_v18 = vpop.f32.mrf.mxu2 }
 0x534   : > { %v4257_v33 = vrot.slane %v4150_v23, 7  ;;  %v4051_v17 = vadd.f32 %v4005_v18, %v3813_v11  ;;  %v9073_v1 = vpop.f32.mrf.mxu0  ;;  %v3814_v60 = vadd.f32 %v8875_v22, %v3532_v48 }
 0x536   : > { %v4258_v13 = vsel %vm7679_vm4, %v4256_v57, %v4257_v33  ;;  %v4087_v55 = vadd.f32 %v9080_v10, %v4051_v17  ;;  %v9083_v49 = vld [vmem:[#allocation3 + $0x50] sm:$0xff]  ;;  %v4259_v22 = vrot.slane %v4257_v33, 4 }
 0x537   : > { %4342 = vst [vmem:[#allocation3 + $0x58] sm:$0xf] %v4258_v13  ;;  %v4708_v35 = vpop.f32.mrf.mxu3  ;;  %4908 = vmatmul.bf16.gmra.mxu0 %v9083_v49  ;;  %v5070_v29 = vpop.f32.mrf.mxu1  ;;  %v4978_v15 = vrot.slane %v9083_v49, 1  ;;  %v4581_v9 = vshll.u32 %v9083_v49, 16  ;;  %v4585_v43 = vshrl.u32 %v9083_v49, 16  ;;  %v5498_v3 = vrot.slane %v9083_v49, 2 }
 0x538   : > { %v4119_v39 = vmax.f32 %v4087_v55, 0.0  ;;  %5366 = vmatmul.bf16.gmra.mxu2 %v8929_v5  ;;  %v4862_v54 = vadd.f32 %v9024_v59, %v4708_v35  ;;  %v9696_v33 = vld [vmem:[#allocation16_spill] sm:$0xff] }
 0x539   : > { %v4979_v5 = vsel %vm1682_vm5, %v4976_v21, %v4978_v15  ;;  %v4583_v23 = vrot.slane %v4581_v9, 1  ;;  %v5241_v18 = vrot.slane %v4585_v43, 1  ;;  %v5242_v13 = vrot.slane %v4581_v9, 2 }
 0x53a   : > { %v4151_v11 = vpack.c.bf16 %v4119_v39, %v4119_v39  ;;  %5109 = vmatmul.bf16.gmra.mxu1 %v4979_v5  ;;  %v9096_v17 = vadd.f32 %v5067_v51, %v4862_v54  ;;  %v9099_v55 = vsel %vm2204_vm7, %v5496_v8, %v5498_v3  ;;  %v7004_v8 = vld [vmem:[%s9609_s8 + $0x38] sm:$0xff]  ;;  %v3533_v31 = vadd.f32 %v8851_v46, %v9696_v33 }
 0x53b   : > { %v4008_v57 = vpop.f32.mrf.mxu2  ;;  %v4584_v44 = vsel %vm1223_vm6, %v4579_v34, %v4583_v23  ;;  %v5243_v49 = vor.u32 %v5242_v13, %v5241_v18  ;;  %5849 = vmatpush.bf16.msra.mxu0 %v7004_v8  ;;  %7021 = vmatpush.bf16.msrb.mxu2 %v7004_v8 }
 0x53c   : > { %v4260_v62 = vrot.slane %v4151_v11, 7  ;;  %v4052_v59 = vadd.f32 %v4008_v57, %v3814_v60  ;;  %4750 = vmatmul.bf16.gmra.mxu3 %v4584_v44  ;;  %v9102_v0 = vpop.f32.mrf.mxu0  ;;  %v3815_v60 = vadd.f32 %v8898_v24, %v3533_v31  ;;  %v4587_v31 = vor.u32 %v4585_v43, %v4583_v23 }
 0x53d   : > { %v9111_v51 = vsel %vm1921_vm8, %v5239_v52, %v5243_v49 }
 0x53e   : > { %v4261_v21 = vsel %vm7679_vm4, %v4259_v22, %v4260_v62  ;;  %v4088_v48 = vadd.f32 %v9080_v10, %v4052_v59  ;;  %v4262_v18 = vrot.slane %v4260_v62, 4  ;;  %v9697_v59 = vld [vmem:[#allocation33_spill] sm:$0xff] }
 0x53f   : > { %4343 = vst [vmem:[#allocation3 + $0x5c] sm:$0xf] %v4261_v21  ;;  %v4711_v35 = vpop.f32.mrf.mxu3  ;;  %v5072_v34 = vpop.f32.mrf.mxu1  ;;  %v3534_v24 = vadd.f32 %v8873_v41, %v9697_v59 }
 0x540   : > { %v4120_v39 = vmax.f32 %v4088_v48, 0.0  ;;  %v4865_v9 = vadd.f32 %v9038_v14, %v4711_v35 }
 0x541   : > { %v3816_v8 = vadd.f32 %v8923_v45, %v3534_v24 }
 0x542   : > { %v4152_v54 = vpack.c.bf16 %v4120_v39, %v4120_v39  ;;  %v9117_v5 = vadd.f32 %v5070_v29, %v4865_v9 }
 0x543   : > { %v4010_v11 = vpop.f32.mrf.mxu2 }
 0x544   : > { %v4263_v57 = vrot.slane %v4152_v54, 7  ;;  %v4053_v52 = vadd.f32 %v4010_v11, %v3815_v60  ;;  %v9119_v13 = vpop.f32.mrf.mxu0 }
 0x546   : > { %v4264_v46 = vsel %vm7679_vm4, %v4262_v18, %v4263_v57  ;;  %v4089_v22 = vadd.f32 %v9080_v10, %v4053_v52  ;;  %v9124_v14 = vld [vmem:[#allocation3 + $0x58] sm:$0xff]  ;;  %v4265_v52 = vrot.slane %v4263_v57, 4 }
 0x547   : > { %4344 = vst [vmem:[#allocation3 + $0x60] sm:$0xf] %v4264_v46  ;;  %v4713_v29 = vpop.f32.mrf.mxu3  ;;  %4913 = vmatmul.bf16.gmra.mxu0 %v9124_v14  ;;  %v4980_v62 = vrot.slane %v9124_v14, 1  ;;  %v4589_v21 = vshll.u32 %v9124_v14, 16  ;;  %v4593_v48 = vshrl.u32 %v9124_v14, 16  ;;  %v5500_v41 = vrot.slane %v9124_v14, 2  ;;  %v5075_v46 = vpop.f32.mrf.mxu1 }
 0x548   : > { %v4121_v44 = vmax.f32 %v4089_v22, 0.0  ;;  %5371 = vmatmul.bf16.gmra.mxu2 %v8961_v19  ;;  %v4867_v33 = vadd.f32 %v9059_v61, %v4713_v29 }
 0x549   : > { %v4981_v35 = vsel %vm1682_vm5, %v4978_v15, %v4980_v62  ;;  %v4591_v19 = vrot.slane %v4589_v21, 1  ;;  %v5245_v9 = vrot.slane %v4593_v48, 1  ;;  %v5246_v11 = vrot.slane %v4589_v21, 2 }
 0x54a   : > { %v4153_v39 = vpack.c.bf16 %v4121_v44, %v4121_v44  ;;  %5114 = vmatmul.bf16.gmra.mxu1 %v4981_v35  ;;  %v9137_v54 = vadd.f32 %v5072_v34, %v4867_v33  ;;  %v9140_v18 = vsel %vm2204_vm7, %v5498_v3, %v5500_v41  ;;  %v9698_v3 = vld [vmem:[#allocation17_spill] sm:$0xff] }
 0x54b   : > { %v4013_v60 = vpop.f32.mrf.mxu2  ;;  %v4592_v43 = vsel %vm1223_vm6, %v4587_v31, %v4591_v19  ;;  %v5247_v15 = vor.u32 %v5246_v11, %v5245_v9  ;;  %v3535_v57 = vadd.f32 %v8896_v27, %v9698_v3 }
 0x54c   : > { %v4266_v45 = vrot.slane %v4153_v39, 7  ;;  %v4054_v61 = vadd.f32 %v4013_v60, %v3816_v8  ;;  %4755 = vmatmul.bf16.gmra.mxu3 %v4592_v43  ;;  %v9143_v23 = vpop.f32.mrf.mxu0 }
 0x54d   : > { %v9149_v14 = vsel %vm1921_vm8, %v5243_v49, %v5247_v15  ;;  %v3817_v29 = vadd.f32 %v8943_v56, %v3535_v57  ;;  %v4595_v57 = vor.u32 %v4593_v48, %v4591_v19 }
 0x54e   : > { %v4267_v22 = vsel %vm7679_vm4, %v4265_v52, %v4266_v45  ;;  %v4090_v34 = vadd.f32 %v9080_v10, %v4054_v61  ;;  %v4268_v31 = vrot.slane %v4266_v45, 4  ;;  %v6990_v52 = vld [vmem:[#allocation7 + $0x108] sm:$0xff] }
 0x54f   : > { %4345 = vst [vmem:[#allocation3 + $0x64] sm:$0xf] %v4267_v22  ;;  %v4716_v24 = vpop.f32.mrf.mxu3  ;;  %v5077_v60 = vpop.f32.mrf.mxu1  ;;  %5582 = vmatpush.bf16.msra.mxu3 %v6990_v52 }
 0x550   : > { %v4122_v59 = vmax.f32 %v4090_v34, 0.0  ;;  %v4870_v44 = vadd.f32 %v9073_v1, %v4716_v24  ;;  %v9699_v1 = vld [vmem:[#allocation18_spill] sm:$0xff] }
 0x551   : > { %v3536_v56 = vadd.f32 %v8921_v7, %v9699_v1 }
 0x552   : > { %v4154_v21 = vpack.c.bf16 %v4122_v59, %v4122_v59  ;;  %v9155_v33 = vadd.f32 %v5075_v46, %v4870_v44 }
 0x553   : > { %v4015_v8 = vpop.f32.mrf.mxu2  ;;  %v3818_v34 = vadd.f32 %v8968_v38, %v3536_v56 }
 0x554   : > { %v4269_v39 = vrot.slane %v4154_v21, 7  ;;  %v4055_v35 = vadd.f32 %v4015_v8, %v3817_v29  ;;  %v9157_v9 = vpop.f32.mrf.mxu0 }
 0x556   : > { %v4270_v49 = vsel %vm7679_vm4, %v4268_v31, %v4269_v39  ;;  %v4091_v27 = vadd.f32 %v9080_v10, %v4055_v35  ;;  %v9162_v11 = vld [vmem:[#allocation3 + $0x60] sm:$0xff] }
 0x557   : > { %4346 = vst [vmem:[#allocation3 + $0x68] sm:$0xf] %v4270_v49  ;;  %v4718_v45 = vpop.f32.mrf.mxu3  ;;  %4918 = vmatmul.bf16.gmra.mxu0 %v9162_v11  ;;  %v4982_v61 = vrot.slane %v9162_v11, 1  ;;  %v4597_v43 = vshll.u32 %v9162_v11, 16  ;;  %v4601_v22 = vshrl.u32 %v9162_v11, 16  ;;  %v5502_v7 = vrot.slane %v9162_v11, 2  ;;  %v5080_v1 = vpop.f32.mrf.mxu1 }
 0x558   : > { %v4123_v46 = vmax.f32 %v4091_v27, 0.0  ;;  %5376 = vmatmul.bf16.gmra.mxu2 %v8997_v32  ;;  %v4872_v3 = vadd.f32 %v9102_v0, %v4718_v45  ;;  %v4271_v0 = vrot.slane %v4269_v39, 4 }
 0x559   : > { %v4983_v32 = vsel %vm1682_vm5, %v4980_v62, %v4982_v61  ;;  %v4599_v24 = vrot.slane %v4597_v43, 1  ;;  %v5249_v44 = vrot.slane %v4601_v22, 1  ;;  %v5250_v8 = vrot.slane %v4597_v43, 2 }
 0x55a   : > { %v4155_v59 = vpack.c.bf16 %v4123_v46, %v4123_v46  ;;  %5119 = vmatmul.bf16.gmra.mxu1 %v4983_v32  ;;  %v9177_v21 = vadd.f32 %v5077_v60, %v4872_v3  ;;  %v9182_v38 = vsel %vm2204_vm7, %v5500_v41, %v5502_v7  ;;  %v9700_v41 = vld [vmem:[#allocation19_spill] sm:$0xff] }
 0x55b   : > { %v4018_v29 = vpop.f32.mrf.mxu2  ;;  %v4600_v31 = vsel %vm1223_vm6, %v4595_v57, %v4599_v24  ;;  %v5251_v62 = vor.u32 %v5250_v8, %v5249_v44  ;;  %v3537_v39 = vadd.f32 %v8941_v2, %v9700_v41  ;;  %v7003_v46 = vld [vmem:[%s9609_s8 + $0x30] sm:$0xff] }
 0x55c   : > { %v4272_v48 = vrot.slane %v4155_v59, 7  ;;  %v4056_v19 = vadd.f32 %v4018_v29, %v3818_v34  ;;  %4760 = vmatmul.bf16.gmra.mxu3 %v4600_v31  ;;  %v9185_v35 = vpop.f32.mrf.mxu0  ;;  %5850 = vmatpush.bf16.msra.mxu0 %v7003_v46 }
 0x55d   : > { %v9191_v27 = vsel %vm1921_vm8, %v5247_v15, %v5251_v62  ;;  %v3819_v43 = vadd.f32 %v8990_v4, %v3537_v39  ;;  %7022 = vmatpush.bf16.msrb.mxu2 %v7003_v46  ;;  %v4603_v39 = vor.u32 %v4601_v22, %v4599_v24 }
 0x55e   : > { %v4273_v49 = vsel %vm7679_vm4, %v4271_v0, %v4272_v48  ;;  %v4092_v60 = vadd.f32 %v9080_v10, %v4056_v19  ;;  %v4274_v57 = vrot.slane %v4272_v48, 4 }
 0x55f   : > { %4347 = vst [vmem:[#allocation3 + $0x6c] sm:$0xf] %v4273_v49  ;;  %v4721_v52 = vpop.f32.mrf.mxu3 }
 0x560   : > { %v4124_v56 = vmax.f32 %v4092_v60, 0.0  ;;  %v4875_v45 = vadd.f32 %v9119_v13, %v4721_v52  ;;  %v9701_v13 = vld [vmem:[#allocation20_spill] sm:$0xff] }
 0x561   : > { %v3538_v4 = vadd.f32 %v8966_v47, %v9701_v13 }
 0x562   : > { %v4156_v34 = vpack.c.bf16 %v4124_v56, %v4124_v56  ;;  %v9200_v15 = vadd.f32 %v5080_v1, %v4875_v45  ;;  %v5082_v1 = vpop.f32.mrf.mxu1 }
 0x563   : > { %v4020_v3 = vpop.f32.mrf.mxu2  ;;  %v3820_v60 = vadd.f32 %v9004_v50, %v3538_v4 }
 0x564   : > { %v4275_v59 = vrot.slane %v4156_v34, 7  ;;  %v4057_v2 = vadd.f32 %v4020_v3, %v3819_v43  ;;  %v9202_v32 = vpop.f32.mrf.mxu0 }
 0x566   : > { %v4276_v44 = vsel %vm7679_vm4, %v4274_v57, %v4275_v59  ;;  %v4093_v29 = vadd.f32 %v9080_v10, %v4057_v2  ;;  %v9207_v8 = vld [vmem:[#allocation3 + $0x68] sm:$0xff] }
 0x567   : > { %4348 = vst [vmem:[#allocation3 + $0x70] sm:$0xf] %v4276_v44  ;;  %v4723_v19 = vpop.f32.mrf.mxu3  ;;  %4923 = vmatmul.bf16.gmra.mxu0 %v9207_v8  ;;  %v4984_v48 = vrot.slane %v9207_v8, 1  ;;  %v4605_v31 = vshll.u32 %v9207_v8, 16  ;;  %v4609_v49 = vshrl.u32 %v9207_v8, 16  ;;  %v5504_v47 = vrot.slane %v9207_v8, 2 }
 0x568   : > { %v4125_v0 = vmax.f32 %v4093_v29, 0.0  ;;  %5381 = vmatmul.bf16.gmra.mxu2 %v9031_v53  ;;  %v4877_v41 = vadd.f32 %v9143_v23, %v4723_v19  ;;  %v4277_v23 = vrot.slane %v4275_v59, 4 }
 0x569   : > { %v4985_v53 = vsel %vm1682_vm5, %v4982_v61, %v4984_v48  ;;  %v4607_v52 = vrot.slane %v4605_v31, 1  ;;  %v5253_v46 = vrot.slane %v4609_v49, 1  ;;  %v5254_v34 = vrot.slane %v4605_v31, 2  ;;  %v6989_v61 = vld [vmem:[#allocation7 + $0x100] sm:$0xff] }
 0x56a   : > { %v4157_v56 = vpack.c.bf16 %v4125_v0, %v4125_v0  ;;  %5124 = vmatmul.bf16.gmra.mxu1 %v4985_v53  ;;  %v9222_v43 = vadd.f32 %v5082_v1, %v4877_v41  ;;  %v9227_v50 = vsel %vm2204_vm7, %v5502_v7, %v5504_v47  ;;  %5583 = vmatpush.bf16.msra.mxu3 %v6989_v61  ;;  %v9702_v7 = vld [vmem:[#allocation21_spill] sm:$0xff] }
 0x56b   : > { %v4023_v45 = vpop.f32.mrf.mxu2  ;;  %v4608_v3 = vsel %vm1223_vm6, %v4603_v39, %v4607_v52  ;;  %v5255_v2 = vor.u32 %v5254_v34, %v5253_v46  ;;  %v3539_v59 = vadd.f32 %v8988_v28, %v9702_v7  ;;  %v7002_v34 = vld [vmem:[%s9609_s8 + $0x28] sm:$0xff] }
 0x56c   : > { %v4278_v22 = vrot.slane %v4157_v56, 7  ;;  %v4058_v24 = vadd.f32 %v4023_v45, %v3820_v60  ;;  %4765 = vmatmul.bf16.gmra.mxu3 %v4608_v3  ;;  %v9230_v57 = vpop.f32.mrf.mxu0  ;;  %5851 = vmatpush.bf16.msra.mxu0 %v7002_v34 }
 0x56d   : > { %v9236_v11 = vsel %vm1921_vm8, %v5251_v62, %v5255_v2  ;;  %v3821_v0 = vadd.f32 %v9035_v58, %v3539_v59  ;;  %7023 = vmatpush.bf16.msrb.mxu2 %v7002_v34 }
 0x56e   : > { %v4279_v44 = vsel %vm7679_vm4, %v4277_v23, %v4278_v22  ;;  %v4094_v29 = vadd.f32 %v9080_v10, %v4058_v24  ;;  %v4280_v60 = vrot.slane %v4278_v22, 4  ;;  %v4611_v23 = vor.u32 %v4609_v49, %v4607_v52 }
 0x56f   : > { %4349 = vst [vmem:[#allocation3 + $0x74] sm:$0xf] %v4279_v44  ;;  %v4726_v13 = vpop.f32.mrf.mxu3 }
 0x570   : > { %v4126_v8 = vmax.f32 %v4094_v29, 0.0  ;;  %v9241_v4 = vadd.f32 %v9157_v9, %v4726_v13 }
 0x572   : > { %v4158_v19 = vpack.c.bf16 %v4126_v8, %v4126_v8 }
 0x573   : > { %v4025_v31 = vpop.f32.mrf.mxu2 }
 0x574   : > { %v4281_v41 = vrot.slane %v4158_v19, 7  ;;  %v4059_v39 = vadd.f32 %v4025_v31, %v3821_v0  ;;  %v9244_v1 = vpop.f32.mrf.mxu0 }
 0x576   : > { %v4282_v62 = vsel %vm7679_vm4, %v4280_v60, %v4281_v41  ;;  %v4095_v56 = vadd.f32 %v9080_v10, %v4059_v39  ;;  %v6955_v28 = vld [vmem:[#allocation3 + $0x70] sm:$0xff]  ;;  %v4283_v7 = vrot.slane %v4281_v41, 4 }
 0x577   : > { %4350 = vst [vmem:[#allocation3 + $0x78] sm:$0xf] %v4282_v62  ;;  %v9250_v9 = vpop.f32.mrf.mxu3  ;;  %4928 = vmatmul.bf16.gmra.mxu0 %v6955_v28  ;;  %v4986_v58 = vrot.slane %v6955_v28, 1  ;;  %v4613_v46 = vshll.u32 %v6955_v28, 16  ;;  %v4617_v45 = vshrl.u32 %v6955_v28, 16  ;;  %v5506_v22 = vrot.slane %v6955_v28, 2 }
 0x578   : > { %v4127_v53 = vmax.f32 %v4095_v56, 0.0  ;;  %5386 = vmatmul.bf16.gmra.mxu2 %v9065_v40 }
 0x579   : > { %v4987_v10 = vsel %vm1682_vm5, %v4984_v48, %v4986_v58  ;;  %v4615_v3 = vrot.slane %v4613_v46, 1  ;;  %v5257_v61 = vrot.slane %v4617_v45, 1  ;;  %v5258_v44 = vrot.slane %v4613_v46, 2 }
 0x57a   : > { %v4159_v24 = vpack.c.bf16 %v4127_v53, %v4127_v53  ;;  %5129 = vmatmul.bf16.gmra.mxu1 %v4987_v10  ;;  %v9257_v29 = vsel %vm2204_vm7, %v5504_v47, %v5506_v22 }
 0x57b   : > { %v5347_v40 = vpop.f32.mrf.mxu2  ;;  %v4616_v49 = vsel %vm1223_vm6, %v4611_v23, %v4615_v3  ;;  %v5259_v48 = vor.u32 %v5258_v44, %v5257_v61  ;;  %v4619_v23 = vor.u32 %v4617_v45, %v4615_v3 }
 0x57c   : > { %v4284_v59 = vrot.slane %v4159_v24, 7  ;;  %v9260_v8 = vadd.f32 %v5347_v40, %v9071_v25  ;;  %4770 = vmatmul.bf16.gmra.mxu3 %v4616_v49  ;;  %v9263_v52 = vpop.f32.mrf.mxu0 }
 0x57d   : > { %v9268_v19 = vsel %vm1921_vm8, %v5255_v2, %v5259_v48 }
 0x57e   : > { %v4285_v13 = vsel %vm7679_vm4, %v4283_v7, %v4284_v59  ;;  %v4286_v0 = vrot.slane %v4284_v59, 4 }
 0x57f   : > { %4351 = vst [vmem:[#allocation3 + $0x7c] sm:$0xf] %v4285_v13  ;;  %v4731_v47 = vpop.f32.mrf.mxu3 }
 0x580   : > { %4352 = vst [vmem:[#allocation3 + $0x80] sm:$0x1] %v4286_v0  ;;  %v9271_v31 = vadd.f32 %v9202_v32, %v4731_v47 }
 0x583   : > { %v5349_v25 = vpop.f32.mrf.mxu2 }
 0x584   : > { %v9274_v60 = vadd.f32 %v5349_v25, %v9096_v17  ;;  %v4894_v41 = vpop.f32.mrf.mxu0 }
 0x586   : > { %v6956_v39 = vld [vmem:[#allocation3 + $0x78] sm:$0xff] }
 0x587   : > { %v5177_v62 = vld [vmem:[#allocation3 + $0x80] sm:$0x3]  ;;  %v9277_v26 = vpop.f32.mrf.mxu3  ;;  %4933 = vmatmul.bf16.gmra.mxu0 %v6956_v39  ;;  %v4988_v56 = vrot.slane %v6956_v39, 1  ;;  %v4621_v2 = vshll.u32 %v6956_v39, 16  ;;  %v4625_v28 = vshrl.u32 %v6956_v39, 16  ;;  %v5508_v34 = vrot.slane %v6956_v39, 2 }
 0x588   : > { %5391 = vmatmul.bf16.gmra.mxu2 %v9111_v51  ;;  %v4401_v53 = vld [vmem:[#allocation3 + $0x80] sm:$0x1]  ;;  %v5195_v46 = vunpack.c.l.b16 %v5177_v62 }
 0x589   : > { %v4989_v32 = vsel %vm1682_vm5, %v4986_v58, %v4988_v56  ;;  %v4623_v24 = vrot.slane %v4621_v2, 1  ;;  %v5261_v17 = vrot.slane %v4625_v28, 1  ;;  %v5262_v61 = vrot.slane %v4621_v2, 2 }
 0x58a   : > { %5134 = vmatmul.bf16.gmra.mxu1 %v4989_v32  ;;  %v9280_v40 = vpack.c.b16 %v5195_v46, %v5195_v46  ;;  %v9283_v51 = vsel %vm2204_vm7, %v5506_v22, %v5508_v34  ;;  %v4483_v59 = vunpack.c.l.b16 %v4401_v53  ;;  %v7001_v46 = vld [vmem:[%s9609_s8 + $0x20] sm:$0xff] }
 0x58b   : > { %v5352_v10 = vpop.f32.mrf.mxu2  ;;  %v4624_v7 = vsel %vm1223_vm6, %v4619_v23, %v4623_v24  ;;  %v9291_v58 = vor.u32 %v5262_v61, %v5261_v17  ;;  %5852 = vmatpush.bf16.msra.mxu0 %v7001_v46  ;;  %7024 = vmatpush.bf16.msrb.mxu2 %v7001_v46 }
 0x58c   : > { %v9286_v44 = vadd.f32 %v5352_v10, %v9117_v5  ;;  %4775 = vmatmul.bf16.gmra.mxu3 %v4624_v7  ;;  %v9289_v49 = vpop.f32.mrf.mxu0  ;;  %v5510_v45 = vrot.slane %v9280_v40, 2  ;;  %v4500_v0 = vpack.c.b16 %v4483_v59, %v4483_v59 }
 0x58d   : > { %v5264_v3 = vsel %vm1921_vm8, %v5259_v48, %v9291_v58 }
 0x58e   : > { %v9297_v22 = vsel %vm2204_vm7, %v5508_v34, %v5510_v45  ;;  %v4629_v39 = vshll.u32 %v4500_v0, 16  ;;  %v4990_v2 = vrot.slane %v4500_v0, 1 }
 0x58f   : > { %v4736_v13 = vpop.f32.mrf.mxu3 }
 0x590   : > { %v9300_v5 = vadd.f32 %v9244_v1, %v4736_v13  ;;  %v4631_v48 = vrot.slane %v4629_v39, 1  ;;  %v4991_v34 = vsel %vm1682_vm5, %v4988_v56, %v4990_v2  ;;  %v4627_v1 = vor.u32 %v4625_v28, %v4623_v24 }
 0x592   : > { %v4632_v23 = vsel %vm1223_vm6, %v4627_v1, %v4631_v48  ;;  %v6999_v48 = vld [vmem:[%s9609_s8 + $0x10] sm:$0xff] }
 0x593   : > { %v5354_v47 = vpop.f32.mrf.mxu2 }
 0x594   : > { %v9303_v25 = vadd.f32 %v5354_v47, %v9137_v54  ;;  %v4899_v62 = vpop.f32.mrf.mxu0 }
 0x597   : > { %v9306_v53 = vpop.f32.mrf.mxu3 }
 0x598   : > { %5396 = vmatmul.bf16.gmra.mxu2 %v9149_v14 }
 0x59a   : > { %5139 = vmatmul.bf16.gmra.mxu1 %v4991_v34  ;;  %v5269_v34 = vshll.u32 %v9280_v40, 16 }
 0x59b   : > { %v5357_v32 = vpop.f32.mrf.mxu2 }
 0x59c   : > { %v9313_v54 = vadd.f32 %v5357_v32, %v9155_v33  ;;  %4780 = vmatmul.bf16.gmra.mxu3 %v4632_v23  ;;  %v9316_v14 = vpop.f32.mrf.mxu0  ;;  %v5271_v1 = vrot.slane %v5269_v34, 2 }
 0x59f   : > { %v4741_v17 = vpop.f32.mrf.mxu3 }
 0x5a0   : > { %v9318_v10 = vadd.f32 %v4894_v41, %v4741_v17 }
 0x5a3   : > { %v5359_v61 = vpop.f32.mrf.mxu2 }
 0x5a4   : > { %v9321_v7 = vadd.f32 %v5359_v61, %v9177_v21  ;;  %v4904_v56 = vpop.f32.mrf.mxu0 }
 0x5a7   : > { %v9324_v28 = vpop.f32.mrf.mxu3 }
 0x5a8   : > { %5401 = vmatmul.bf16.gmra.mxu2 %v9191_v27 }
 0x5ab   : > { %v5362_v24 = vpop.f32.mrf.mxu2 }
 0x5ac   : > { %v9327_v33 = vadd.f32 %v5362_v24, %v9200_v15  ;;  %5584 = vmatmul.bf16.vlgmr.msra.gmra.mxu3 %v8767_v63  ;;  %v9332_v41 = vpop.f32.mrf.mxu0  ;;  %v7000_v15 = vld [vmem:[%s9609_s8 + $0x18] sm:$0xff] }
 0x5ad   : > { %5853 = vmatpush.bf16.msra.mxu0 %v7000_v15  ;;  %7025 = vmatpush.bf16.msrb.mxu2 %v7000_v15 }
 0x5af   : > { %v4746_v59 = vpop.f32.mrf.mxu3 }
 0x5b0   : > { %v9330_v45 = vadd.f32 %v4899_v62, %v4746_v59 }
 0x5b1   : > { %5854 = vmatpush.bf16.msra.mxu0 %v6999_v48  ;;  %7026 = vmatpush.bf16.msrb.mxu2 %v6999_v48 }
 0x5b3   : > { %v5364_v13 = vpop.f32.mrf.mxu2 }
 0x5b4   : > { %v9335_v21 = vadd.f32 %v5364_v13, %v9222_v43  ;;  %v4909_v63 = vpop.f32.mrf.mxu0 }
 0x5b7   : > { %v9338_v27 = vpop.f32.mrf.mxu3 }
 0x5b8   : > { %5406 = vmatmul.bf16.gmra.mxu2 %v9236_v11 }
 0x5bc   : > { %5589 = vmatmul.bf16.gmra.mxu3 %v8799_v37  ;;  %v9346_v39 = vpop.f32.mrf.mxu0 }
 0x5bf   : > { %v4751_v0 = vpop.f32.mrf.mxu3 }
 0x5c0   : > { %v9344_v47 = vadd.f32 %v4904_v56, %v4751_v0 }
 0x5c4   : > { %v4914_v11 = vpop.f32.mrf.mxu0 }
 0x5c7   : > { %v9349_v43 = vpop.f32.mrf.mxu3 }
 0x5c8   : > { %5411 = vmatmul.bf16.gmra.mxu2 %v9268_v19  ;;  %v5266_v19 = vshrl.u32 %v9280_v40, 16 }
 0x5cc   : > { %5594 = vmatmul.bf16.gmra.mxu3 %v8840_v16  ;;  %v9359_v46 = vpop.f32.mrf.mxu0  ;;  %v5268_v16 = vrot.slane %v5266_v19, 1  ;;  %v6997_v19 = vld [vmem:[%s9609_s8] sm:$0xff] }
 0x5ce   : > { %v5272_v17 = vor.u32 %v5271_v1, %v5268_v16 }
 0x5cf   : > { %v4756_v62 = vpop.f32.mrf.mxu3 }
 0x5d0   : > { %v9352_v2 = vadd.f32 %v4909_v63, %v4756_v62 }
 0x5d4   : > { %v4919_v61 = vpop.f32.mrf.mxu0 }
 0x5d7   : > { %v9357_v37 = vpop.f32.mrf.mxu3 }
 0x5d8   : > { %5416 = vmatmul.bf16.gmra.mxu2 %v5264_v3  ;;  %v5273_v3 = vsel %vm1921_vm8, %v9291_v58, %v5272_v17 }
 0x5dc   : > { %5599 = vmatmul.bf16.gmra.mxu3 %v8883_v42  ;;  %v9371_v24 = vpop.f32.mrf.mxu0  ;;  %v6998_v42 = vld [vmem:[%s9609_s8 + $0x8] sm:$0xff] }
 0x5dd   : > { %5855 = vmatpush.bf16.msra.mxu0 %v6998_v42  ;;  %7027 = vmatpush.bf16.msrb.mxu2 %v6998_v42 }
 0x5df   : > { %v4761_v32 = vpop.f32.mrf.mxu3 }
 0x5e0   : > { %v9364_v23 = vadd.f32 %v4914_v11, %v4761_v32 }
 0x5e1   : > { %5856 = vmatpush.bf16.msra.mxu0 %v6997_v19  ;;  %7028 = vmatpush.bf16.msrb.mxu2 %v6997_v19 }
 0x5e4   : > { %v4924_v13 = vpop.f32.mrf.mxu0 }
 0x5e7   : > { %v9368_v56 = vpop.f32.mrf.mxu3 }
 0x5e8   : > { %5421 = vmatmul.bf16.gmra.mxu2 %v5273_v3  ;;  %v9407_v3 = vld [vmem:[%s9608_s7] ss:$0 sm:$0xff] }
 0x5ec   : > { %5604 = vmatmul.bf16.gmra.mxu3 %v8918_v30  ;;  %v9383_v30 = vpop.f32.mrf.mxu0 }
 0x5ef   : > { %v4766_v40 = vpop.f32.mrf.mxu3 }
 0x5f0   : > { %v9373_v59 = vadd.f32 %v4919_v61, %v4766_v40 }
 0x5f4   : > { %v4929_v11 = vpop.f32.mrf.mxu0 }
 0x5f7   : > { %v9378_v15 = vpop.f32.mrf.mxu3 }
 0x5fc   : > { %5609 = vmatmul.bf16.gmra.mxu3 %v8954_v12  ;;  %v9393_v34 = vpop.f32.mrf.mxu0 }
 0x5ff   : > { %v4771_v58 = vpop.f32.mrf.mxu3 }
 0x600   : > { %v9381_v63 = vadd.f32 %v4924_v13, %v4771_v58  ;;  %v5085_v58 = vpop.f32.mrf.mxu1 }
 0x604   : > { %v4934_v16 = vpop.f32.mrf.mxu0 }
 0x607   : > { %v9385_v0 = vpop.f32.mrf.mxu3 }
 0x60c   : > { %5614 = vmatmul.bf16.gmra.mxu3 %v8986_v6 }
 0x60f   : > { %v4776_v62 = vpop.f32.mrf.mxu3 }
 0x610   : > { %v9388_v48 = vadd.f32 %v4929_v11, %v4776_v62 }
 0x612   : > { %9703 = vst [vmem:[#allocation30_spill] sm:$0xff] %v9388_v48 }
 0x617   : > { %v9395_v12 = vpop.f32.mrf.mxu3 }
 0x61c   : > { %5619 = vmatmul.bf16.gmra.mxu3 %v9022_v36 }
 0x61f   : > { %v4781_v1 = vpop.f32.mrf.mxu3 }
 0x620   : > { %v9398_v32 = vadd.f32 %v4934_v16, %v4781_v1  ;;  %v5087_v1 = vpop.f32.mrf.mxu1 }
 0x622   : > { %9704 = vst [vmem:[#allocation29_spill] sm:$0xff] %v9398_v32 }
 0x627   : > { %v9400_v6 = vpop.f32.mrf.mxu3 }
 0x628   : > { %9705 = vst [vmem:[#allocation22_spill] sm:$0xff] %v9400_v6 }
 0x62c   : > { %5624 = vmatmul.bf16.gmra.mxu3 %v9056_v20  ;;  %v5367_v20 = vpop.f32.mrf.mxu2 }
 0x62f   : > { %v5585_v17 = vpop.f32.mrf.mxu3 }
 0x630   : > { %v5665_v61 = vadd.f32 %v5585_v17, %v9260_v8 }
 0x632   : > { %v5701_v42 = vadd.f32 %v9407_v3, %v5665_v61 }
 0x634   : > { %v5733_v11 = vmax.f32 %v5701_v42, 0.0  ;;  %v5369_v17 = vpop.f32.mrf.mxu2 }
 0x637   : > { %v5587_v40 = vpop.f32.mrf.mxu3 }
 0x638   : > { %v5666_v36 = vadd.f32 %v5587_v40, %v9274_v60 }
 0x63a   : > { %v5702_v13 = vadd.f32 %v9407_v3, %v5666_v36 }
 0x63c   : > { %v5734_v62 = vmax.f32 %v5702_v13, 0.0  ;;  %5629 = vmatmul.bf16.gmra.mxu3 %v9099_v55 }
 0x63e   : > { %v5765_v19 = vpack.c.bf16 %v5734_v62, %v5733_v11  ;;  %v5090_v11 = vpop.f32.mrf.mxu1  ;;  %v5372_v62 = vpop.f32.mrf.mxu2 }
 0x63f   : > { %v5590_v8 = vpop.f32.mrf.mxu3 }
 0x640   : > { %5857 = vmatmul.bf16.vlgmr.msra.gmra.mxu0 %v5765_v19  ;;  %v5667_v16 = vadd.f32 %v5590_v8, %v9286_v44 }
 0x642   : > { %v5703_v61 = vadd.f32 %v9407_v3, %v5667_v16 }
 0x644   : > { %v5735_v36 = vmax.f32 %v5703_v61, 0.0 }
 0x646   : > { %v5092_v6 = vpop.f32.mrf.mxu1 }
 0x647   : > { %v5592_v32 = vpop.f32.mrf.mxu3 }
 0x648   : > { %v5668_v60 = vadd.f32 %v5592_v32, %v9303_v25  ;;  %v5374_v32 = vpop.f32.mrf.mxu2 }
 0x64a   : > { %v5704_v40 = vadd.f32 %v9407_v3, %v5668_v60 }
 0x64c   : > { %v5736_v42 = vmax.f32 %v5704_v40, 0.0  ;;  %5634 = vmatmul.bf16.gmra.mxu3 %v9140_v18 }
 0x64e   : > { %v5766_v55 = vpack.c.bf16 %v5736_v42, %v5735_v36  ;;  %v5095_v36 = vpop.f32.mrf.mxu1 }
 0x64f   : > { %v5595_v13 = vpop.f32.mrf.mxu3 }
 0x650   : > { %5862 = vmatmul.bf16.gmra.mxu0 %v5766_v55  ;;  %v5669_v44 = vadd.f32 %v5595_v13, %v9313_v54  ;;  %v5377_v54 = vpop.f32.mrf.mxu2 }
 0x652   : > { %v5705_v8 = vadd.f32 %v9407_v3, %v5669_v44 }
 0x654   : > { %v5737_v61 = vmax.f32 %v5705_v8, 0.0 }
 0x656   : > { %v5097_v8 = vpop.f32.mrf.mxu1 }
 0x657   : > { %v5597_v19 = vpop.f32.mrf.mxu3 }
 0x658   : > { %v5670_v16 = vadd.f32 %v5597_v19, %v9321_v7 }
 0x65a   : > { %v5706_v25 = vadd.f32 %v9407_v3, %v5670_v16 }
 0x65c   : > { %v5738_v60 = vmax.f32 %v5706_v25, 0.0  ;;  %5639 = vmatmul.bf16.gmra.mxu3 %v9182_v38  ;;  %v5379_v25 = vpop.f32.mrf.mxu2 }
 0x65e   : > { %v5767_v18 = vpack.c.bf16 %v5738_v60, %v5737_v61  ;;  %v4882_v60 = vadd.f32 %v9185_v35, %v9250_v9 }
 0x65f   : > { %v5600_v40 = vpop.f32.mrf.mxu3 }
 0x660   : > { %5867 = vmatmul.bf16.gmra.mxu0 %v5767_v18  ;;  %v5671_v42 = vadd.f32 %v5600_v40, %v9327_v33  ;;  %v5153_v33 = vadd.f32 %v5085_v58, %v9241_v4  ;;  %v5154_v40 = vadd.f32 %v5087_v1, %v4882_v60  ;;  %v4887_v4 = vadd.f32 %v9230_v57, %v9277_v26 }
 0x661   : > { %v5155_v58 = vadd.f32 %v5090_v11, %v9271_v31  ;;  %v4892_v11 = vadd.f32 %v9263_v52, %v9306_v53 }
 0x662   : > { %v5707_v13 = vadd.f32 %v9407_v3, %v5671_v42  ;;  %v5435_v18 = vadd.f32 %v5367_v20, %v5153_v33 }
 0x663   : > { %v5437_v1 = vadd.f32 %v5372_v62, %v5155_v58 }
 0x664   : > { %v5739_v19 = vmax.f32 %v5707_v13, 0.0 }
 0x667   : > { %v5602_v55 = vpop.f32.mrf.mxu3 }
 0x668   : > { %v5672_v7 = vadd.f32 %v5602_v55, %v9335_v21  ;;  %v5436_v21 = vadd.f32 %v5369_v17, %v5154_v40 }
 0x66a   : > { %v5708_v44 = vadd.f32 %v9407_v3, %v5672_v7  ;;  %v5100_v7 = vpop.f32.mrf.mxu1 }
 0x66c   : > { %v5740_v16 = vmax.f32 %v5708_v44, 0.0  ;;  %5644 = vmatmul.bf16.gmra.mxu3 %v9227_v50  ;;  %v5382_v50 = vpop.f32.mrf.mxu2 }
 0x66e   : > { %v5768_v38 = vpack.c.bf16 %v5740_v16, %v5739_v19 }
 0x66f   : > { %v5605_v61 = vpop.f32.mrf.mxu3 }
 0x670   : > { %5872 = vmatmul.bf16.gmra.mxu0 %v5768_v38  ;;  %v5673_v42 = vadd.f32 %v5605_v61, %v5435_v18  ;;  %v5156_v38 = vadd.f32 %v5092_v6, %v4887_v4  ;;  %v5157_v6 = vadd.f32 %v5095_v36, %v9300_v5  ;;  %v4897_v5 = vadd.f32 %v9289_v49, %v9324_v28 }
 0x672   : > { %v5709_v13 = vadd.f32 %v9407_v3, %v5673_v42  ;;  %v5102_v20 = vpop.f32.mrf.mxu1  ;;  %v5438_v60 = vadd.f32 %v5374_v32, %v5156_v38  ;;  %v5439_v62 = vadd.f32 %v5377_v54, %v5157_v6  ;;  %v5158_v32 = vadd.f32 %v5097_v8, %v4892_v11 }
 0x673   : > { %v5159_v54 = vadd.f32 %v5100_v7, %v9318_v10  ;;  %v4902_v10 = vadd.f32 %v9316_v14, %v9338_v27  ;;  %v9464_v14 = vld [vmem:[%s9610_s9] ss:$0 sm:$0xff] }
 0x674   : > { %v5741_v16 = vmax.f32 %v5709_v13, 0.0  ;;  %v5384_v17 = vpop.f32.mrf.mxu2 }
 0x677   : > { %v5607_v55 = vpop.f32.mrf.mxu3 }
 0x678   : > { %v5674_v44 = vadd.f32 %v5607_v55, %v5436_v21 }
 0x67a   : > { %v5710_v19 = vadd.f32 %v9407_v3, %v5674_v44  ;;  %v5440_v44 = vadd.f32 %v5379_v25, %v5158_v32  ;;  %v5441_v25 = vadd.f32 %v5382_v50, %v5159_v54 }
 0x67c   : > { %v5742_v48 = vmax.f32 %v5710_v19, 0.0  ;;  %5649 = vmatmul.bf16.gmra.mxu3 %v9257_v29  ;;  %v5387_v57 = vpop.f32.mrf.mxu2 }
 0x67e   : > { %v5769_v35 = vpack.c.bf16 %v5742_v48, %v5741_v16  ;;  %v5105_v48 = vpop.f32.mrf.mxu1 }
 0x67f   : > { %v5610_v9 = vpop.f32.mrf.mxu3  ;;  %v5161_v7 = vadd.f32 %v5105_v48, %v9330_v45 }
 0x680   : > { %5877 = vmatmul.bf16.gmra.mxu0 %v5769_v35  ;;  %v5675_v61 = vadd.f32 %v5610_v9, %v5437_v1  ;;  %v5160_v1 = vadd.f32 %v5102_v20, %v4897_v5 }
 0x681   : > { %v5443_v50 = vadd.f32 %v5387_v57, %v5161_v7 }
 0x682   : > { %v5711_v18 = vadd.f32 %v9407_v3, %v5675_v61  ;;  %v5442_v61 = vadd.f32 %v5384_v17, %v5160_v1 }
 0x684   : > { %v5743_v42 = vmax.f32 %v5711_v18, 0.0  ;;  %v5389_v19 = vpop.f32.mrf.mxu2 }
 0x686   : > { %v5107_v13 = vpop.f32.mrf.mxu1 }
 0x687   : > { %v5612_v33 = vpop.f32.mrf.mxu3  ;;  %v5162_v17 = vadd.f32 %v5107_v13, %v4902_v10 }
 0x688   : > { %v5676_v40 = vadd.f32 %v5612_v33, %v5438_v60 }
 0x689   : > { %v5444_v6 = vadd.f32 %v5389_v19, %v5162_v17 }
 0x68a   : > { %v5712_v29 = vadd.f32 %v9407_v3, %v5676_v40 }
 0x68c   : > { %v5744_v21 = vmax.f32 %v5712_v29, 0.0  ;;  %5654 = vmatmul.bf16.gmra.mxu3 %v9283_v51  ;;  %v5392_v8 = vpop.f32.mrf.mxu2 }
 0x68e   : > { %v5770_v31 = vpack.c.bf16 %v5744_v21, %v5743_v42  ;;  %v5110_v36 = vpop.f32.mrf.mxu1 }
 0x68f   : > { %v5615_v26 = vpop.f32.mrf.mxu3 }
 0x690   : > { %5882 = vmatmul.bf16.gmra.mxu0 %v5770_v31  ;;  %v5677_v55 = vadd.f32 %v5615_v26, %v5439_v62  ;;  %v9454_v26 = vpop.f32.mrf.mxu0 }
 0x692   : > { %v5713_v35 = vadd.f32 %v9407_v3, %v5677_v55 }
 0x694   : > { %v5745_v4 = vmax.f32 %v5713_v35, 0.0  ;;  %v5394_v29 = vpop.f32.mrf.mxu2 }
 0x696   : > { %v5112_v40 = vpop.f32.mrf.mxu1 }
 0x697   : > { %v5617_v16 = vpop.f32.mrf.mxu3 }
 0x698   : > { %v5678_v9 = vadd.f32 %v5617_v16, %v5440_v44 }
 0x69a   : > { %v5714_v51 = vadd.f32 %v9407_v3, %v5678_v9  ;;  %v4907_v9 = vadd.f32 %v9332_v41, %v9349_v43 }
 0x69c   : > { %v5746_v58 = vmax.f32 %v5714_v51, 0.0  ;;  %5659 = vmatmul.bf16.gmra.mxu3 %v9297_v22  ;;  %v5397_v11 = vpop.f32.mrf.mxu2  ;;  %v5163_v51 = vadd.f32 %v5110_v36, %v9344_v47 }
 0x69e   : > { %v5771_v52 = vpack.c.bf16 %v5746_v58, %v5745_v4  ;;  %v5115_v20 = vpop.f32.mrf.mxu1  ;;  %v5445_v4 = vadd.f32 %v5392_v8, %v5163_v51  ;;  %v5164_v58 = vadd.f32 %v5112_v40, %v4907_v9  ;;  %v4912_v40 = vadd.f32 %v9346_v39, %v9357_v37 }
 0x69f   : > { %v5620_v53 = vpop.f32.mrf.mxu3 }
 0x6a0   : > { %5887 = vmatmul.bf16.gmra.mxu0 %v5771_v52  ;;  %v5679_v38 = vadd.f32 %v5620_v53, %v5441_v25  ;;  %v5446_v5 = vadd.f32 %v5394_v29, %v5164_v58 }
 0x6a2   : > { %v5715_v33 = vadd.f32 %v9407_v3, %v5679_v38 }
 0x6a4   : > { %v5747_v42 = vmax.f32 %v5715_v33, 0.0  ;;  %v5399_v16 = vpop.f32.mrf.mxu2 }
 0x6a6   : > { %v5117_v57 = vpop.f32.mrf.mxu1 }
 0x6a7   : > { %v5622_v60 = vpop.f32.mrf.mxu3 }
 0x6a8   : > { %v5680_v18 = vadd.f32 %v5622_v60, %v5442_v61 }
 0x6aa   : > { %v5716_v22 = vadd.f32 %v9407_v3, %v5680_v18 }
 0x6ac   : > { %v5748_v49 = vmax.f32 %v5716_v22, 0.0  ;;  %v5402_v43 = vpop.f32.mrf.mxu2  ;;  %v5165_v22 = vadd.f32 %v5115_v20, %v9352_v2 }
 0x6ae   : > { %v5772_v28 = vpack.c.bf16 %v5748_v49, %v5747_v42  ;;  %v5120_v1 = vpop.f32.mrf.mxu1  ;;  %v5447_v42 = vadd.f32 %v5397_v11, %v5165_v22 }
 0x6af   : > { %v5625_v21 = vpop.f32.mrf.mxu3 }
 0x6b0   : > { %5892 = vmatmul.bf16.gmra.mxu0 %v5772_v28  ;;  %v5681_v31 = vadd.f32 %v5625_v21, %v5443_v50  ;;  %v5166_v28 = vadd.f32 %v5117_v57, %v4912_v40 }
 0x6b2   : > { %v5717_v32 = vadd.f32 %v9407_v3, %v5681_v31  ;;  %v5448_v7 = vadd.f32 %v5399_v16, %v5166_v28 }
 0x6b4   : > { %v5749_v45 = vmax.f32 %v5717_v32, 0.0  ;;  %v5404_v49 = vpop.f32.mrf.mxu2 }
 0x6b6   : > { %v5122_v29 = vpop.f32.mrf.mxu1 }
 0x6b7   : > { %v5627_v62 = vpop.f32.mrf.mxu3 }
 0x6b8   : > { %v5682_v55 = vadd.f32 %v5627_v62, %v5444_v6 }
 0x6ba   : > { %v5718_v44 = vadd.f32 %v9407_v3, %v5682_v55 }
 0x6bc   : > { %v5750_v27 = vmax.f32 %v5718_v44, 0.0  ;;  %v5407_v62 = vpop.f32.mrf.mxu2 }
 0x6bd   : > { %v5858_v48 = vpop.f32.mrf.mxu0 }
 0x6be   : > { %v5859_v13 = vadd.f32 %v9464_v14, %v5858_v48  ;;  %v5773_v19 = vpack.c.bf16 %v5750_v27, %v5749_v45  ;;  %v5125_v2 = vpop.f32.mrf.mxu1  ;;  %v4917_v45 = vadd.f32 %v9359_v46, %v9368_v56  ;;  %v5167_v27 = vadd.f32 %v5120_v1, %v9364_v23 }
 0x6bf   : > { %v5630_v35 = vpop.f32.mrf.mxu3  ;;  %v4922_v1 = vadd.f32 %v9371_v24, %v9378_v15 }
 0x6c0   : > { %5938 = vst [vmem:[%s9470_s20] sm:$0xff] %v5859_v13  ;;  %5897 = vmatmul.bf16.gmra.mxu0 %v5773_v19  ;;  %v5683_v52 = vadd.f32 %v5630_v35, %v5445_v4  ;;  %v5449_v48 = vadd.f32 %v5402_v43, %v5167_v27  ;;  %v5168_v57 = vadd.f32 %v5122_v29, %v4917_v45 }
 0x6c2   : > { %v5719_v41 = vadd.f32 %v9407_v3, %v5683_v52  ;;  %v5450_v35 = vadd.f32 %v5404_v49, %v5168_v57 }
 0x6c4   : > { %v5751_v38 = vmax.f32 %v5719_v41, 0.0  ;;  %v5409_v51 = vpop.f32.mrf.mxu2 }
 0x6c5   : > { %v5860_v53 = vpop.f32.mrf.mxu0 }
 0x6c6   : > { %v5861_v54 = vadd.f32 %v9464_v14, %v5860_v53  ;;  %v5127_v16 = vpop.f32.mrf.mxu1 }
 0x6c7   : > { %v5632_v25 = vpop.f32.mrf.mxu3 }
 0x6c8   : > { %5939 = vst [vmem:[%s9470_s20 + $0x8] sm:$0xff] %v5861_v54  ;;  %v5684_v47 = vadd.f32 %v5632_v25, %v5446_v5 }
 0x6ca   : > { %v5720_v36 = vadd.f32 %v9407_v3, %v5684_v47  ;;  %v5169_v47 = vadd.f32 %v5125_v2, %v9373_v59 }
 0x6cc   : > { %v5752_v61 = vmax.f32 %v5720_v36, 0.0  ;;  %v5412_v43 = vpop.f32.mrf.mxu2  ;;  %v5451_v36 = vadd.f32 %v5407_v62, %v5169_v47 }
 0x6cd   : > { %v5863_v60 = vpop.f32.mrf.mxu0 }
 0x6ce   : > { %v5864_v8 = vadd.f32 %v9464_v14, %v5863_v60  ;;  %v5774_v33 = vpack.c.bf16 %v5752_v61, %v5751_v38  ;;  %v5130_v41 = vpop.f32.mrf.mxu1  ;;  %v5170_v38 = vadd.f32 %v5127_v16, %v4922_v1  ;;  %v9706_v16 = vld [vmem:[#allocation30_spill] sm:$0xff] }
 0x6cf   : > { %v5635_v18 = vpop.f32.mrf.mxu3 }
 0x6d0   : > { %5940 = vst [vmem:[%s9470_s20 + $0x10] sm:$0xff] %v5864_v8  ;;  %5902 = vmatmul.bf16.gmra.mxu0 %v5774_v33  ;;  %v5685_v21 = vadd.f32 %v5635_v18, %v5447_v42  ;;  %v5452_v8 = vadd.f32 %v5409_v51, %v5170_v38 }
 0x6d2   : > { %v5721_v31 = vadd.f32 %v9407_v3, %v5685_v21 }
 0x6d4   : > { %v5753_v37 = vmax.f32 %v5721_v31, 0.0  ;;  %v5414_v59 = vpop.f32.mrf.mxu2 }
 0x6d5   : > { %v5865_v10 = vpop.f32.mrf.mxu0 }
 0x6d6   : > { %v5866_v50 = vadd.f32 %v9464_v14, %v5865_v10  ;;  %v5132_v24 = vpop.f32.mrf.mxu1 }
 0x6d7   : > { %v5637_v17 = vpop.f32.mrf.mxu3 }
 0x6d8   : > { %5941 = vst [vmem:[%s9470_s20 + $0x18] sm:$0xff] %v5866_v50  ;;  %v5686_v6 = vadd.f32 %v5637_v17, %v5448_v7  ;;  %v4927_v7 = vadd.f32 %v9383_v30, %v9385_v0  ;;  %v5171_v50 = vadd.f32 %v5130_v41, %v9381_v63 }
 0x6da   : > { %v5722_v39 = vadd.f32 %v9407_v3, %v5686_v6  ;;  %v5453_v17 = vadd.f32 %v5412_v43, %v5171_v50  ;;  %v5172_v6 = vadd.f32 %v5132_v24, %v4927_v7 }
 0x6dc   : > { %v5754_v20 = vmax.f32 %v5722_v39, 0.0  ;;  %v5417_v2 = vpop.f32.mrf.mxu2 }
 0x6dd   : > { %v5868_v11 = vpop.f32.mrf.mxu0 }
 0x6de   : > { %v5869_v32 = vadd.f32 %v9464_v14, %v5868_v11  ;;  %v5775_v55 = vpack.c.bf16 %v5754_v20, %v5753_v37  ;;  %v5135_v31 = vpop.f32.mrf.mxu1  ;;  %v5454_v20 = vadd.f32 %v5414_v59, %v5172_v6 }
 0x6df   : > { %v5640_v44 = vpop.f32.mrf.mxu3 }
 0x6e0   : > { %5942 = vst [vmem:[%s9470_s20 + $0x20] sm:$0xff] %v5869_v32  ;;  %5907 = vmatmul.bf16.gmra.mxu0 %v5775_v55  ;;  %v5687_v13 = vadd.f32 %v5640_v44, %v5449_v48 }
 0x6e2   : > { %v5723_v58 = vadd.f32 %v9407_v3, %v5687_v13 }
 0x6e4   : > { %v5755_v23 = vmax.f32 %v5723_v58, 0.0  ;;  %v5419_v57 = vpop.f32.mrf.mxu2 }
 0x6e5   : > { %v5870_v19 = vpop.f32.mrf.mxu0 }
 0x6e6   : > { %v5871_v9 = vadd.f32 %v9464_v14, %v5870_v19  ;;  %v5137_v45 = vpop.f32.mrf.mxu1  ;;  %v4932_v19 = vadd.f32 %v9393_v34, %v9395_v12 }
 0x6e7   : > { %v5642_v4 = vpop.f32.mrf.mxu3 }
 0x6e8   : > { %5943 = vst [vmem:[%s9470_s20 + $0x28] sm:$0xff] %v5871_v9  ;;  %v5688_v52 = vadd.f32 %v5642_v4, %v5450_v35  ;;  %v5173_v35 = vadd.f32 %v5135_v31, %v9706_v16  ;;  %v5174_v51 = vadd.f32 %v5137_v45, %v4932_v19 }
 0x6ea   : > { %v5724_v46 = vadd.f32 %v9407_v3, %v5688_v52  ;;  %v5455_v9 = vadd.f32 %v5417_v2, %v5173_v35  ;;  %v5456_v52 = vadd.f32 %v5419_v57, %v5174_v51 }
 0x6ec   : > { %v5756_v56 = vmax.f32 %v5724_v46, 0.0 }
 0x6ed   : > { %v5873_v53 = vpop.f32.mrf.mxu0 }
 0x6ee   : > { %v5874_v5 = vadd.f32 %v9464_v14, %v5873_v53  ;;  %v5776_v54 = vpack.c.bf16 %v5756_v56, %v5755_v23 }
 0x6ef   : > { %v5645_v25 = vpop.f32.mrf.mxu3 }
 0x6f0   : > { %5944 = vst [vmem:[%s9470_s20 + $0x30] sm:$0xff] %v5874_v5  ;;  %5912 = vmatmul.bf16.gmra.mxu0 %v5776_v54  ;;  %v5689_v61 = vadd.f32 %v5645_v25, %v5451_v36  ;;  %v5140_v5 = vpop.f32.mrf.mxu1  ;;  %v5422_v54 = vpop.f32.mrf.mxu2  ;;  %v9707_v36 = vld [vmem:[#allocation22_spill] sm:$0xff] }
 0x6f1   : > { %v4937_v38 = vadd.f32 %v9454_v26, %v9707_v36 }
 0x6f2   : > { %v5725_v40 = vadd.f32 %v9407_v3, %v5689_v61  ;;  %v9708_v61 = vld [vmem:[#allocation29_spill] sm:$0xff] }
 0x6f4   : > { %v5757_v29 = vmax.f32 %v5725_v40, 0.0 }
 0x6f5   : > { %v5875_v60 = vpop.f32.mrf.mxu0 }
 0x6f6   : > { %v5876_v33 = vadd.f32 %v9464_v14, %v5875_v60  ;;  %v5175_v60 = vadd.f32 %v5140_v5, %v9708_v61 }
 0x6f7   : > { %v5647_v18 = vpop.f32.mrf.mxu3 }
 0x6f8   : > { %5945 = vst [vmem:[%s9470_s20 + $0x38] sm:$0xff] %v5876_v33  ;;  %v5690_v22 = vadd.f32 %v5647_v18, %v5452_v8  ;;  %v5457_v8 = vadd.f32 %v5422_v54, %v5175_v60  ;;  %v5142_v33 = vpop.f32.mrf.mxu1  ;;  %v5424_v18 = vpop.f32.mrf.mxu2 }
 0x6f9   : > { %v5176_v40 = vadd.f32 %v5142_v33, %v4937_v38 }
 0x6fa   : > { %v5726_v15 = vadd.f32 %v9407_v3, %v5690_v22 }
 0x6fc   : > { %v5758_v42 = vmax.f32 %v5726_v15, 0.0  ;;  %v5458_v15 = vadd.f32 %v5424_v18, %v5176_v40 }
 0x6fd   : > { %v5878_v49 = vpop.f32.mrf.mxu0 }
 0x6fe   : > { %v5879_v28 = vadd.f32 %v9464_v14, %v5878_v49  ;;  %v5777_v21 = vpack.c.bf16 %v5758_v42, %v5757_v29 }
 0x6ff   : > { %v5650_v10 = vpop.f32.mrf.mxu3 }
 0x700   : > { %5946 = vst [vmem:[%s9470_s20 + $0x40] sm:$0xff] %v5879_v28  ;;  %5917 = vmatmul.bf16.gmra.mxu0 %v5777_v21  ;;  %v5691_v39 = vadd.f32 %v5650_v10, %v5453_v17 }
 0x702   : > { %v5727_v32 = vadd.f32 %v9407_v3, %v5691_v39 }
 0x704   : > { %v5759_v63 = vmax.f32 %v5727_v32, 0.0 }
 0x705   : > { %v5880_v37 = vpop.f32.mrf.mxu0 }
 0x706   : > { %v5881_v62 = vadd.f32 %v9464_v14, %v5880_v37 }
 0x707   : > { %v5652_v11 = vpop.f32.mrf.mxu3 }
 0x708   : > { %5947 = vst [vmem:[%s9470_s20 + $0x48] sm:$0xff] %v5881_v62  ;;  %v5692_v55 = vadd.f32 %v5652_v11, %v5454_v20 }
 0x70a   : > { %v5728_v30 = vadd.f32 %v9407_v3, %v5692_v55 }
 0x70c   : > { %v5760_v0 = vmax.f32 %v5728_v30, 0.0 }
 0x70d   : > { %v5883_v44 = vpop.f32.mrf.mxu0 }
 0x70e   : > { %v5884_v27 = vadd.f32 %v9464_v14, %v5883_v44  ;;  %v5778_v48 = vpack.c.bf16 %v5760_v0, %v5759_v63 }
 0x70f   : > { %v5655_v13 = vpop.f32.mrf.mxu3 }
 0x710   : > { %5948 = vst [vmem:[%s9470_s20 + $0x50] sm:$0xff] %v5884_v27  ;;  %5922 = vmatmul.bf16.gmra.mxu0 %v5778_v48  ;;  %v5693_v4 = vadd.f32 %v5655_v13, %v5455_v9 }
 0x712   : > { %v5729_v56 = vadd.f32 %v9407_v3, %v5693_v4 }
 0x714   : > { %v5761_v12 = vmax.f32 %v5729_v56, 0.0 }
 0x715   : > { %v5885_v58 = vpop.f32.mrf.mxu0 }
 0x716   : > { %v5886_v46 = vadd.f32 %v9464_v14, %v5885_v58 }
 0x717   : > { %v5657_v23 = vpop.f32.mrf.mxu3 }
 0x718   : > { %5949 = vst [vmem:[%s9470_s20 + $0x58] sm:$0xff] %v5886_v46  ;;  %v5694_v53 = vadd.f32 %v5657_v23, %v5456_v52 }
 0x71a   : > { %v5730_v34 = vadd.f32 %v9407_v3, %v5694_v53 }
 0x71c   : > { %v5762_v25 = vmax.f32 %v5730_v34, 0.0 }
 0x71d   : > { %v5888_v1 = vpop.f32.mrf.mxu0 }
 0x71e   : > { %v5889_v41 = vadd.f32 %v9464_v14, %v5888_v1  ;;  %v5779_v47 = vpack.c.bf16 %v5762_v25, %v5761_v12 }
 0x71f   : > { %v5660_v43 = vpop.f32.mrf.mxu3 }
 0x720   : > { %5950 = vst [vmem:[%s9470_s20 + $0x60] sm:$0xff] %v5889_v41  ;;  %5927 = vmatmul.bf16.gmra.mxu0 %v5779_v47  ;;  %v5695_v22 = vadd.f32 %v5660_v43, %v5457_v8 }
 0x722   : > { %v5731_v42 = vadd.f32 %v9407_v3, %v5695_v22 }
 0x724   : > { %v5763_v28 = vmax.f32 %v5731_v42, 0.0 }
 0x725   : > { %v5890_v24 = vpop.f32.mrf.mxu0 }
 0x726   : > { %v5891_v59 = vadd.f32 %v9464_v14, %v5890_v24 }
 0x727   : > { %v5662_v29 = vpop.f32.mrf.mxu3 }
 0x728   : > { %5951 = vst [vmem:[%s9470_s20 + $0x68] sm:$0xff] %v5891_v59  ;;  %v5696_v26 = vadd.f32 %v5662_v29, %v5458_v15 }
 0x72a   : > { %v5732_v49 = vadd.f32 %v9407_v3, %v5696_v26 }
 0x72c   : > { %v5764_v21 = vmax.f32 %v5732_v49, 0.0 }
 0x72d   : > { %v5893_v10 = vpop.f32.mrf.mxu0 }
 0x72e   : > { %v5780_v7 = vpack.c.bf16 %v5764_v21, %v5763_v28  ;;  %v5894_v50 = vadd.f32 %v9464_v14, %v5893_v10 }
 0x730   : > { %5952 = vst [vmem:[%s9470_s20 + $0x70] sm:$0xff] %v5894_v50  ;;  %5932 = vmatmul.bf16.vlgmr.msrb.gmra.mxu2 %v5780_v7 }
 0x735   : > { %v5895_v17 = vpop.f32.mrf.mxu0 }
 0x736   : > { %v5896_v31 = vadd.f32 %v9464_v14, %v5895_v17 }
 0x738   : > { %5953 = vst [vmem:[%s9470_s20 + $0x78] sm:$0xff] %v5896_v31 }
 0x73d   : > { %v5898_v6 = vpop.f32.mrf.mxu0 }
 0x73e   : > { %v5899_v39 = vadd.f32 %v9464_v14, %v5898_v6 }
 0x740   : > { %5954 = vst [vmem:[%s9470_s20 + $0x80] sm:$0xff] %v5899_v39 }
 0x745   : > { %v5900_v3 = vpop.f32.mrf.mxu0 }
 0x746   : > { %v5901_v2 = vadd.f32 %v9464_v14, %v5900_v3 }
 0x748   : > { %5955 = vst [vmem:[%s9470_s20 + $0x88] sm:$0xff] %v5901_v2 }
 0x74d   : > { %v5903_v37 = vpop.f32.mrf.mxu0 }
 0x74e   : > { %v5904_v20 = vadd.f32 %v9464_v14, %v5903_v37 }
 0x750   : > { %5956 = vst [vmem:[%s9470_s20 + $0x90] sm:$0xff] %v5904_v20 }
 0x755   : > { %v5905_v62 = vpop.f32.mrf.mxu0 }
 0x756   : > { %v5906_v11 = vadd.f32 %v9464_v14, %v5905_v62 }
 0x758   : > { %5957 = vst [vmem:[%s9470_s20 + $0x98] sm:$0xff] %v5906_v11 }
 0x75d   : > { %v5908_v32 = vpop.f32.mrf.mxu0 }
 0x75e   : > { %v5909_v55 = vadd.f32 %v9464_v14, %v5908_v32 }
 0x760   : > { %5958 = vst [vmem:[%s9470_s20 + $0xa0] sm:$0xff] %v5909_v55 }
 0x765   : > { %v5910_v30 = vpop.f32.mrf.mxu0 }
 0x766   : > { %v5911_v63 = vadd.f32 %v9464_v14, %v5910_v30 }
 0x768   : > { %5959 = vst [vmem:[%s9470_s20 + $0xa8] sm:$0xff] %v5911_v63 }
 0x76d   : > { %v5913_v0 = vpop.f32.mrf.mxu0 }
 0x76e   : > { %v5914_v44 = vadd.f32 %v9464_v14, %v5913_v0 }
 0x770   : > { %5960 = vst [vmem:[%s9470_s20 + $0xb0] sm:$0xff] %v5914_v44 }
 0x775   : > { %v5915_v45 = vpop.f32.mrf.mxu0 }
 0x776   : > { %v5916_v27 = vadd.f32 %v9464_v14, %v5915_v45 }
 0x778   : > { %5961 = vst [vmem:[%s9470_s20 + $0xb8] sm:$0xff] %v5916_v27 }
 0x77d   : > { %v5918_v48 = vpop.f32.mrf.mxu0 }
 0x77e   : > { %v5919_v57 = vadd.f32 %v9464_v14, %v5918_v48 }
 0x780   : > { %5962 = vst [vmem:[%s9470_s20 + $0xc0] sm:$0xff] %v5919_v57 }
 0x785   : > { %v5920_v13 = vpop.f32.mrf.mxu0 }
 0x786   : > { %v5921_v19 = vadd.f32 %v9464_v14, %v5920_v13 }
 0x788   : > { %5963 = vst [vmem:[%s9470_s20 + $0xc8] sm:$0xff] %v5921_v19 }
 0x78d   : > { %v5923_v16 = vpop.f32.mrf.mxu0 }
 0x78e   : > { %v5924_v35 = vadd.f32 %v9464_v14, %v5923_v16 }
 0x790   : > { %5964 = vst [vmem:[%s9470_s20 + $0xd0] sm:$0xff] %v5924_v35 }
 0x795   : > { %v5925_v9 = vpop.f32.mrf.mxu0 }
 0x796   : > { %v5926_v51 = vadd.f32 %v9464_v14, %v5925_v9 }
 0x798   : > { %5965 = vst [vmem:[%s9470_s20 + $0xd8] sm:$0xff] %v5926_v51 }
 0x79d   : > { %v5928_v4 = vpop.f32.mrf.mxu0 }
 0x79e   : > { %v5929_v58 = vadd.f32 %v9464_v14, %v5928_v4 }
 0x7a0   : > { %5966 = vst [vmem:[%s9470_s20 + $0xe0] sm:$0xff] %v5929_v58 }
 0x7a5   : > { %v5930_v52 = vpop.f32.mrf.mxu0 }
 0x7a6   : > { %v5931_v46 = vadd.f32 %v9464_v14, %v5930_v52 }
 0x7a8   : > { %5967 = vst [vmem:[%s9470_s20 + $0xe8] sm:$0xff] %v5931_v46 }
 0x7b3   : > { %v5933_v23 = vpop.f32.mrf.mxu2 }
 0x7b4   : > { %v5934_v56 = vadd.f32 %v9464_v14, %v5933_v23 }
 0x7b6   : > { %5968 = vst [vmem:[%s9470_s20 + $0xf0] sm:$0xff] %v5934_v56 }
 0x7bb   : > { %v5935_v53 = vpop.f32.mrf.mxu2 }
 0x7bc   : > { %v5936_v5 = vadd.f32 %v9464_v14, %v5935_v53 }
 0x7be   : > { %5969 = vst [vmem:[%s9470_s20 + $0xf8] sm:$0xff] %v5936_v5 }
 0x7bf   : > { %7197 = shalt.err (!%p7194_p8)
}
 0x7c0   : > { %s7248_s30 = smov 128   ;;  %s7249_s20 = smov 8  }
 0x7c1   : > { %7037 = dma.vmem_to_hbm [thread:$0]  (%p7343_p5), %s5984_s27, 4096, %s5986_s28, %s5971_s29, %s7248_s30, %s7248_s30, %s7249_s20  }
 0x7c2 PF: > { %p7054_p9 = scmp.ge.s32.totalorder %s7240_s16, 2  ;;  %s6000_s25 = sand.u32 1, %s7228_s13  }
 0x7c3   : > { %s6001_s12 = scalar_lea.sflag [#allocation6], %s6000_s25 }
 0x7c4   : > { %p7047_p10 = pnand %p7054_p9, %p7347_p6 }
 0x7c6   : > { %p7048_p11 = pneg %p7047_p10 }
 0x7c8   : > { %7223 = dma.done.wait (%p7048_p11), %s6001_s12, 4096  }
 0x7c9   : > { %7225 = vsyncadd (%p7048_p11), %s6001_s12, 4294963200  ;;  %s9709_s17 = sld [smem:[#allocation13_spill]]  ;;  %p22_p12 = scmp.ge.s32.totalorder %s7330_s19, 4  }
 0x7ca   : > { %s9710_s13 = smov %s7232_s14  ;;  %s9711_s14 = smov %s7236_s15 }
 0x7cb   : > { %s9713_s16 = smov %s7330_s19  ;;  %24 = sbr.rel (!%p22_p12) target bundleno = 5 (0x5), region = 104 }
 0x7cf   : > { %s9712_s15 = smov %s9709_s17 }
 0x7d0   :  { %6007 = vsyncpa [#allocation5], 1 }
 0x7d1   :  { %6009 = vsyncpa [#allocation5 + $0x1], 1 }
 0x7d2   :  { %6010 = vsyncpa [#allocation8], 1 }
 0x7d3   :  { %6011 = vsyncpa [#allocation6], 1 }
 0x7d4   :  { %6013 = vsyncpa [#allocation6 + $0x1], 1 }

</bundles_post_ra>
